<compile_context>
chip_gen: v7x
topology: tpu7x:2x2x1
jax: 0.10.0
libtpu: 0.0.40
codegen_flags: <defaults>
</compile_context>

<pallas_src>
import jax
import jax.numpy as jnp
from jax.experimental import pallas as pl
from jax.experimental.pallas import tpu as pltpu

LRELU_SLOPE = 0.2
BN_EPS = 1e-5
KSZ = 4  # all DCGAN discriminator convs are 4x4


# ------------------------------ small helpers ------------------------------ #

def _round_up(x, m):
    return ((x + m - 1) // m) * m


def _pick_tile(m):
    """Largest M tile (multiple of 8, <=512) that divides m; else whole m."""
    for t in (512, 256, 128, 64, 32, 16, 8):
        if m % t == 0:
            return t
    return m


# ----------------------------- Pallas kernels ------------------------------ #

def _k_conv_lrelu(p_ref, w_ref, o_ref):
    # bf16 x bf16 MXU matmul with f32 accumulation, fused LeakyReLU(0.2).
    y = jnp.dot(p_ref[...], w_ref[...], preferred_element_type=jnp.float32)
    y = jnp.maximum(y, LRELU_SLOPE * y)
    o_ref[...] = y.astype(o_ref.dtype)


def _k_conv_stats(p_ref, w_ref, y_ref, s_ref):
    # Raw conv output (pre-BN) + per-tile partial BN statistics.
    y = jnp.dot(p_ref[...], w_ref[...], preferred_element_type=jnp.float32)
    y_ref[...] = y.astype(y_ref.dtype)
    ssum = jnp.sum(y, axis=0, keepdims=True)        # (1, C)
    ssq = jnp.sum(y * y, axis=0, keepdims=True)     # (1, C)
    s_ref[...] = jnp.concatenate([ssum, ssq], axis=0).reshape(s_ref.shape)


def _k_bn_lrelu(y_ref, sc_ref, sh_ref, o_ref):
    # Per-channel affine (folded BatchNorm) + LeakyReLU, f32 math.
    z = y_ref[...].astype(jnp.float32) * sc_ref[...] + sh_ref[...]
    z = jnp.maximum(z, LRELU_SLOPE * z)
    o_ref[...] = z.astype(o_ref.dtype)


def _k_conv_sigmoid(p_ref, w_ref, o_ref):
    y = jnp.dot(p_ref[...], w_ref[...], preferred_element_type=jnp.float32)
    o_ref[...] = jax.nn.sigmoid(y)


# ---------------------------- pallas_call wrappers -------------------------- #

def _matmul_call(kernel, patches, w_mat, *, out_dtype, with_stats):
    """Tiled (M-grid, parallel) fused conv-as-matmul kernel launch."""
    m, k = patches.shape
    cpad = w_mat.shape[1]
    tm = _pick_tile(m)
    n_tiles = m // tm

    in_specs = [
        pl.BlockSpec((tm, k), lambda i: (i, 0)),      # patches tile
        pl.BlockSpec((k, cpad), lambda i: (0, 0)),    # full weight, resident
    ]
    out_shape = [jax.ShapeDtypeStruct((m, cpad), out_dtype)]
    out_specs = [pl.BlockSpec((tm, cpad), lambda i: (i, 0))]
    if with_stats:
        out_shape.append(jax.ShapeDtypeStruct((n_tiles, 2, cpad), jnp.float32))
        out_specs.append(pl.BlockSpec((1, 2, cpad), lambda i: (i, 0, 0)))

    return pl.pallas_call(
        kernel,
        grid=(n_tiles,),
        in_specs=in_specs,
        out_specs=tuple(out_specs) if with_stats else out_specs[0],
        out_shape=tuple(out_shape) if with_stats else out_shape[0],
        compiler_params=pltpu.CompilerParams(dimension_semantics=("parallel",)),
    )(patches, w_mat)


def _bn_lrelu_call(y, scale, shift):
    """Tiled BatchNorm(affine-folded) + LeakyReLU over the (M, Cpad) conv output."""
    m, cpad = y.shape
    tm = _pick_tile(m)
    return pl.pallas_call(
        _k_bn_lrelu,
        grid=(m // tm,),
        in_specs=[
            pl.BlockSpec((tm, cpad), lambda i: (i, 0)),
            pl.BlockSpec((1, cpad), lambda i: (0, 0)),
            pl.BlockSpec((1, cpad), lambda i: (0, 0)),
        ],
        out_specs=pl.BlockSpec((tm, cpad), lambda i: (i, 0)),
        out_shape=jax.ShapeDtypeStruct((m, cpad), jnp.bfloat16),
        compiler_params=pltpu.CompilerParams(dimension_semantics=("parallel",)),
    )(y, scale, shift)


# ------------------------------- JAX glue ---------------------------------- #

def _im2col(x_nhwc, stride, pad):
    """(N, H, W, C) -> patches (N*OH*OW, 16*C), plus (OH, OW). Tap-major, C-minor."""
    x = jnp.pad(x_nhwc, ((0, 0), (pad, pad), (pad, pad), (0, 0)))
    n, h, w, c = x.shape
    oh = (h - KSZ) // stride + 1
    ow = (w - KSZ) // stride + 1
    pieces = []
    for i in range(KSZ):
        for j in range(KSZ):
            pieces.append(x[:, i:i + stride * oh:stride, j:j + stride * ow:stride, :])
    patches = jnp.concatenate(pieces, axis=-1)          # (N, OH, OW, 16*C)
    return patches.reshape(n * oh * ow, KSZ * KSZ * c), oh, ow


def _w_to_mat(w_oihw, cin_pad, cout_pad):
    """PyTorch conv weight (Cout, Cin, KH, KW) -> bf16 (KH*KW*Cin_pad, Cout_pad),
    matching the (kh, kw, cin) flattening order of _im2col. Zero padded."""
    c_out, c_in, kh, kw = w_oihw.shape
    w = jnp.transpose(w_oihw, (2, 3, 1, 0))             # (kh, kw, cin, cout)
    w = jnp.pad(w, ((0, 0), (0, 0), (0, cin_pad - c_in), (0, cout_pad - c_out)))
    return w.reshape(kh * kw * cin_pad, cout_pad).astype(jnp.bfloat16)


def _bn_affine(stats, count, gamma, beta):
    """Reduce per-tile (sum, sumsq) partials -> per-channel scale/shift (f32)."""
    ssum = jnp.sum(stats[:, 0, :], axis=0)
    ssq = jnp.sum(stats[:, 1, :], axis=0)
    mean = ssum / count
    var = jnp.maximum(ssq / count - mean * mean, 0.0)   # biased var, training mode
    scale = gamma * jax.lax.rsqrt(var + BN_EPS)
    shift = beta - mean * scale
    return scale[None, :], shift[None, :]               # (1, Cpad) each


def init_params(keys, nc, ndf):
    def conv_w(k, c_out, c_in, ksz):
        return 0.02 * jax.random.normal(k, (c_out, c_in, ksz, ksz), jnp.float32)

    return {
        "w1": conv_w(keys[0], ndf, nc, 4),
        "w2": conv_w(keys[1], ndf * 2, ndf, 4),
        "g2": jnp.ones((ndf * 2,), jnp.float32),
        "b2": jnp.zeros((ndf * 2,), jnp.float32),
        "w3": conv_w(keys[2], ndf * 4, ndf * 2, 4),
        "g3": jnp.ones((ndf * 4,), jnp.float32),
        "b3": jnp.zeros((ndf * 4,), jnp.float32),
        "w4": conv_w(keys[3], ndf * 8, ndf * 4, 4),
        "g4": jnp.ones((ndf * 8,), jnp.float32),
        "b4": jnp.zeros((ndf * 8,), jnp.float32),
        "w5": conv_w(keys[4], 1, ndf * 8, 4),
    }


@jax.jit
def discriminator_forward(x_nchw, params):
    """Mirrors Discriminator.forward (training-mode BatchNorm, bias-free convs).

    x_nchw: (N, nc, 64, 64) float32  ->  (N,) float32 (post-sigmoid).
    """
    n, nc = x_nchw.shape[0], x_nchw.shape[1]
    x = jnp.transpose(x_nchw, (0, 2, 3, 1)).astype(jnp.bfloat16)   # NHWC bf16

    # ---- Layer 1: Conv(nc -> ndf, 4, s2, p1) + LeakyReLU(0.2) ----
    w1 = params["w1"]
    ndf = w1.shape[0]
    cin_p = _round_up(nc, 8)            # K = 16*cin_p is a multiple of 128
    cout_p = _round_up(ndf, 128)        # lane-dense output
    if cin_p != nc:
        x = jnp.pad(x, ((0, 0), (0, 0), (0, 0), (0, cin_p - nc)))
    p, oh, ow = _im2col(x, 2, 1)
    a = _matmul_call(_k_conv_lrelu, p, _w_to_mat(w1, cin_p, cout_p),
                     out_dtype=jnp.bfloat16, with_stats=False)
    act = a[:, :ndf].reshape(n, oh, ow, ndf)

    # ---- Layers 2-4: Conv(4, s2, p1) + BatchNorm(batch stats) + LeakyReLU ----
    for wk, gk, bk in (("w2", "g2", "b2"), ("w3", "g3", "b3"), ("w4", "g4", "b4")):
        w = params[wk]
        cout, cin = w.shape[0], w.shape[1]
        cin_p = _round_up(cin, 8)
        cout_p = _round_up(cout, 128)
        if cin_p != cin:
            act = jnp.pad(act, ((0, 0), (0, 0), (0, 0), (0, cin_p - cin)))
        p, oh, ow = _im2col(act, 2, 1)
        y, stats = _matmul_call(_k_conv_stats, p, _w_to_mat(w, cin_p, cout_p),
                                out_dtype=jnp.bfloat16, with_stats=True)
        gamma = jnp.pad(params[gk].astype(jnp.float32), (0, cout_p - cout))
        beta = jnp.pad(params[bk].astype(jnp.float32), (0, cout_p - cout))
        scale, shift = _bn_affine(stats, p.shape[0], gamma, beta)
        a = _bn_lrelu_call(y, scale, shift)
        act = a[:, :cout].reshape(n, oh, ow, cout)

    # ---- Layer 5: Conv(8ndf -> 1, 4, s1, p0) + Sigmoid ----
    w5 = params["w5"]
    cin = w5.shape[1]
    cin_p = _round_up(cin, 8)
    if cin_p != cin:
        act = jnp.pad(act, ((0, 0), (0, 0), (0, 0), (0, cin_p - cin)))
    p, _, _ = _im2col(act, 1, 0)        # 4x4 input, 4x4 kernel -> 1x1, M = N
    logits = _matmul_call(_k_conv_sigmoid, p, _w_to_mat(w5, cin_p, 128),
                          out_dtype=jnp.float32, with_stats=False)

    # output.view(-1, 1).squeeze(1) -> (N,); only channel 0 is real, rest is pad.
    return logits[:, 0]


# --------------------------------- main ------------------------------------ #

if __name__ == "__main__":
    key = jax.random.PRNGKey(0)
    k_x, *k_params = jax.random.split(key, 6)

    # Small but shape-consistent config: the DCGAN discriminator needs 64x64
    # spatial input so the final 4x4 / stride-1 conv yields a 1x1 map.
    N, nc, ndf = 2, 3, 8
    x = jax.random.normal(k_x, (N, nc, 64, 64), jnp.float32)
    params = init_params(k_params, nc, ndf)

    out = jax.block_until_ready(discriminator_forward(x, params))

    assert out.shape == (N,), out.shape
    assert bool(jnp.all((out >= 0.0) & (out <= 1.0))), out
    print("KERNEL_OK")
</pallas_src>

<mosaic_0001>
module attributes {stable_mosaic.version = 11 : i64} {
  func.func @_k_conv_lrelu(%arg0: i32, %arg1: memref<512x128xbf16, #tpu.memory_space<vmem>>, %arg2: memref<128x128xbf16, #tpu.memory_space<vmem>>, %arg3: memref<512x128xbf16, #tpu.memory_space<vmem>>) attributes {dimension_semantics = [#tpu.dimension_semantics<parallel>], iteration_bounds = array<i64: 4>, scalar_prefetch = 0 : i64, scratch_operands = 0 : i64, tpu.core_type = #tpu.core_type<tc>, window_params = [{transform_indices = @transform_0, window_bounds = array<i64: 512, 128>}, {pipeline_mode = #tpu.pipeline_mode<synchronous>, transform_indices = @transform_1, window_bounds = array<i64: 128, 128>}, {transform_indices = @transform_2, window_bounds = array<i64: 512, 128>}]} {
    %c0 = arith.constant 0 : index
    %c0_0 = arith.constant 0 : index
    %0 = vector.load %arg1[%c0, %c0_0] : memref<512x128xbf16, #tpu.memory_space<vmem>>, vector<512x128xbf16>
    %c0_1 = arith.constant 0 : index
    %c0_2 = arith.constant 0 : index
    %1 = vector.load %arg2[%c0_1, %c0_2] : memref<128x128xbf16, #tpu.memory_space<vmem>>, vector<128x128xbf16>
    %cst = arith.constant dense<0.000000e+00> : vector<512x128xf32>
    %2 = tpu.matmul %0, %1, %cst {dimension_numbers = #tpu.dot_dimension_numbers<[1], [0], [0], [1], [0, 0, 1, 1], [], []>} : vector<512x128xbf16>, vector<128x128xbf16>, vector<512x128xf32> -> vector<512x128xf32>
    %cst_3 = arith.constant 2.000000e-01 : f32
    %3 = vector.broadcast %cst_3 : f32 to vector<512x128xf32>
    %4 = arith.mulf %3, %2 : vector<512x128xf32>
    %5 = arith.maximumf %2, %4 : vector<512x128xf32>
    %6 = arith.truncf %5 : vector<512x128xf32> to vector<512x128xbf16>
    %c0_4 = arith.constant 0 : index
    %c0_5 = arith.constant 0 : index
    %7 = vector.load %arg3[%c0_4, %c0_5] : memref<512x128xbf16, #tpu.memory_space<vmem>>, vector<512x128xbf16>
    tpu.vector_store %arg3[%c0_4, %c0_5], %6 {strides = array<i32>} : memref<512x128xbf16, #tpu.memory_space<vmem>>, vector<512x128xbf16>,
    return
  }
  func.func @transform_0(%arg0: i32) -> (i32, i32) {
    %c0_i32 = arith.constant 0 : i32
    %c0_i32_0 = arith.constant 0 : i32
    return %arg0, %c0_i32 : i32, i32
  }
  func.func @transform_1(%arg0: i32) -> (i32, i32) {
    %c0_i32 = arith.constant 0 : i32
    %c0_i32_0 = arith.constant 0 : i32
    %c0_i32_1 = arith.constant 0 : i32
    return %c0_i32, %c0_i32_0 : i32, i32
  }
  func.func @transform_2(%arg0: i32) -> (i32, i32) {
    %c0_i32 = arith.constant 0 : i32
    %c0_i32_0 = arith.constant 0 : i32
    return %arg0, %c0_i32 : i32, i32
  }
}

module attributes {stable_mosaic.version = 11 : i64} {
  func.func @_k_conv_stats(%arg0: i32, %arg1: memref<512x128xbf16, #tpu.memory_space<vmem>>, %arg2: memref<128x128xbf16, #tpu.memory_space<vmem>>, %arg3: memref<512x128xbf16, #tpu.memory_space<vmem>>, %arg4: memref<1x2x128xf32, #tpu.memory_space<vmem>>) attributes {dimension_semantics = [#tpu.dimension_semantics<parallel>], iteration_bounds = array<i64: 1>, scalar_prefetch = 0 : i64, scratch_operands = 0 : i64, tpu.core_type = #tpu.core_type<tc>, window_params = [{transform_indices = @transform_0, window_bounds = array<i64: 512, 128>}, {pipeline_mode = #tpu.pipeline_mode<synchronous>, transform_indices = @transform_1, window_bounds = array<i64: 128, 128>}, {transform_indices = @transform_2, window_bounds = array<i64: 512, 128>}, {transform_indices = @transform_3, window_bounds = array<i64: 1, 2, 128>}]} {
    %c0 = arith.constant 0 : index
    %c0_0 = arith.constant 0 : index
    %0 = vector.load %arg1[%c0, %c0_0] : memref<512x128xbf16, #tpu.memory_space<vmem>>, vector<512x128xbf16>
    %c0_1 = arith.constant 0 : index
    %c0_2 = arith.constant 0 : index
    %1 = vector.load %arg2[%c0_1, %c0_2] : memref<128x128xbf16, #tpu.memory_space<vmem>>, vector<128x128xbf16>
    %cst = arith.constant dense<0.000000e+00> : vector<512x128xf32>
    %2 = tpu.matmul %0, %1, %cst {dimension_numbers = #tpu.dot_dimension_numbers<[1], [0], [0], [1], [0, 0, 1, 1], [], []>} : vector<512x128xbf16>, vector<128x128xbf16>, vector<512x128xf32> -> vector<512x128xf32>
    %3 = arith.truncf %2 : vector<512x128xf32> to vector<512x128xbf16>
    %c0_3 = arith.constant 0 : index
    %c0_4 = arith.constant 0 : index
    %4 = vector.load %arg3[%c0_3, %c0_4] : memref<512x128xbf16, #tpu.memory_space<vmem>>, vector<512x128xbf16>
    tpu.vector_store %arg3[%c0_3, %c0_4], %3 {strides = array<i32>} : memref<512x128xbf16, #tpu.memory_space<vmem>>, vector<512x128xbf16>,
    %cst_5 = arith.constant dense<0.000000e+00> : vector<128xf32>
    %5 = vector.multi_reduction <add>, %2, %cst_5 [0] : vector<512x128xf32> to vector<128xf32>
    %6 = vector.shape_cast %5 : vector<128xf32> to vector<1x128xf32>
    %7 = arith.mulf %2, %2 : vector<512x128xf32>
    %cst_6 = arith.constant dense<0.000000e+00> : vector<128xf32>
    %8 = vector.multi_reduction <add>, %7, %cst_6 [0] : vector<512x128xf32> to vector<128xf32>
    %9 = vector.shape_cast %8 : vector<128xf32> to vector<1x128xf32>
    %10 = tpu.concatenate %6, %9 in 0 : vector<1x128xf32>, vector<1x128xf32> -> vector<2x128xf32>
    %11 = vector.shape_cast %10 : vector<2x128xf32> to vector<1x2x128xf32>
    %c0_7 = arith.constant 0 : index
    %c0_8 = arith.constant 0 : index
    %c0_9 = arith.constant 0 : index
    %12 = vector.load %arg4[%c0_7, %c0_8, %c0_9] : memref<1x2x128xf32, #tpu.memory_space<vmem>>, vector<1x2x128xf32>
    tpu.vector_store %arg4[%c0_7, %c0_8, %c0_9], %11 {strides = array<i32>} : memref<1x2x128xf32, #tpu.memory_space<vmem>>, vector<1x2x128xf32>,
    return
  }
  func.func @transform_0(%arg0: i32) -> (i32, i32) {
    %c0_i32 = arith.constant 0 : i32
    %c0_i32_0 = arith.constant 0 : i32
    return %arg0, %c0_i32 : i32, i32
  }
  func.func @transform_1(%arg0: i32) -> (i32, i32) {
    %c0_i32 = arith.constant 0 : i32
    %c0_i32_0 = arith.constant 0 : i32
    %c0_i32_1 = arith.constant 0 : i32
    return %c0_i32, %c0_i32_0 : i32, i32
  }
  func.func @transform_2(%arg0: i32) -> (i32, i32) {
    %c0_i32 = arith.constant 0 : i32
    %c0_i32_0 = arith.constant 0 : i32
    return %arg0, %c0_i32 : i32, i32
  }
  func.func @transform_3(%arg0: i32) -> (i32, i32, i32) {
    %c0_i32 = arith.constant 0 : i32
    %c0_i32_0 = arith.constant 0 : i32
    %c0_i32_1 = arith.constant 0 : i32
    return %arg0, %c0_i32, %c0_i32_0 : i32, i32, i32
  }
}

module attributes {stable_mosaic.version = 11 : i64} {
  func.func @_k_bn_lrelu(%arg0: i32, %arg1: memref<512x128xbf16, #tpu.memory_space<vmem>>, %arg2: memref<1x128xf32, #tpu.memory_space<vmem>>, %arg3: memref<1x128xf32, #tpu.memory_space<vmem>>, %arg4: memref<512x128xbf16, #tpu.memory_space<vmem>>) attributes {dimension_semantics = [#tpu.dimension_semantics<parallel>], iteration_bounds = array<i64: 1>, scalar_prefetch = 0 : i64, scratch_operands = 0 : i64, tpu.core_type = #tpu.core_type<tc>, window_params = [{transform_indices = @transform_0, window_bounds = array<i64: 512, 128>}, {pipeline_mode = #tpu.pipeline_mode<synchronous>, transform_indices = @transform_1, window_bounds = array<i64: 1, 128>}, {pipeline_mode = #tpu.pipeline_mode<synchronous>, transform_indices = @transform_2, window_bounds = array<i64: 1, 128>}, {transform_indices = @transform_3, window_bounds = array<i64: 512, 128>}]} {
    %c0 = arith.constant 0 : index
    %c0_0 = arith.constant 0 : index
    %0 = vector.load %arg1[%c0, %c0_0] : memref<512x128xbf16, #tpu.memory_space<vmem>>, vector<512x128xbf16>
    %1 = arith.extf %0 : vector<512x128xbf16> to vector<512x128xf32>
    %c0_1 = arith.constant 0 : index
    %c0_2 = arith.constant 0 : index
    %2 = vector.load %arg2[%c0_1, %c0_2] : memref<1x128xf32, #tpu.memory_space<vmem>>, vector<1x128xf32>
    %3 = vector.broadcast %2 : vector<1x128xf32> to vector<512x128xf32>
    %4 = arith.mulf %1, %3 : vector<512x128xf32>
    %c0_3 = arith.constant 0 : index
    %c0_4 = arith.constant 0 : index
    %5 = vector.load %arg3[%c0_3, %c0_4] : memref<1x128xf32, #tpu.memory_space<vmem>>, vector<1x128xf32>
    %6 = vector.broadcast %5 : vector<1x128xf32> to vector<512x128xf32>
    %7 = arith.addf %4, %6 : vector<512x128xf32>
    %cst = arith.constant 2.000000e-01 : f32
    %8 = vector.broadcast %cst : f32 to vector<512x128xf32>
    %9 = arith.mulf %8, %7 : vector<512x128xf32>
    %10 = arith.maximumf %7, %9 : vector<512x128xf32>
    %11 = arith.truncf %10 : vector<512x128xf32> to vector<512x128xbf16>
    %c0_5 = arith.constant 0 : index
    %c0_6 = arith.constant 0 : index
    %12 = vector.load %arg4[%c0_5, %c0_6] : memref<512x128xbf16, #tpu.memory_space<vmem>>, vector<512x128xbf16>
    tpu.vector_store %arg4[%c0_5, %c0_6], %11 {strides = array<i32>} : memref<512x128xbf16, #tpu.memory_space<vmem>>, vector<512x128xbf16>,
    return
  }
  func.func @transform_0(%arg0: i32) -> (i32, i32) {
    %c0_i32 = arith.constant 0 : i32
    %c0_i32_0 = arith.constant 0 : i32
    return %arg0, %c0_i32 : i32, i32
  }
  func.func @transform_1(%arg0: i32) -> (i32, i32) {
    %c0_i32 = arith.constant 0 : i32
    %c0_i32_0 = arith.constant 0 : i32
    %c0_i32_1 = arith.constant 0 : i32
    return %c0_i32, %c0_i32_0 : i32, i32
  }
  func.func @transform_2(%arg0: i32) -> (i32, i32) {
    %c0_i32 = arith.constant 0 : i32
    %c0_i32_0 = arith.constant 0 : i32
    %c0_i32_1 = arith.constant 0 : i32
    return %c0_i32, %c0_i32_0 : i32, i32
  }
  func.func @transform_3(%arg0: i32) -> (i32, i32) {
    %c0_i32 = arith.constant 0 : i32
    %c0_i32_0 = arith.constant 0 : i32
    return %arg0, %c0_i32 : i32, i32
  }
}

module attributes {stable_mosaic.version = 11 : i64} {
  func.func @_k_conv_stats(%arg0: i32, %arg1: memref<128x256xbf16, #tpu.memory_space<vmem>>, %arg2: memref<256x128xbf16, #tpu.memory_space<vmem>>, %arg3: memref<128x128xbf16, #tpu.memory_space<vmem>>, %arg4: memref<1x2x128xf32, #tpu.memory_space<vmem>>) attributes {dimension_semantics = [#tpu.dimension_semantics<parallel>], iteration_bounds = array<i64: 1>, scalar_prefetch = 0 : i64, scratch_operands = 0 : i64, tpu.core_type = #tpu.core_type<tc>, window_params = [{transform_indices = @transform_0, window_bounds = array<i64: 128, 256>}, {pipeline_mode = #tpu.pipeline_mode<synchronous>, transform_indices = @transform_1, window_bounds = array<i64: 256, 128>}, {transform_indices = @transform_2, window_bounds = array<i64: 128, 128>}, {transform_indices = @transform_3, window_bounds = array<i64: 1, 2, 128>}]} {
    %c0 = arith.constant 0 : index
    %c0_0 = arith.constant 0 : index
    %0 = vector.load %arg1[%c0, %c0_0] : memref<128x256xbf16, #tpu.memory_space<vmem>>, vector<128x256xbf16>
    %c0_1 = arith.constant 0 : index
    %c0_2 = arith.constant 0 : index
    %1 = vector.load %arg2[%c0_1, %c0_2] : memref<256x128xbf16, #tpu.memory_space<vmem>>, vector<256x128xbf16>
    %cst = arith.constant dense<0.000000e+00> : vector<128x128xf32>
    %2 = tpu.matmul %0, %1, %cst {dimension_numbers = #tpu.dot_dimension_numbers<[1], [0], [0], [1], [0, 0, 1, 1], [], []>} : vector<128x256xbf16>, vector<256x128xbf16>, vector<128x128xf32> -> vector<128x128xf32>
    %3 = arith.truncf %2 : vector<128x128xf32> to vector<128x128xbf16>
    %c0_3 = arith.constant 0 : index
    %c0_4 = arith.constant 0 : index
    %4 = vector.load %arg3[%c0_3, %c0_4] : memref<128x128xbf16, #tpu.memory_space<vmem>>, vector<128x128xbf16>
    tpu.vector_store %arg3[%c0_3, %c0_4], %3 {strides = array<i32>} : memref<128x128xbf16, #tpu.memory_space<vmem>>, vector<128x128xbf16>,
    %cst_5 = arith.constant dense<0.000000e+00> : vector<128xf32>
    %5 = vector.multi_reduction <add>, %2, %cst_5 [0] : vector<128x128xf32> to vector<128xf32>
    %6 = vector.shape_cast %5 : vector<128xf32> to vector<1x128xf32>
    %7 = arith.mulf %2, %2 : vector<128x128xf32>
    %cst_6 = arith.constant dense<0.000000e+00> : vector<128xf32>
    %8 = vector.multi_reduction <add>, %7, %cst_6 [0] : vector<128x128xf32> to vector<128xf32>
    %9 = vector.shape_cast %8 : vector<128xf32> to vector<1x128xf32>
    %10 = tpu.concatenate %6, %9 in 0 : vector<1x128xf32>, vector<1x128xf32> -> vector<2x128xf32>
    %11 = vector.shape_cast %10 : vector<2x128xf32> to vector<1x2x128xf32>
    %c0_7 = arith.constant 0 : index
    %c0_8 = arith.constant 0 : index
    %c0_9 = arith.constant 0 : index
    %12 = vector.load %arg4[%c0_7, %c0_8, %c0_9] : memref<1x2x128xf32, #tpu.memory_space<vmem>>, vector<1x2x128xf32>
    tpu.vector_store %arg4[%c0_7, %c0_8, %c0_9], %11 {strides = array<i32>} : memref<1x2x128xf32, #tpu.memory_space<vmem>>, vector<1x2x128xf32>,
    return
  }
  func.func @transform_0(%arg0: i32) -> (i32, i32) {
    %c0_i32 = arith.constant 0 : i32
    %c0_i32_0 = arith.constant 0 : i32
    return %arg0, %c0_i32 : i32, i32
  }
  func.func @transform_1(%arg0: i32) -> (i32, i32) {
    %c0_i32 = arith.constant 0 : i32
    %c0_i32_0 = arith.constant 0 : i32
    %c0_i32_1 = arith.constant 0 : i32
    return %c0_i32, %c0_i32_0 : i32, i32
  }
  func.func @transform_2(%arg0: i32) -> (i32, i32) {
    %c0_i32 = arith.constant 0 : i32
    %c0_i32_0 = arith.constant 0 : i32
    return %arg0, %c0_i32 : i32, i32
  }
  func.func @transform_3(%arg0: i32) -> (i32, i32, i32) {
    %c0_i32 = arith.constant 0 : i32
    %c0_i32_0 = arith.constant 0 : i32
    %c0_i32_1 = arith.constant 0 : i32
    return %arg0, %c0_i32, %c0_i32_0 : i32, i32, i32
  }
}

module attributes {stable_mosaic.version = 11 : i64} {
  func.func @_k_bn_lrelu(%arg0: i32, %arg1: memref<128x128xbf16, #tpu.memory_space<vmem>>, %arg2: memref<1x128xf32, #tpu.memory_space<vmem>>, %arg3: memref<1x128xf32, #tpu.memory_space<vmem>>, %arg4: memref<128x128xbf16, #tpu.memory_space<vmem>>) attributes {dimension_semantics = [#tpu.dimension_semantics<parallel>], iteration_bounds = array<i64: 1>, scalar_prefetch = 0 : i64, scratch_operands = 0 : i64, tpu.core_type = #tpu.core_type<tc>, window_params = [{transform_indices = @transform_0, window_bounds = array<i64: 128, 128>}, {pipeline_mode = #tpu.pipeline_mode<synchronous>, transform_indices = @transform_1, window_bounds = array<i64: 1, 128>}, {pipeline_mode = #tpu.pipeline_mode<synchronous>, transform_indices = @transform_2, window_bounds = array<i64: 1, 128>}, {transform_indices = @transform_3, window_bounds = array<i64: 128, 128>}]} {
    %c0 = arith.constant 0 : index
    %c0_0 = arith.constant 0 : index
    %0 = vector.load %arg1[%c0, %c0_0] : memref<128x128xbf16, #tpu.memory_space<vmem>>, vector<128x128xbf16>
    %1 = arith.extf %0 : vector<128x128xbf16> to vector<128x128xf32>
    %c0_1 = arith.constant 0 : index
    %c0_2 = arith.constant 0 : index
    %2 = vector.load %arg2[%c0_1, %c0_2] : memref<1x128xf32, #tpu.memory_space<vmem>>, vector<1x128xf32>
    %3 = vector.broadcast %2 : vector<1x128xf32> to vector<128x128xf32>
    %4 = arith.mulf %1, %3 : vector<128x128xf32>
    %c0_3 = arith.constant 0 : index
    %c0_4 = arith.constant 0 : index
    %5 = vector.load %arg3[%c0_3, %c0_4] : memref<1x128xf32, #tpu.memory_space<vmem>>, vector<1x128xf32>
    %6 = vector.broadcast %5 : vector<1x128xf32> to vector<128x128xf32>
    %7 = arith.addf %4, %6 : vector<128x128xf32>
    %cst = arith.constant 2.000000e-01 : f32
    %8 = vector.broadcast %cst : f32 to vector<128x128xf32>
    %9 = arith.mulf %8, %7 : vector<128x128xf32>
    %10 = arith.maximumf %7, %9 : vector<128x128xf32>
    %11 = arith.truncf %10 : vector<128x128xf32> to vector<128x128xbf16>
    %c0_5 = arith.constant 0 : index
    %c0_6 = arith.constant 0 : index
    %12 = vector.load %arg4[%c0_5, %c0_6] : memref<128x128xbf16, #tpu.memory_space<vmem>>, vector<128x128xbf16>
    tpu.vector_store %arg4[%c0_5, %c0_6], %11 {strides = array<i32>} : memref<128x128xbf16, #tpu.memory_space<vmem>>, vector<128x128xbf16>,
    return
  }
  func.func @transform_0(%arg0: i32) -> (i32, i32) {
    %c0_i32 = arith.constant 0 : i32
    %c0_i32_0 = arith.constant 0 : i32
    return %arg0, %c0_i32 : i32, i32
  }
  func.func @transform_1(%arg0: i32) -> (i32, i32) {
    %c0_i32 = arith.constant 0 : i32
    %c0_i32_0 = arith.constant 0 : i32
    %c0_i32_1 = arith.constant 0 : i32
    return %c0_i32, %c0_i32_0 : i32, i32
  }
  func.func @transform_2(%arg0: i32) -> (i32, i32) {
    %c0_i32 = arith.constant 0 : i32
    %c0_i32_0 = arith.constant 0 : i32
    %c0_i32_1 = arith.constant 0 : i32
    return %c0_i32, %c0_i32_0 : i32, i32
  }
  func.func @transform_3(%arg0: i32) -> (i32, i32) {
    %c0_i32 = arith.constant 0 : i32
    %c0_i32_0 = arith.constant 0 : i32
    return %arg0, %c0_i32 : i32, i32
  }
}

module attributes {stable_mosaic.version = 11 : i64} {
  func.func @_k_conv_stats(%arg0: i32, %arg1: memref<32x512xbf16, #tpu.memory_space<vmem>>, %arg2: memref<512x128xbf16, #tpu.memory_space<vmem>>, %arg3: memref<32x128xbf16, #tpu.memory_space<vmem>>, %arg4: memref<1x2x128xf32, #tpu.memory_space<vmem>>) attributes {dimension_semantics = [#tpu.dimension_semantics<parallel>], iteration_bounds = array<i64: 1>, scalar_prefetch = 0 : i64, scratch_operands = 0 : i64, tpu.core_type = #tpu.core_type<tc>, window_params = [{transform_indices = @transform_0, window_bounds = array<i64: 32, 512>}, {pipeline_mode = #tpu.pipeline_mode<synchronous>, transform_indices = @transform_1, window_bounds = array<i64: 512, 128>}, {transform_indices = @transform_2, window_bounds = array<i64: 32, 128>}, {transform_indices = @transform_3, window_bounds = array<i64: 1, 2, 128>}]} {
    %c0 = arith.constant 0 : index
    %c0_0 = arith.constant 0 : index
    %0 = vector.load %arg1[%c0, %c0_0] : memref<32x512xbf16, #tpu.memory_space<vmem>>, vector<32x512xbf16>
    %c0_1 = arith.constant 0 : index
    %c0_2 = arith.constant 0 : index
    %1 = vector.load %arg2[%c0_1, %c0_2] : memref<512x128xbf16, #tpu.memory_space<vmem>>, vector<512x128xbf16>
    %cst = arith.constant dense<0.000000e+00> : vector<32x128xf32>
    %2 = tpu.matmul %0, %1, %cst {dimension_numbers = #tpu.dot_dimension_numbers<[1], [0], [0], [1], [0, 0, 1, 1], [], []>} : vector<32x512xbf16>, vector<512x128xbf16>, vector<32x128xf32> -> vector<32x128xf32>
    %3 = arith.truncf %2 : vector<32x128xf32> to vector<32x128xbf16>
    %c0_3 = arith.constant 0 : index
    %c0_4 = arith.constant 0 : index
    %4 = vector.load %arg3[%c0_3, %c0_4] : memref<32x128xbf16, #tpu.memory_space<vmem>>, vector<32x128xbf16>
    tpu.vector_store %arg3[%c0_3, %c0_4], %3 {strides = array<i32>} : memref<32x128xbf16, #tpu.memory_space<vmem>>, vector<32x128xbf16>,
    %cst_5 = arith.constant dense<0.000000e+00> : vector<128xf32>
    %5 = vector.multi_reduction <add>, %2, %cst_5 [0] : vector<32x128xf32> to vector<128xf32>
    %6 = vector.shape_cast %5 : vector<128xf32> to vector<1x128xf32>
    %7 = arith.mulf %2, %2 : vector<32x128xf32>
    %cst_6 = arith.constant dense<0.000000e+00> : vector<128xf32>
    %8 = vector.multi_reduction <add>, %7, %cst_6 [0] : vector<32x128xf32> to vector<128xf32>
    %9 = vector.shape_cast %8 : vector<128xf32> to vector<1x128xf32>
    %10 = tpu.concatenate %6, %9 in 0 : vector<1x128xf32>, vector<1x128xf32> -> vector<2x128xf32>
    %11 = vector.shape_cast %10 : vector<2x128xf32> to vector<1x2x128xf32>
    %c0_7 = arith.constant 0 : index
    %c0_8 = arith.constant 0 : index
    %c0_9 = arith.constant 0 : index
    %12 = vector.load %arg4[%c0_7, %c0_8, %c0_9] : memref<1x2x128xf32, #tpu.memory_space<vmem>>, vector<1x2x128xf32>
    tpu.vector_store %arg4[%c0_7, %c0_8, %c0_9], %11 {strides = array<i32>} : memref<1x2x128xf32, #tpu.memory_space<vmem>>, vector<1x2x128xf32>,
    return
  }
  func.func @transform_0(%arg0: i32) -> (i32, i32) {
    %c0_i32 = arith.constant 0 : i32
    %c0_i32_0 = arith.constant 0 : i32
    return %arg0, %c0_i32 : i32, i32
  }
  func.func @transform_1(%arg0: i32) -> (i32, i32) {
    %c0_i32 = arith.constant 0 : i32
    %c0_i32_0 = arith.constant 0 : i32
    %c0_i32_1 = arith.constant 0 : i32
    return %c0_i32, %c0_i32_0 : i32, i32
  }
  func.func @transform_2(%arg0: i32) -> (i32, i32) {
    %c0_i32 = arith.constant 0 : i32
    %c0_i32_0 = arith.constant 0 : i32
    return %arg0, %c0_i32 : i32, i32
  }
  func.func @transform_3(%arg0: i32) -> (i32, i32, i32) {
    %c0_i32 = arith.constant 0 : i32
    %c0_i32_0 = arith.constant 0 : i32
    %c0_i32_1 = arith.constant 0 : i32
    return %arg0, %c0_i32, %c0_i32_0 : i32, i32, i32
  }
}

module attributes {stable_mosaic.version = 11 : i64} {
  func.func @_k_bn_lrelu(%arg0: i32, %arg1: memref<32x128xbf16, #tpu.memory_space<vmem>>, %arg2: memref<1x128xf32, #tpu.memory_space<vmem>>, %arg3: memref<1x128xf32, #tpu.memory_space<vmem>>, %arg4: memref<32x128xbf16, #tpu.memory_space<vmem>>) attributes {dimension_semantics = [#tpu.dimension_semantics<parallel>], iteration_bounds = array<i64: 1>, scalar_prefetch = 0 : i64, scratch_operands = 0 : i64, tpu.core_type = #tpu.core_type<tc>, window_params = [{transform_indices = @transform_0, window_bounds = array<i64: 32, 128>}, {pipeline_mode = #tpu.pipeline_mode<synchronous>, transform_indices = @transform_1, window_bounds = array<i64: 1, 128>}, {pipeline_mode = #tpu.pipeline_mode<synchronous>, transform_indices = @transform_2, window_bounds = array<i64: 1, 128>}, {transform_indices = @transform_3, window_bounds = array<i64: 32, 128>}]} {
    %c0 = arith.constant 0 : index
    %c0_0 = arith.constant 0 : index
    %0 = vector.load %arg1[%c0, %c0_0] : memref<32x128xbf16, #tpu.memory_space<vmem>>, vector<32x128xbf16>
    %1 = arith.extf %0 : vector<32x128xbf16> to vector<32x128xf32>
    %c0_1 = arith.constant 0 : index
    %c0_2 = arith.constant 0 : index
    %2 = vector.load %arg2[%c0_1, %c0_2] : memref<1x128xf32, #tpu.memory_space<vmem>>, vector<1x128xf32>
    %3 = vector.broadcast %2 : vector<1x128xf32> to vector<32x128xf32>
    %4 = arith.mulf %1, %3 : vector<32x128xf32>
    %c0_3 = arith.constant 0 : index
    %c0_4 = arith.constant 0 : index
    %5 = vector.load %arg3[%c0_3, %c0_4] : memref<1x128xf32, #tpu.memory_space<vmem>>, vector<1x128xf32>
    %6 = vector.broadcast %5 : vector<1x128xf32> to vector<32x128xf32>
    %7 = arith.addf %4, %6 : vector<32x128xf32>
    %cst = arith.constant 2.000000e-01 : f32
    %8 = vector.broadcast %cst : f32 to vector<32x128xf32>
    %9 = arith.mulf %8, %7 : vector<32x128xf32>
    %10 = arith.maximumf %7, %9 : vector<32x128xf32>
    %11 = arith.truncf %10 : vector<32x128xf32> to vector<32x128xbf16>
    %c0_5 = arith.constant 0 : index
    %c0_6 = arith.constant 0 : index
    %12 = vector.load %arg4[%c0_5, %c0_6] : memref<32x128xbf16, #tpu.memory_space<vmem>>, vector<32x128xbf16>
    tpu.vector_store %arg4[%c0_5, %c0_6], %11 {strides = array<i32>} : memref<32x128xbf16, #tpu.memory_space<vmem>>, vector<32x128xbf16>,
    return
  }
  func.func @transform_0(%arg0: i32) -> (i32, i32) {
    %c0_i32 = arith.constant 0 : i32
    %c0_i32_0 = arith.constant 0 : i32
    return %arg0, %c0_i32 : i32, i32
  }
  func.func @transform_1(%arg0: i32) -> (i32, i32) {
    %c0_i32 = arith.constant 0 : i32
    %c0_i32_0 = arith.constant 0 : i32
    %c0_i32_1 = arith.constant 0 : i32
    return %c0_i32, %c0_i32_0 : i32, i32
  }
  func.func @transform_2(%arg0: i32) -> (i32, i32) {
    %c0_i32 = arith.constant 0 : i32
    %c0_i32_0 = arith.constant 0 : i32
    %c0_i32_1 = arith.constant 0 : i32
    return %c0_i32, %c0_i32_0 : i32, i32
  }
  func.func @transform_3(%arg0: i32) -> (i32, i32) {
    %c0_i32 = arith.constant 0 : i32
    %c0_i32_0 = arith.constant 0 : i32
    return %arg0, %c0_i32 : i32, i32
  }
}

module attributes {stable_mosaic.version = 11 : i64} {
  func.func @_k_conv_sigmoid(%arg0: i32, %arg1: memref<2x1024xbf16, #tpu.memory_space<vmem>>, %arg2: memref<1024x128xbf16, #tpu.memory_space<vmem>>, %arg3: memref<2x128xf32, #tpu.memory_space<vmem>>) attributes {dimension_semantics = [#tpu.dimension_semantics<parallel>], iteration_bounds = array<i64: 1>, scalar_prefetch = 0 : i64, scratch_operands = 0 : i64, tpu.core_type = #tpu.core_type<tc>, window_params = [{transform_indices = @transform_0, window_bounds = array<i64: 2, 1024>}, {pipeline_mode = #tpu.pipeline_mode<synchronous>, transform_indices = @transform_1, window_bounds = array<i64: 1024, 128>}, {transform_indices = @transform_2, window_bounds = array<i64: 2, 128>}]} {
    %c0 = arith.constant 0 : index
    %c0_0 = arith.constant 0 : index
    %0 = vector.load %arg1[%c0, %c0_0] : memref<2x1024xbf16, #tpu.memory_space<vmem>>, vector<2x1024xbf16>
    %c0_1 = arith.constant 0 : index
    %c0_2 = arith.constant 0 : index
    %1 = vector.load %arg2[%c0_1, %c0_2] : memref<1024x128xbf16, #tpu.memory_space<vmem>>, vector<1024x128xbf16>
    %cst = arith.constant dense<0.000000e+00> : vector<2x128xf32>
    %2 = tpu.matmul %0, %1, %cst {dimension_numbers = #tpu.dot_dimension_numbers<[1], [0], [0], [1], [0, 0, 1, 1], [], []>} : vector<2x1024xbf16>, vector<1024x128xbf16>, vector<2x128xf32> -> vector<2x128xf32>
    %3 = arith.negf %2 : vector<2x128xf32>
    %4 = math.exp %3 : vector<2x128xf32>
    %cst_3 = arith.constant 1.000000e+00 : f32
    %5 = vector.broadcast %cst_3 : f32 to vector<2x128xf32>
    %6 = arith.addf %5, %4 : vector<2x128xf32>
    %7 = arith.divf %5, %6 : vector<2x128xf32>
    %c0_4 = arith.constant 0 : index
    %c0_5 = arith.constant 0 : index
    %8 = vector.load %arg3[%c0_4, %c0_5] : memref<2x128xf32, #tpu.memory_space<vmem>>, vector<2x128xf32>
    tpu.vector_store %arg3[%c0_4, %c0_5], %7 {strides = array<i32>} : memref<2x128xf32, #tpu.memory_space<vmem>>, vector<2x128xf32>,
    return
  }
  func.func @transform_0(%arg0: i32) -> (i32, i32) {
    %c0_i32 = arith.constant 0 : i32
    %c0_i32_0 = arith.constant 0 : i32
    return %arg0, %c0_i32 : i32, i32
  }
  func.func @transform_1(%arg0: i32) -> (i32, i32) {
    %c0_i32 = arith.constant 0 : i32
    %c0_i32_0 = arith.constant 0 : i32
    %c0_i32_1 = arith.constant 0 : i32
    return %c0_i32, %c0_i32_0 : i32, i32
  }
  func.func @transform_2(%arg0: i32) -> (i32, i32) {
    %c0_i32 = arith.constant 0 : i32
    %c0_i32_0 = arith.constant 0 : i32
    return %arg0, %c0_i32 : i32, i32
  }
}

</mosaic_0001>

<bundles_post_ra>
// kernel: discriminator_forward.8
= control target key start
LH: loop header
LB: loop body
LE: loop exit
PB: predicated region body
PF: predicated region fallthrough
CT: control target
= control target key end

     0   :  { %s1838_s9 = smov 0   ;;  %s1954_s0 = inlined_call_operand.vmem [shape: bf16[2048,128], index: 0, kind: input, shape index: {}]   ;;  %s1955_s1 = inlined_call_operand.vmem [shape: bf16[128,128], index: 1, kind: input, shape index: {}]   ;;  %s1956_s2 = inlined_call_operand.vmem [shape: bf16[2048,128], index: 2, kind: output, shape index: {}]  }
   0x1 LB: > { %s1261_s10 = sadd.s32 4294967295, %s1821_s9   ;;  %p1265_p0 = scmp.ge.s32.totalorder %s1821_s9, 1  ;;  %s1821_s9 = sphi %s1838_s9, %s12_s9  }
   0x2   : > { %p113_p1 = scmp.lt.s32.totalorder %s1821_s9, 5 }
   0x4   : > { %p114_p2 = pnand %p1265_p0, %p113_p1 }
   0x5   : > { %v1775_v0 = vld [vmem:[%s1955_s1] sm:$0xff] (!%p114_p2)   ;;  %s1266_s13 = sshll.u32 (!%p114_p2), %s1261_s10, 6  ;;  %v1776_v1 = vld [vmem:[%s1955_s1 + $0x8] sm:$0xff] (!%p114_p2)   ;;  %v1777_v2 = vld [vmem:[%s1955_s1 + $0x10] sm:$0xff] (!%p114_p2)  }
   0x6   : > { %117 = sbr.rel (%p114_p2) target bundleno = 317 (0x13d), region = 28  ;;  %p136_p3 = scmp.lt.s32.totalorder (!%p114_p2), %s1266_s13, 255  ;;  %1671 = vmatprep.subr.bf16.mxu0 (!%p114_p2), %v1775_v0  ;;  %1751 = vmatprep.subr.bf16.mxu1 (!%p114_p2), %v1775_v0  ;;  %v1778_v3 = vld [vmem:[%s1955_s1 + $0x18] sm:$0xff] (!%p114_p2)   ;;  %v1779_v6 = vld [vmem:[%s1955_s1 + $0x20] sm:$0xff] (!%p114_p2)   ;;  %v1780_v7 = vld [vmem:[%s1955_s1 + $0x28] sm:$0xff] (!%p114_p2)  }
   0x7   : > { %1672 = vmatpush3.bf16.msra.mxu0 (!%p114_p2), %v1775_v0  ;;  %1759 = vmatpush3.bf16.msra.mxu1 (!%p114_p2), %v1775_v0  ;;  %v1781_v8 = vld [vmem:[%s1955_s1 + $0x30] sm:$0xff] (!%p114_p2)   ;;  %v1782_v9 = vld [vmem:[%s1955_s1 + $0x38] sm:$0xff] (!%p114_p2)  }
   0x8   : > { %1673 = vmatprep.subr.bf16.mxu0 (!%p114_p2), %v1776_v1  ;;  %1752 = vmatprep.subr.bf16.mxu1 (!%p114_p2), %v1776_v1 }
   0xb   : > { %1674 = vmatpush3.bf16.msra.mxu0 (!%p114_p2), %v1776_v1  ;;  %1760 = vmatpush3.bf16.msra.mxu1 (!%p114_p2), %v1776_v1 }
   0xc   : > { %1675 = vmatprep.subr.bf16.mxu0 (!%p114_p2), %v1777_v2  ;;  %1753 = vmatprep.subr.bf16.mxu1 (!%p114_p2), %v1777_v2 }
   0xd   : > { %s1958_s13 = smov (!%p136_p3, %s1266_s13), 255 }
   0xe   : > { %s1267_s18 = sshll.u32 %s1958_s13, 2 }
   0xf   : > { %s1863_s21 = scalar_lea.vmem %s1954_s0, %s1267_s18  ;;  %1676 = vmatpush3.bf16.msra.mxu0 %v1777_v2  ;;  %1761 = vmatpush3.bf16.msra.mxu1 %v1777_v2  ;;  %s1917_s6 = scalar_lea.vmem %s1956_s2, %s1267_s18 }
  0x10   : > { %v1783_v4 = vld [vmem:[%s1863_s21] sm:$0xff]   ;;  %1677 = vmatprep.subr.bf16.mxu0 %v1778_v3  ;;  %1754 = vmatprep.subr.bf16.mxu1 %v1778_v3  ;;  %v1785_v10 = vld [vmem:[%s1863_s21 + $0x8] sm:$0xff]   ;;  %v1787_v12 = vld [vmem:[%s1863_s21 + $0x10] sm:$0xff]  }
  0x11   : > { %v1784_v5 = vld [vmem:[%s1863_s21 + $0x80] sm:$0xff]   ;;  %1687 = vmatprep.mubr.bf16.mxu0 %v1783_v4  ;;  %v1786_v11 = vld [vmem:[%s1863_s21 + $0x88] sm:$0xff]   ;;  %v1788_v13 = vld [vmem:[%s1863_s21 + $0x90] sm:$0xff]  }
  0x12   : > { %1719 = vmatprep.mubr.bf16.mxu1 %v1784_v5  ;;  %v1789_v14 = vld [vmem:[%s1863_s21 + $0x18] sm:$0xff]   ;;  %v1791_v16 = vld [vmem:[%s1863_s21 + $0x20] sm:$0xff]   ;;  %v1793_v18 = vld [vmem:[%s1863_s21 + $0x28] sm:$0xff]  }
  0x13   : > { %1678 = vmatpush3.bf16.msra.mxu0 %v1778_v3  ;;  %1762 = vmatpush3.bf16.msra.mxu1 %v1778_v3  ;;  %v1790_v15 = vld [vmem:[%s1863_s21 + $0x98] sm:$0xff]   ;;  %v1792_v17 = vld [vmem:[%s1863_s21 + $0xa0] sm:$0xff]   ;;  %v1794_v19 = vld [vmem:[%s1863_s21 + $0xa8] sm:$0xff]  }
  0x14   : > { %1679 = vmatprep.subr.bf16.mxu0 %v1779_v6  ;;  %1755 = vmatprep.subr.bf16.mxu1 %v1779_v6  ;;  %v1795_v20 = vld [vmem:[%s1863_s21 + $0x30] sm:$0xff]   ;;  %v1797_v22 = vld [vmem:[%s1863_s21 + $0x38] sm:$0xff]   ;;  %v1799_v24 = vld [vmem:[%s1863_s21 + $0x40] sm:$0xff]  }
  0x15   : > { %v1796_v21 = vld [vmem:[%s1863_s21 + $0xb0] sm:$0xff]   ;;  %v1798_v23 = vld [vmem:[%s1863_s21 + $0xb8] sm:$0xff]   ;;  %v1800_v25 = vld [vmem:[%s1863_s21 + $0xc0] sm:$0xff]  }
  0x16   : > { %v1801_v26 = vld [vmem:[%s1863_s21 + $0x48] sm:$0xff]   ;;  %v1803_v28 = vld [vmem:[%s1863_s21 + $0x50] sm:$0xff]   ;;  %v1805_v30 = vld [vmem:[%s1863_s21 + $0x58] sm:$0xff]  }
  0x17   : > { %1680 = vmatpush3.bf16.msra.mxu0 %v1779_v6  ;;  %1763 = vmatpush3.bf16.msra.mxu1 %v1779_v6  ;;  %v1802_v27 = vld [vmem:[%s1863_s21 + $0xc8] sm:$0xff]   ;;  %v1804_v29 = vld [vmem:[%s1863_s21 + $0xd0] sm:$0xff]   ;;  %v1806_v31 = vld [vmem:[%s1863_s21 + $0xd8] sm:$0xff]  }
  0x18   : > { %1681 = vmatprep.subr.bf16.mxu0 %v1780_v7  ;;  %1756 = vmatprep.subr.bf16.mxu1 %v1780_v7  ;;  %v1807_v32 = vld [vmem:[%s1863_s21 + $0x60] sm:$0xff]   ;;  %v1809_v34 = vld [vmem:[%s1863_s21 + $0x68] sm:$0xff]   ;;  %v1811_v36 = vld [vmem:[%s1863_s21 + $0x70] sm:$0xff]  }
  0x19   : > { %v1808_v33 = vld [vmem:[%s1863_s21 + $0xe0] sm:$0xff]   ;;  %v1810_v35 = vld [vmem:[%s1863_s21 + $0xe8] sm:$0xff]   ;;  %v1812_v37 = vld [vmem:[%s1863_s21 + $0xf0] sm:$0xff]  }
  0x1a   : > { %v1813_v38 = vld [vmem:[%s1863_s21 + $0x78] sm:$0xff]  }
  0x1b   : > { %1682 = vmatpush3.bf16.msra.mxu0 %v1780_v7  ;;  %1764 = vmatpush3.bf16.msra.mxu1 %v1780_v7  ;;  %v1814_v39 = vld [vmem:[%s1863_s21 + $0xf8] sm:$0xff]  }
  0x1c   : > { %1683 = vmatprep.subr.bf16.mxu0 %v1781_v8  ;;  %1757 = vmatprep.subr.bf16.mxu1 %v1781_v8 }
  0x1f   : > { %1684 = vmatpush3.bf16.msra.mxu0 %v1781_v8  ;;  %1765 = vmatpush3.bf16.msra.mxu1 %v1781_v8 }
  0x20   : > { %1685 = vmatprep.subr.bf16.mxu0 %v1782_v9  ;;  %1758 = vmatprep.subr.bf16.mxu1 %v1782_v9 }
  0x23   : > { %1686 = vmatpush3.bf16.msra.mxu0 %v1782_v9  ;;  %1766 = vmatpush3.bf16.msra.mxu1 %v1782_v9 }
  0x26   : > { %1688 = vmatmul.mubr.bf16.vlgmr.msra.gmra.mrb[0].mxu0 %v1785_v10  ;;  %1720 = vmatmul.mubr.bf16.vlgmr.msra.gmra.mrb[0].mxu1 %v1786_v11 }
  0x27   : > { %1691 = vmatprep.mubr.bf16.mxu0 %v1787_v12  ;;  %1723 = vmatprep.mubr.bf16.mxu1 %v1788_v13 }
  0x2e   : > { %1692 = vmatmul.mubr.bf16.gmra.mrb[4].mxu0 %v1789_v14  ;;  %1724 = vmatmul.mubr.bf16.gmra.mrb[4].mxu1 %v1790_v15 }
  0x2f   : > { %1695 = vmatprep.mubr.bf16.mxu0 %v1791_v16  ;;  %1727 = vmatprep.mubr.bf16.mxu1 %v1792_v17 }
  0x36   : > { %1696 = vmatmul.mubr.bf16.gmra.mrb[8].mxu0 %v1793_v18  ;;  %1728 = vmatmul.mubr.bf16.gmra.mrb[8].mxu1 %v1794_v19 }
  0x37   : > { %1699 = vmatprep.mubr.bf16.mxu0 %v1795_v20  ;;  %1731 = vmatprep.mubr.bf16.mxu1 %v1796_v21 }
  0x3e   : > { %1700 = vmatmul.mubr.bf16.gmra.mrb[12].mxu0 %v1797_v22  ;;  %1732 = vmatmul.mubr.bf16.gmra.mrb[12].mxu1 %v1798_v23 }
  0x3f   : > { %1703 = vmatprep.mubr.bf16.mxu0 %v1799_v24  ;;  %1735 = vmatprep.mubr.bf16.mxu1 %v1800_v25 }
  0x46   : > { %1704 = vmatmul.mubr.bf16.gmra.mrb[16].mxu0 %v1801_v26  ;;  %1736 = vmatmul.mubr.bf16.gmra.mrb[16].mxu1 %v1802_v27 }
  0x47   : > { %1707 = vmatprep.mubr.bf16.mxu0 %v1803_v28  ;;  %1739 = vmatprep.mubr.bf16.mxu1 %v1804_v29 }
  0x4e   : > { %1708 = vmatmul.mubr.bf16.gmra.mrb[20].mxu0 %v1805_v30  ;;  %1740 = vmatmul.mubr.bf16.gmra.mrb[20].mxu1 %v1806_v31 }
  0x4f   : > { %1711 = vmatprep.mubr.bf16.mxu0 %v1807_v32  ;;  %1743 = vmatprep.mubr.bf16.mxu1 %v1808_v33 }
  0x56   : > { %1712 = vmatmul.mubr.bf16.gmra.mrb[24].mxu0 %v1809_v34  ;;  %1744 = vmatmul.mubr.bf16.gmra.mrb[24].mxu1 %v1810_v35 }
  0x57   : > { %1715 = vmatprep.mubr.bf16.mxu0 %v1811_v36  ;;  %1747 = vmatprep.mubr.bf16.mxu1 %v1812_v37 }
  0x5e   : > { %1716 = vmatmul.mubr.bf16.gmra.mrb[28].mxu0 %v1813_v38  ;;  %1748 = vmatmul.mubr.bf16.gmra.mrb[28].mxu1 %v1814_v39 }
  0xf9   : > { %v1689_v40 = vpop.f32.mrb[0].mxu0  ;;  %v1721_v41 = vpop.f32.mrb[0].mxu1 }
  0xfa   : > { %v759_v42 = vmul.f32 0.2, %v1689_v40  ;;  %v791_v43 = vmul.f32 0.2, %v1721_v41  ;;  %v502_v44 = vpop.f32.mrb[1].mxu0  ;;  %v630_v45 = vpop.f32.mrb[1].mxu1 }
  0xfb   : > { %v757_v46 = vmul.f32 0.2, %v502_v44  ;;  %v789_v47 = vmul.f32 0.2, %v630_v45  ;;  %v1690_v48 = vpop.f32.mrb[2].mxu0  ;;  %v1722_v49 = vpop.f32.mrb[2].mxu1 }
  0xfc   : > { %v760_v50 = vmul.f32 0.2, %v1690_v48  ;;  %v792_v51 = vmul.f32 0.2, %v1722_v49  ;;  %v505_v52 = vpop.f32.mrb[3].mxu0  ;;  %v633_v53 = vpop.f32.mrb[3].mxu1  ;;  %v823_v56 = vmax.f32 %v1689_v40, %v759_v42  ;;  %v855_v57 = vmax.f32 %v1721_v41, %v791_v43 }
  0xfd   : > { %v758_v54 = vmul.f32 0.2, %v505_v52  ;;  %v790_v55 = vmul.f32 0.2, %v633_v53  ;;  %v821_v60 = vmax.f32 %v502_v44, %v757_v46  ;;  %v853_v61 = vmax.f32 %v630_v45, %v789_v47 }
  0xfe   : > { %v824_v58 = vmax.f32 %v1690_v48, %v760_v50  ;;  %v856_v59 = vmax.f32 %v1722_v49, %v792_v51 }
  0xff   : > { %v822_v62 = vmax.f32 %v505_v52, %v758_v54  ;;  %v854_v63 = vmax.f32 %v633_v53, %v790_v55 }
 0x100   : > { %v1448_v0 = vpack.c.bf16 %v824_v58, %v823_v56  ;;  %v1528_v1 = vpack.c.bf16 %v856_v59, %v855_v57 }
 0x101   : > { %v1443_v2 = vpack.c.bf16 %v822_v62, %v821_v60  ;;  %v1523_v3 = vpack.c.bf16 %v854_v63, %v853_v61  ;;  %v1693_v4 = vpop.f32.mrb[4].mxu0  ;;  %v1725_v5 = vpop.f32.mrb[4].mxu1 }
 0x102   : > { %1600 = vst [vmem:[%s1917_s6 + $0x8] sm:$0xff] %v1448_v0   ;;  %1616 = vst [vmem:[%s1917_s6 + $0x88] sm:$0xff] %v1528_v1   ;;  %v763_v6 = vmul.f32 0.2, %v1693_v4  ;;  %v795_v7 = vmul.f32 0.2, %v1725_v5 }
 0x103   : > { %v518_v8 = vpop.f32.mrb[5].mxu0  ;;  %v646_v9 = vpop.f32.mrb[5].mxu1  ;;  %1444 = vst [vmem:[%s1917_s6] sm:$0xff] %v1443_v2   ;;  %1615 = vst [vmem:[%s1917_s6 + $0x80] sm:$0xff] %v1523_v3  }
 0x104   : > { %v761_v10 = vmul.f32 0.2, %v518_v8  ;;  %v793_v11 = vmul.f32 0.2, %v646_v9  ;;  %v1694_v12 = vpop.f32.mrb[6].mxu0  ;;  %v1726_v13 = vpop.f32.mrb[6].mxu1  ;;  %v827_v20 = vmax.f32 %v1693_v4, %v763_v6  ;;  %v859_v21 = vmax.f32 %v1725_v5, %v795_v7 }
 0x105   : > { %v764_v14 = vmul.f32 0.2, %v1694_v12  ;;  %v796_v15 = vmul.f32 0.2, %v1726_v13  ;;  %v521_v16 = vpop.f32.mrb[7].mxu0  ;;  %v649_v17 = vpop.f32.mrb[7].mxu1 }
 0x106   : > { %v762_v18 = vmul.f32 0.2, %v521_v16  ;;  %v794_v19 = vmul.f32 0.2, %v649_v17  ;;  %v825_v24 = vmax.f32 %v518_v8, %v761_v10  ;;  %v857_v25 = vmax.f32 %v646_v9, %v793_v11 }
 0x107   : > { %v828_v22 = vmax.f32 %v1694_v12, %v764_v14  ;;  %v860_v23 = vmax.f32 %v1726_v13, %v796_v15 }
 0x108   : > { %v826_v26 = vmax.f32 %v521_v16, %v762_v18  ;;  %v858_v27 = vmax.f32 %v649_v17, %v794_v19 }
 0x109   : > { %v1458_v28 = vpack.c.bf16 %v828_v22, %v827_v20  ;;  %v1538_v29 = vpack.c.bf16 %v860_v23, %v859_v21  ;;  %v1697_v32 = vpop.f32.mrb[8].mxu0  ;;  %v1729_v33 = vpop.f32.mrb[8].mxu1 }
 0x10a   : > { %v1453_v30 = vpack.c.bf16 %v826_v26, %v825_v24  ;;  %v1533_v31 = vpack.c.bf16 %v858_v27, %v857_v25  ;;  %v767_v34 = vmul.f32 0.2, %v1697_v32  ;;  %v799_v35 = vmul.f32 0.2, %v1729_v33  ;;  %v534_v36 = vpop.f32.mrb[9].mxu0  ;;  %v662_v37 = vpop.f32.mrb[9].mxu1 }
 0x10b   : > { %1602 = vst [vmem:[%s1917_s6 + $0x18] sm:$0xff] %v1458_v28   ;;  %1618 = vst [vmem:[%s1917_s6 + $0x98] sm:$0xff] %v1538_v29   ;;  %v765_v38 = vmul.f32 0.2, %v534_v36  ;;  %v797_v39 = vmul.f32 0.2, %v662_v37 }
 0x10c   : > { %1601 = vst [vmem:[%s1917_s6 + $0x10] sm:$0xff] %v1453_v30   ;;  %1617 = vst [vmem:[%s1917_s6 + $0x90] sm:$0xff] %v1533_v31   ;;  %v1698_v40 = vpop.f32.mrb[10].mxu0  ;;  %v1730_v41 = vpop.f32.mrb[10].mxu1  ;;  %v831_v48 = vmax.f32 %v1697_v32, %v767_v34  ;;  %v863_v49 = vmax.f32 %v1729_v33, %v799_v35 }
 0x10d   : > { %v768_v42 = vmul.f32 0.2, %v1698_v40  ;;  %v800_v43 = vmul.f32 0.2, %v1730_v41  ;;  %v537_v44 = vpop.f32.mrb[11].mxu0  ;;  %v665_v45 = vpop.f32.mrb[11].mxu1  ;;  %v829_v52 = vmax.f32 %v534_v36, %v765_v38  ;;  %v861_v53 = vmax.f32 %v662_v37, %v797_v39 }
 0x10e   : > { %v766_v46 = vmul.f32 0.2, %v537_v44  ;;  %v798_v47 = vmul.f32 0.2, %v665_v45 }
 0x10f   : > { %v832_v50 = vmax.f32 %v1698_v40, %v768_v42  ;;  %v864_v51 = vmax.f32 %v1730_v41, %v800_v43 }
 0x110   : > { %v830_v54 = vmax.f32 %v537_v44, %v766_v46  ;;  %v862_v55 = vmax.f32 %v665_v45, %v798_v47 }
 0x111   : > { %v1468_v56 = vpack.c.bf16 %v832_v50, %v831_v48  ;;  %v1548_v57 = vpack.c.bf16 %v864_v51, %v863_v49  ;;  %v1701_v60 = vpop.f32.mrb[12].mxu0  ;;  %v1733_v61 = vpop.f32.mrb[12].mxu1 }
 0x112   : > { %v1463_v58 = vpack.c.bf16 %v830_v54, %v829_v52  ;;  %v1543_v59 = vpack.c.bf16 %v862_v55, %v861_v53  ;;  %v771_v62 = vmul.f32 0.2, %v1701_v60  ;;  %v803_v63 = vmul.f32 0.2, %v1733_v61  ;;  %v550_v0 = vpop.f32.mrb[13].mxu0  ;;  %v678_v1 = vpop.f32.mrb[13].mxu1 }
 0x113   : > { %1604 = vst [vmem:[%s1917_s6 + $0x28] sm:$0xff] %v1468_v56   ;;  %1620 = vst [vmem:[%s1917_s6 + $0xa8] sm:$0xff] %v1548_v57   ;;  %v769_v2 = vmul.f32 0.2, %v550_v0  ;;  %v801_v3 = vmul.f32 0.2, %v678_v1 }
 0x114   : > { %1603 = vst [vmem:[%s1917_s6 + $0x20] sm:$0xff] %v1463_v58   ;;  %1619 = vst [vmem:[%s1917_s6 + $0xa0] sm:$0xff] %v1543_v59   ;;  %v1702_v4 = vpop.f32.mrb[14].mxu0  ;;  %v1734_v5 = vpop.f32.mrb[14].mxu1  ;;  %v835_v12 = vmax.f32 %v1701_v60, %v771_v62  ;;  %v867_v13 = vmax.f32 %v1733_v61, %v803_v63 }
 0x115   : > { %v772_v6 = vmul.f32 0.2, %v1702_v4  ;;  %v804_v7 = vmul.f32 0.2, %v1734_v5  ;;  %v553_v8 = vpop.f32.mrb[15].mxu0  ;;  %v681_v9 = vpop.f32.mrb[15].mxu1  ;;  %v833_v16 = vmax.f32 %v550_v0, %v769_v2  ;;  %v865_v17 = vmax.f32 %v678_v1, %v801_v3 }
 0x116   : > { %v770_v10 = vmul.f32 0.2, %v553_v8  ;;  %v802_v11 = vmul.f32 0.2, %v681_v9 }
 0x117   : > { %v836_v14 = vmax.f32 %v1702_v4, %v772_v6  ;;  %v868_v15 = vmax.f32 %v1734_v5, %v804_v7 }
 0x118   : > { %v834_v18 = vmax.f32 %v553_v8, %v770_v10  ;;  %v866_v19 = vmax.f32 %v681_v9, %v802_v11 }
 0x119   : > { %v1478_v20 = vpack.c.bf16 %v836_v14, %v835_v12  ;;  %v1558_v21 = vpack.c.bf16 %v868_v15, %v867_v13  ;;  %v1705_v24 = vpop.f32.mrb[16].mxu0  ;;  %v1737_v25 = vpop.f32.mrb[16].mxu1 }
 0x11a   : > { %v1473_v22 = vpack.c.bf16 %v834_v18, %v833_v16  ;;  %v1553_v23 = vpack.c.bf16 %v866_v19, %v865_v17  ;;  %v775_v26 = vmul.f32 0.2, %v1705_v24  ;;  %v807_v27 = vmul.f32 0.2, %v1737_v25  ;;  %v566_v28 = vpop.f32.mrb[17].mxu0  ;;  %v694_v29 = vpop.f32.mrb[17].mxu1 }
 0x11b   : > { %1606 = vst [vmem:[%s1917_s6 + $0x38] sm:$0xff] %v1478_v20   ;;  %1622 = vst [vmem:[%s1917_s6 + $0xb8] sm:$0xff] %v1558_v21   ;;  %v773_v30 = vmul.f32 0.2, %v566_v28  ;;  %v805_v31 = vmul.f32 0.2, %v694_v29 }
 0x11c   : > { %1605 = vst [vmem:[%s1917_s6 + $0x30] sm:$0xff] %v1473_v22   ;;  %1621 = vst [vmem:[%s1917_s6 + $0xb0] sm:$0xff] %v1553_v23   ;;  %v1706_v32 = vpop.f32.mrb[18].mxu0  ;;  %v1738_v33 = vpop.f32.mrb[18].mxu1  ;;  %v839_v40 = vmax.f32 %v1705_v24, %v775_v26  ;;  %v871_v41 = vmax.f32 %v1737_v25, %v807_v27 }
 0x11d   : > { %v776_v34 = vmul.f32 0.2, %v1706_v32  ;;  %v808_v35 = vmul.f32 0.2, %v1738_v33  ;;  %v569_v36 = vpop.f32.mrb[19].mxu0  ;;  %v697_v37 = vpop.f32.mrb[19].mxu1  ;;  %v837_v44 = vmax.f32 %v566_v28, %v773_v30  ;;  %v869_v45 = vmax.f32 %v694_v29, %v805_v31 }
 0x11e   : > { %v774_v38 = vmul.f32 0.2, %v569_v36  ;;  %v806_v39 = vmul.f32 0.2, %v697_v37 }
 0x11f   : > { %v840_v42 = vmax.f32 %v1706_v32, %v776_v34  ;;  %v872_v43 = vmax.f32 %v1738_v33, %v808_v35 }
 0x120   : > { %v838_v46 = vmax.f32 %v569_v36, %v774_v38  ;;  %v870_v47 = vmax.f32 %v697_v37, %v806_v39 }
 0x121   : > { %v1488_v48 = vpack.c.bf16 %v840_v42, %v839_v40  ;;  %v1568_v49 = vpack.c.bf16 %v872_v43, %v871_v41  ;;  %v1709_v52 = vpop.f32.mrb[20].mxu0  ;;  %v1741_v53 = vpop.f32.mrb[20].mxu1 }
 0x122   : > { %v1483_v50 = vpack.c.bf16 %v838_v46, %v837_v44  ;;  %v1563_v51 = vpack.c.bf16 %v870_v47, %v869_v45  ;;  %v779_v54 = vmul.f32 0.2, %v1709_v52  ;;  %v811_v55 = vmul.f32 0.2, %v1741_v53  ;;  %v582_v56 = vpop.f32.mrb[21].mxu0  ;;  %v710_v57 = vpop.f32.mrb[21].mxu1 }
 0x123   : > { %1608 = vst [vmem:[%s1917_s6 + $0x48] sm:$0xff] %v1488_v48   ;;  %1624 = vst [vmem:[%s1917_s6 + $0xc8] sm:$0xff] %v1568_v49   ;;  %v777_v58 = vmul.f32 0.2, %v582_v56  ;;  %v809_v59 = vmul.f32 0.2, %v710_v57 }
 0x124   : > { %1607 = vst [vmem:[%s1917_s6 + $0x40] sm:$0xff] %v1483_v50   ;;  %1623 = vst [vmem:[%s1917_s6 + $0xc0] sm:$0xff] %v1563_v51   ;;  %v1710_v60 = vpop.f32.mrb[22].mxu0  ;;  %v1742_v61 = vpop.f32.mrb[22].mxu1  ;;  %v843_v4 = vmax.f32 %v1709_v52, %v779_v54  ;;  %v875_v5 = vmax.f32 %v1741_v53, %v811_v55 }
 0x125   : > { %v780_v62 = vmul.f32 0.2, %v1710_v60  ;;  %v812_v63 = vmul.f32 0.2, %v1742_v61  ;;  %v585_v0 = vpop.f32.mrb[23].mxu0  ;;  %v713_v1 = vpop.f32.mrb[23].mxu1  ;;  %v841_v8 = vmax.f32 %v582_v56, %v777_v58  ;;  %v873_v9 = vmax.f32 %v710_v57, %v809_v59 }
 0x126   : > { %v778_v2 = vmul.f32 0.2, %v585_v0  ;;  %v810_v3 = vmul.f32 0.2, %v713_v1 }
 0x127   : > { %v844_v6 = vmax.f32 %v1710_v60, %v780_v62  ;;  %v876_v7 = vmax.f32 %v1742_v61, %v812_v63 }
 0x128   : > { %v842_v10 = vmax.f32 %v585_v0, %v778_v2  ;;  %v874_v11 = vmax.f32 %v713_v1, %v810_v3 }
 0x129   : > { %v1498_v12 = vpack.c.bf16 %v844_v6, %v843_v4  ;;  %v1578_v13 = vpack.c.bf16 %v876_v7, %v875_v5  ;;  %v1713_v16 = vpop.f32.mrb[24].mxu0  ;;  %v1745_v17 = vpop.f32.mrb[24].mxu1 }
 0x12a   : > { %v1493_v14 = vpack.c.bf16 %v842_v10, %v841_v8  ;;  %v1573_v15 = vpack.c.bf16 %v874_v11, %v873_v9  ;;  %v783_v18 = vmul.f32 0.2, %v1713_v16  ;;  %v815_v19 = vmul.f32 0.2, %v1745_v17  ;;  %v598_v20 = vpop.f32.mrb[25].mxu0  ;;  %v726_v21 = vpop.f32.mrb[25].mxu1 }
 0x12b   : > { %1610 = vst [vmem:[%s1917_s6 + $0x58] sm:$0xff] %v1498_v12   ;;  %1626 = vst [vmem:[%s1917_s6 + $0xd8] sm:$0xff] %v1578_v13   ;;  %v781_v22 = vmul.f32 0.2, %v598_v20  ;;  %v813_v23 = vmul.f32 0.2, %v726_v21 }
 0x12c   : > { %1609 = vst [vmem:[%s1917_s6 + $0x50] sm:$0xff] %v1493_v14   ;;  %1625 = vst [vmem:[%s1917_s6 + $0xd0] sm:$0xff] %v1573_v15   ;;  %v1714_v24 = vpop.f32.mrb[26].mxu0  ;;  %v1746_v25 = vpop.f32.mrb[26].mxu1  ;;  %v847_v32 = vmax.f32 %v1713_v16, %v783_v18  ;;  %v879_v33 = vmax.f32 %v1745_v17, %v815_v19 }
 0x12d   : > { %v784_v26 = vmul.f32 0.2, %v1714_v24  ;;  %v816_v27 = vmul.f32 0.2, %v1746_v25  ;;  %v601_v28 = vpop.f32.mrb[27].mxu0  ;;  %v729_v29 = vpop.f32.mrb[27].mxu1  ;;  %v845_v36 = vmax.f32 %v598_v20, %v781_v22  ;;  %v877_v37 = vmax.f32 %v726_v21, %v813_v23 }
 0x12e   : > { %v782_v30 = vmul.f32 0.2, %v601_v28  ;;  %v814_v31 = vmul.f32 0.2, %v729_v29 }
 0x12f   : > { %v848_v34 = vmax.f32 %v1714_v24, %v784_v26  ;;  %v880_v35 = vmax.f32 %v1746_v25, %v816_v27 }
 0x130   : > { %v846_v38 = vmax.f32 %v601_v28, %v782_v30  ;;  %v878_v39 = vmax.f32 %v729_v29, %v814_v31 }
 0x131   : > { %v1508_v40 = vpack.c.bf16 %v848_v34, %v847_v32  ;;  %v1588_v41 = vpack.c.bf16 %v880_v35, %v879_v33  ;;  %v1717_v44 = vpop.f32.mrb[28].mxu0  ;;  %v1749_v45 = vpop.f32.mrb[28].mxu1 }
 0x132   : > { %v1503_v42 = vpack.c.bf16 %v846_v38, %v845_v36  ;;  %v1583_v43 = vpack.c.bf16 %v878_v39, %v877_v37  ;;  %v787_v46 = vmul.f32 0.2, %v1717_v44  ;;  %v819_v47 = vmul.f32 0.2, %v1749_v45  ;;  %v614_v48 = vpop.f32.mrb[29].mxu0  ;;  %v742_v49 = vpop.f32.mrb[29].mxu1 }
 0x133   : > { %1612 = vst [vmem:[%s1917_s6 + $0x68] sm:$0xff] %v1508_v40   ;;  %1628 = vst [vmem:[%s1917_s6 + $0xe8] sm:$0xff] %v1588_v41   ;;  %v785_v50 = vmul.f32 0.2, %v614_v48  ;;  %v817_v51 = vmul.f32 0.2, %v742_v49 }
 0x134   : > { %1611 = vst [vmem:[%s1917_s6 + $0x60] sm:$0xff] %v1503_v42   ;;  %1627 = vst [vmem:[%s1917_s6 + $0xe0] sm:$0xff] %v1583_v43   ;;  %v1718_v52 = vpop.f32.mrb[30].mxu0  ;;  %v1750_v53 = vpop.f32.mrb[30].mxu1  ;;  %v851_v60 = vmax.f32 %v1717_v44, %v787_v46  ;;  %v883_v61 = vmax.f32 %v1749_v45, %v819_v47 }
 0x135   : > { %v788_v54 = vmul.f32 0.2, %v1718_v52  ;;  %v820_v55 = vmul.f32 0.2, %v1750_v53  ;;  %v617_v56 = vpop.f32.mrb[31].mxu0  ;;  %v745_v57 = vpop.f32.mrb[31].mxu1  ;;  %v849_v0 = vmax.f32 %v614_v48, %v785_v50  ;;  %v881_v1 = vmax.f32 %v742_v49, %v817_v51 }
 0x136   : > { %v786_v58 = vmul.f32 0.2, %v617_v56  ;;  %v818_v59 = vmul.f32 0.2, %v745_v57 }
 0x137   : > { %v852_v62 = vmax.f32 %v1718_v52, %v788_v54  ;;  %v884_v63 = vmax.f32 %v1750_v53, %v820_v55 }
 0x138   : > { %v850_v2 = vmax.f32 %v617_v56, %v786_v58  ;;  %v882_v3 = vmax.f32 %v745_v57, %v818_v59 }
 0x139   : > { %v1518_v4 = vpack.c.bf16 %v852_v62, %v851_v60  ;;  %v1598_v5 = vpack.c.bf16 %v884_v63, %v883_v61 }
 0x13a   : > { %v1513_v6 = vpack.c.bf16 %v850_v2, %v849_v0  ;;  %v1593_v7 = vpack.c.bf16 %v882_v3, %v881_v1 }
 0x13b   : > { %1614 = vst [vmem:[%s1917_s6 + $0x78] sm:$0xff] %v1518_v4   ;;  %1630 = vst [vmem:[%s1917_s6 + $0xf8] sm:$0xff] %v1598_v5  }
 0x13c   : > { %1613 = vst [vmem:[%s1917_s6 + $0x70] sm:$0xff] %v1513_v6   ;;  %1629 = vst [vmem:[%s1917_s6 + $0xf0] sm:$0xff] %v1593_v7  }
 0x13d PF: > { %s12_s9 = sadd.s32 1, %s1821_s9  }
 0x13e   : > { %p9_p4 = scmp.ge.s32.totalorder %s12_s9, 6  }
 0x140   :  { %11 = sbr.rel (!%p9_p4) target bundleno = 1 (0x1), region = 58 }

// kernel: discriminator_forward.9
= control target key start
LH: loop header
LB: loop body
LE: loop exit
PB: predicated region body
PF: predicated region fallthrough
CT: control target
= control target key end

     0   :  { %vm1145_vm0 = vcmask 1040384   ;;  %s2122_s1 = inlined_call_operand.vmem [shape: bf16[128,128], index: 1, kind: input, shape index: {}]   ;;  %s2123_s0 = inlined_call_operand.vmem [shape: bf16[512,128], index: 0, kind: input, shape index: {}]   ;;  %s2124_s2 = inlined_call_operand.vmem [shape: bf16[512,128], index: 2, kind: output, shape index: {0}]   ;;  %s2125_s3 = inlined_call_operand.vmem [shape: f32[1,2,128], index: 3, kind: output, shape index: {1}]  }
   0x1   :  { %v1651_v0 = vld [vmem:[%s2122_s1] sm:$0xff]   ;;  %v1652_v1 = vld [vmem:[%s2122_s1 + $0x8] sm:$0xff]   ;;  %v1653_v2 = vld [vmem:[%s2122_s1 + $0x10] sm:$0xff]  }
   0x2   :  { %1555 = vmatprep.subr.bf16.mxu0 %v1651_v0  ;;  %1635 = vmatprep.subr.bf16.mxu1 %v1651_v0  ;;  %v1654_v3 = vld [vmem:[%s2122_s1 + $0x18] sm:$0xff]   ;;  %v1659_v4 = vld [vmem:[%s2123_s0] sm:$0xff]   ;;  %v1656_v6 = vld [vmem:[%s2122_s1 + $0x28] sm:$0xff]  }
   0x3   :  { %1556 = vmatpush3.bf16.msra.mxu0 %v1651_v0  ;;  %1643 = vmatpush3.bf16.msra.mxu1 %v1651_v0  ;;  %v1655_v5 = vld [vmem:[%s2122_s1 + $0x20] sm:$0xff]   ;;  %v1657_v7 = vld [vmem:[%s2122_s1 + $0x30] sm:$0xff]   ;;  %v1658_v8 = vld [vmem:[%s2122_s1 + $0x38] sm:$0xff]  }
   0x4   :  { %1557 = vmatprep.subr.bf16.mxu0 %v1652_v1  ;;  %1636 = vmatprep.subr.bf16.mxu1 %v1652_v1  ;;  %v1675_v9 = vld [vmem:[%s2123_s0 + $0x80] sm:$0xff]   ;;  %v1660_v10 = vld [vmem:[%s2123_s0 + $0x8] sm:$0xff]   ;;  %v1661_v11 = vld [vmem:[%s2123_s0 + $0x10] sm:$0xff]  }
   0x5   :  { %1571 = vmatprep.mubr.bf16.mxu0 %v1659_v4  ;;  %1603 = vmatprep.mubr.bf16.mxu1 %v1675_v9  ;;  %v1676_v12 = vld [vmem:[%s2123_s0 + $0x88] sm:$0xff]   ;;  %v1677_v13 = vld [vmem:[%s2123_s0 + $0x90] sm:$0xff]   ;;  %v1662_v14 = vld [vmem:[%s2123_s0 + $0x18] sm:$0xff]  }
   0x6   :  { %v1663_v15 = vld [vmem:[%s2123_s0 + $0x20] sm:$0xff]   ;;  %v1678_v16 = vld [vmem:[%s2123_s0 + $0x98] sm:$0xff]   ;;  %v1664_v18 = vld [vmem:[%s2123_s0 + $0x28] sm:$0xff]  }
   0x7   :  { %1558 = vmatpush3.bf16.msra.mxu0 %v1652_v1  ;;  %1644 = vmatpush3.bf16.msra.mxu1 %v1652_v1  ;;  %v1679_v17 = vld [vmem:[%s2123_s0 + $0xa0] sm:$0xff]   ;;  %v1680_v19 = vld [vmem:[%s2123_s0 + $0xa8] sm:$0xff]   ;;  %v1665_v20 = vld [vmem:[%s2123_s0 + $0x30] sm:$0xff]  }
   0x8   :  { %1559 = vmatprep.subr.bf16.mxu0 %v1653_v2  ;;  %1637 = vmatprep.subr.bf16.mxu1 %v1653_v2  ;;  %v1681_v21 = vld [vmem:[%s2123_s0 + $0xb0] sm:$0xff]   ;;  %v1666_v22 = vld [vmem:[%s2123_s0 + $0x38] sm:$0xff]   ;;  %v1667_v24 = vld [vmem:[%s2123_s0 + $0x40] sm:$0xff]  }
   0x9   :  { %v1682_v23 = vld [vmem:[%s2123_s0 + $0xb8] sm:$0xff]   ;;  %v1683_v25 = vld [vmem:[%s2123_s0 + $0xc0] sm:$0xff]   ;;  %v1668_v26 = vld [vmem:[%s2123_s0 + $0x48] sm:$0xff]  }
   0xa   :  { %v1684_v27 = vld [vmem:[%s2123_s0 + $0xc8] sm:$0xff]   ;;  %v1669_v28 = vld [vmem:[%s2123_s0 + $0x50] sm:$0xff]   ;;  %v1670_v30 = vld [vmem:[%s2123_s0 + $0x58] sm:$0xff]  }
   0xb   :  { %1560 = vmatpush3.bf16.msra.mxu0 %v1653_v2  ;;  %1645 = vmatpush3.bf16.msra.mxu1 %v1653_v2  ;;  %v1685_v29 = vld [vmem:[%s2123_s0 + $0xd0] sm:$0xff]   ;;  %v1686_v31 = vld [vmem:[%s2123_s0 + $0xd8] sm:$0xff]   ;;  %v1671_v32 = vld [vmem:[%s2123_s0 + $0x60] sm:$0xff]  }
   0xc   :  { %1561 = vmatprep.subr.bf16.mxu0 %v1654_v3  ;;  %1638 = vmatprep.subr.bf16.mxu1 %v1654_v3  ;;  %v1687_v33 = vld [vmem:[%s2123_s0 + $0xe0] sm:$0xff]   ;;  %v1672_v34 = vld [vmem:[%s2123_s0 + $0x68] sm:$0xff]   ;;  %v1673_v36 = vld [vmem:[%s2123_s0 + $0x70] sm:$0xff]  }
   0xd   :  { %v1688_v35 = vld [vmem:[%s2123_s0 + $0xe8] sm:$0xff]   ;;  %v1689_v37 = vld [vmem:[%s2123_s0 + $0xf0] sm:$0xff]   ;;  %v1674_v38 = vld [vmem:[%s2123_s0 + $0x78] sm:$0xff]  }
   0xe   :  { %v1690_v39 = vld [vmem:[%s2123_s0 + $0xf8] sm:$0xff]  }
   0xf   :  { %1562 = vmatpush3.bf16.msra.mxu0 %v1654_v3  ;;  %1646 = vmatpush3.bf16.msra.mxu1 %v1654_v3 }
  0x10   :  { %1563 = vmatprep.subr.bf16.mxu0 %v1655_v5  ;;  %1639 = vmatprep.subr.bf16.mxu1 %v1655_v5 }
  0x13   :  { %1564 = vmatpush3.bf16.msra.mxu0 %v1655_v5  ;;  %1647 = vmatpush3.bf16.msra.mxu1 %v1655_v5 }
  0x14   :  { %1565 = vmatprep.subr.bf16.mxu0 %v1656_v6  ;;  %1640 = vmatprep.subr.bf16.mxu1 %v1656_v6 }
  0x17   :  { %1566 = vmatpush3.bf16.msra.mxu0 %v1656_v6  ;;  %1648 = vmatpush3.bf16.msra.mxu1 %v1656_v6 }
  0x18   :  { %1567 = vmatprep.subr.bf16.mxu0 %v1657_v7  ;;  %1641 = vmatprep.subr.bf16.mxu1 %v1657_v7 }
  0x1b   :  { %1568 = vmatpush3.bf16.msra.mxu0 %v1657_v7  ;;  %1649 = vmatpush3.bf16.msra.mxu1 %v1657_v7 }
  0x1c   :  { %1569 = vmatprep.subr.bf16.mxu0 %v1658_v8  ;;  %1642 = vmatprep.subr.bf16.mxu1 %v1658_v8 }
  0x1f   :  { %1570 = vmatpush3.bf16.msra.mxu0 %v1658_v8  ;;  %1650 = vmatpush3.bf16.msra.mxu1 %v1658_v8 }
  0x22   :  { %1572 = vmatmul.mubr.bf16.vlgmr.msra.gmra.mrb[0].mxu0 %v1660_v10  ;;  %1604 = vmatmul.mubr.bf16.vlgmr.msra.gmra.mrb[0].mxu1 %v1676_v12 }
  0x23   :  { %1575 = vmatprep.mubr.bf16.mxu0 %v1661_v11  ;;  %1607 = vmatprep.mubr.bf16.mxu1 %v1677_v13 }
  0x2a   :  { %1576 = vmatmul.mubr.bf16.gmra.mrb[4].mxu0 %v1662_v14  ;;  %1608 = vmatmul.mubr.bf16.gmra.mrb[4].mxu1 %v1678_v16 }
  0x2b   :  { %1579 = vmatprep.mubr.bf16.mxu0 %v1663_v15  ;;  %1611 = vmatprep.mubr.bf16.mxu1 %v1679_v17 }
  0x32   :  { %1580 = vmatmul.mubr.bf16.gmra.mrb[8].mxu0 %v1664_v18  ;;  %1612 = vmatmul.mubr.bf16.gmra.mrb[8].mxu1 %v1680_v19 }
  0x33   :  { %1583 = vmatprep.mubr.bf16.mxu0 %v1665_v20  ;;  %1615 = vmatprep.mubr.bf16.mxu1 %v1681_v21 }
  0x3a   :  { %1584 = vmatmul.mubr.bf16.gmra.mrb[12].mxu0 %v1666_v22  ;;  %1616 = vmatmul.mubr.bf16.gmra.mrb[12].mxu1 %v1682_v23 }
  0x3b   :  { %1587 = vmatprep.mubr.bf16.mxu0 %v1667_v24  ;;  %1619 = vmatprep.mubr.bf16.mxu1 %v1683_v25 }
  0x42   :  { %1588 = vmatmul.mubr.bf16.gmra.mrb[16].mxu0 %v1668_v26  ;;  %1620 = vmatmul.mubr.bf16.gmra.mrb[16].mxu1 %v1684_v27 }
  0x43   :  { %1591 = vmatprep.mubr.bf16.mxu0 %v1669_v28  ;;  %1623 = vmatprep.mubr.bf16.mxu1 %v1685_v29 }
  0x4a   :  { %1592 = vmatmul.mubr.bf16.gmra.mrb[20].mxu0 %v1670_v30  ;;  %1624 = vmatmul.mubr.bf16.gmra.mrb[20].mxu1 %v1686_v31 }
  0x4b   :  { %1595 = vmatprep.mubr.bf16.mxu0 %v1671_v32  ;;  %1627 = vmatprep.mubr.bf16.mxu1 %v1687_v33 }
  0x52   :  { %1596 = vmatmul.mubr.bf16.gmra.mrb[24].mxu0 %v1672_v34  ;;  %1628 = vmatmul.mubr.bf16.gmra.mrb[24].mxu1 %v1688_v35 }
  0x53   :  { %1599 = vmatprep.mubr.bf16.mxu0 %v1673_v36  ;;  %1631 = vmatprep.mubr.bf16.mxu1 %v1689_v37 }
  0x5a   :  { %1600 = vmatmul.mubr.bf16.gmra.mrb[28].mxu0 %v1674_v38  ;;  %1632 = vmatmul.mubr.bf16.gmra.mrb[28].mxu1 %v1690_v39 }
  0xf5   :  { %v1573_v40 = vpop.f32.mrb[0].mxu0  ;;  %v1831_v41 = vpop.f32.mrb[0].mxu1 }
  0xf6   :  { %v368_v42 = vpop.f32.mrb[1].mxu0  ;;  %v1833_v43 = vpop.f32.mrb[1].mxu1  ;;  %v1014_v55 = vmul.f32 %v1573_v40, %v1573_v40 }
  0xf7   :  { %v1574_v44 = vpop.f32.mrb[2].mxu0  ;;  %v1835_v45 = vpop.f32.mrb[2].mxu1  ;;  %v1012_v46 = vmul.f32 %v368_v42, %v368_v42 }
  0xf8   :  { %v1332_v47 = vpack.c.bf16 %v1574_v44, %v1573_v40  ;;  %v371_v48 = vpop.f32.mrb[3].mxu0  ;;  %v1412_v49 = vpack.c.bf16 %v1835_v45, %v1831_v41  ;;  %v1839_v50 = vpop.f32.mrb[3].mxu1  ;;  %v1015_v58 = vmul.f32 %v1574_v44, %v1574_v44 }
  0xf9   :  { %v1327_v51 = vpack.c.bf16 %v371_v48, %v368_v42  ;;  %v943_v52 = vadd.f32 %v371_v48, %v368_v42  ;;  %v1013_v53 = vmul.f32 %v371_v48, %v371_v48  ;;  %v1407_v54 = vpack.c.bf16 %v1839_v50, %v1833_v43 }
  0xfa   :  { %1484 = vst [vmem:[%s2124_s2 + $0x8] sm:$0xff] %v1332_v47   ;;  %1500 = vst [vmem:[%s2124_s2 + $0x88] sm:$0xff] %v1412_v49  }
  0xfb   :  { %1328 = vst [vmem:[%s2124_s2] sm:$0xff] %v1327_v51   ;;  %v944_v56 = vadd.f32 %v1573_v40, %v943_v52  ;;  %v1076_v57 = vadd.f32 %v1013_v53, %v1012_v46  ;;  %1499 = vst [vmem:[%s2124_s2 + $0x80] sm:$0xff] %v1407_v54  }
  0xfd   :  { %v1077_v59 = vadd.f32 %v1076_v57, %v1014_v55  ;;  %v1577_v60 = vpop.f32.mrb[4].mxu0  ;;  %v945_v61 = vadd.f32 %v1574_v44, %v944_v56  ;;  %v1855_v62 = vpop.f32.mrb[4].mxu1 }
  0xfe   :  { %v384_v63 = vpop.f32.mrb[5].mxu0  ;;  %v1857_v0 = vpop.f32.mrb[5].mxu1  ;;  %v1018_v15 = vmul.f32 %v1577_v60, %v1577_v60 }
  0xff   :  { %v946_v1 = vadd.f32 %v945_v61, %v384_v63  ;;  %v1016_v2 = vmul.f32 %v384_v63, %v384_v63  ;;  %v1078_v3 = vadd.f32 %v1077_v59, %v1015_v58  ;;  %v1578_v4 = vpop.f32.mrb[6].mxu0  ;;  %v1859_v5 = vpop.f32.mrb[6].mxu1 }
 0x100   :  { %v1342_v6 = vpack.c.bf16 %v1578_v4, %v1577_v60  ;;  %v387_v7 = vpop.f32.mrb[7].mxu0  ;;  %v1422_v8 = vpack.c.bf16 %v1859_v5, %v1855_v62  ;;  %v1863_v9 = vpop.f32.mrb[7].mxu1  ;;  %v1019_v18 = vmul.f32 %v1578_v4, %v1578_v4 }
 0x101   :  { %v1079_v10 = vadd.f32 %v1078_v3, %v1016_v2  ;;  %v1337_v11 = vpack.c.bf16 %v387_v7, %v384_v63  ;;  %v947_v12 = vadd.f32 %v946_v1, %v387_v7  ;;  %v1017_v13 = vmul.f32 %v387_v7, %v387_v7 }
 0x102   :  { %1486 = vst [vmem:[%s2124_s2 + $0x18] sm:$0xff] %v1342_v6   ;;  %1502 = vst [vmem:[%s2124_s2 + $0x98] sm:$0xff] %v1422_v8   ;;  %v1417_v14 = vpack.c.bf16 %v1863_v9, %v1857_v0 }
 0x103   :  { %1485 = vst [vmem:[%s2124_s2 + $0x10] sm:$0xff] %v1337_v11   ;;  %v948_v16 = vadd.f32 %v1577_v60, %v947_v12  ;;  %v1080_v17 = vadd.f32 %v1079_v10, %v1017_v13 }
 0x104   :  { %1501 = vst [vmem:[%s2124_s2 + $0x90] sm:$0xff] %v1417_v14  }
 0x105   :  { %v1081_v19 = vadd.f32 %v1080_v17, %v1018_v15  ;;  %v1581_v20 = vpop.f32.mrb[8].mxu0  ;;  %v949_v21 = vadd.f32 %v1578_v4, %v948_v16  ;;  %v1879_v22 = vpop.f32.mrb[8].mxu1 }
 0x106   :  { %v400_v23 = vpop.f32.mrb[9].mxu0  ;;  %v1881_v24 = vpop.f32.mrb[9].mxu1  ;;  %v1022_v39 = vmul.f32 %v1581_v20, %v1581_v20 }
 0x107   :  { %v950_v25 = vadd.f32 %v949_v21, %v400_v23  ;;  %v1020_v26 = vmul.f32 %v400_v23, %v400_v23  ;;  %v1082_v27 = vadd.f32 %v1081_v19, %v1019_v18  ;;  %v1582_v28 = vpop.f32.mrb[10].mxu0  ;;  %v1883_v29 = vpop.f32.mrb[10].mxu1 }
 0x108   :  { %v1352_v30 = vpack.c.bf16 %v1582_v28, %v1581_v20  ;;  %v403_v31 = vpop.f32.mrb[11].mxu0  ;;  %v1432_v32 = vpack.c.bf16 %v1883_v29, %v1879_v22  ;;  %v1887_v33 = vpop.f32.mrb[11].mxu1  ;;  %v1023_v44 = vmul.f32 %v1582_v28, %v1582_v28 }
 0x109   :  { %v1083_v34 = vadd.f32 %v1082_v27, %v1020_v26  ;;  %v1347_v35 = vpack.c.bf16 %v403_v31, %v400_v23  ;;  %v951_v36 = vadd.f32 %v950_v25, %v403_v31  ;;  %v1021_v37 = vmul.f32 %v403_v31, %v403_v31 }
 0x10a   :  { %1488 = vst [vmem:[%s2124_s2 + $0x28] sm:$0xff] %v1352_v30   ;;  %1504 = vst [vmem:[%s2124_s2 + $0xa8] sm:$0xff] %v1432_v32   ;;  %v1427_v38 = vpack.c.bf16 %v1887_v33, %v1881_v24 }
 0x10b   :  { %1487 = vst [vmem:[%s2124_s2 + $0x20] sm:$0xff] %v1347_v35   ;;  %v952_v40 = vadd.f32 %v1581_v20, %v951_v36  ;;  %v1084_v42 = vadd.f32 %v1083_v34, %v1021_v37 }
 0x10c   :  { %1503 = vst [vmem:[%s2124_s2 + $0xa0] sm:$0xff] %v1427_v38  }
 0x10d   :  { %v1085_v46 = vadd.f32 %v1084_v42, %v1022_v39  ;;  %v1585_v47 = vpop.f32.mrb[12].mxu0  ;;  %v953_v48 = vadd.f32 %v1582_v28, %v952_v40  ;;  %v1903_v49 = vpop.f32.mrb[12].mxu1 }
 0x10e   :  { %v416_v51 = vpop.f32.mrb[13].mxu0  ;;  %v1905_v52 = vpop.f32.mrb[13].mxu1  ;;  %v1026_v6 = vmul.f32 %v1585_v47, %v1585_v47 }
 0x10f   :  { %v954_v53 = vadd.f32 %v953_v48, %v416_v51  ;;  %v1024_v54 = vmul.f32 %v416_v51, %v416_v51  ;;  %v1086_v55 = vadd.f32 %v1085_v46, %v1023_v44  ;;  %v1586_v56 = vpop.f32.mrb[14].mxu0  ;;  %v1907_v57 = vpop.f32.mrb[14].mxu1 }
 0x110   :  { %v1362_v58 = vpack.c.bf16 %v1586_v56, %v1585_v47  ;;  %v419_v59 = vpop.f32.mrb[15].mxu0  ;;  %v1442_v60 = vpack.c.bf16 %v1907_v57, %v1903_v49  ;;  %v1911_v61 = vpop.f32.mrb[15].mxu1  ;;  %v1027_v10 = vmul.f32 %v1586_v56, %v1586_v56 }
 0x111   :  { %v1087_v63 = vadd.f32 %v1086_v55, %v1024_v54  ;;  %v1357_v1 = vpack.c.bf16 %v419_v59, %v416_v51  ;;  %v955_v2 = vadd.f32 %v954_v53, %v419_v59  ;;  %v1025_v3 = vmul.f32 %v419_v59, %v419_v59 }
 0x112   :  { %1490 = vst [vmem:[%s2124_s2 + $0x38] sm:$0xff] %v1362_v58   ;;  %1506 = vst [vmem:[%s2124_s2 + $0xb8] sm:$0xff] %v1442_v60   ;;  %v1437_v4 = vpack.c.bf16 %v1911_v61, %v1905_v52 }
 0x113   :  { %1489 = vst [vmem:[%s2124_s2 + $0x30] sm:$0xff] %v1357_v1   ;;  %v956_v7 = vadd.f32 %v1585_v47, %v955_v2  ;;  %v1088_v8 = vadd.f32 %v1087_v63, %v1025_v3 }
 0x114   :  { %1505 = vst [vmem:[%s2124_s2 + $0xb0] sm:$0xff] %v1437_v4  }
 0x115   :  { %v1089_v11 = vadd.f32 %v1088_v8, %v1026_v6  ;;  %v1589_v12 = vpop.f32.mrb[16].mxu0  ;;  %v957_v13 = vadd.f32 %v1586_v56, %v956_v7  ;;  %v1927_v14 = vpop.f32.mrb[16].mxu1 }
 0x116   :  { %v432_v15 = vpop.f32.mrb[17].mxu0  ;;  %v1929_v16 = vpop.f32.mrb[17].mxu1  ;;  %v1030_v35 = vmul.f32 %v1589_v12, %v1589_v12 }
 0x117   :  { %v958_v17 = vadd.f32 %v957_v13, %v432_v15  ;;  %v1028_v18 = vmul.f32 %v432_v15, %v432_v15  ;;  %v1090_v19 = vadd.f32 %v1089_v11, %v1027_v10  ;;  %v1590_v20 = vpop.f32.mrb[18].mxu0  ;;  %v1931_v21 = vpop.f32.mrb[18].mxu1 }
 0x118   :  { %v1372_v23 = vpack.c.bf16 %v1590_v20, %v1589_v12  ;;  %v435_v25 = vpop.f32.mrb[19].mxu0  ;;  %v1452_v26 = vpack.c.bf16 %v1931_v21, %v1927_v14  ;;  %v1935_v27 = vpop.f32.mrb[19].mxu1  ;;  %v1031_v38 = vmul.f32 %v1590_v20, %v1590_v20 }
 0x119   :  { %v1091_v28 = vadd.f32 %v1090_v19, %v1028_v18  ;;  %v1367_v30 = vpack.c.bf16 %v435_v25, %v432_v15  ;;  %v959_v31 = vadd.f32 %v958_v17, %v435_v25  ;;  %v1029_v32 = vmul.f32 %v435_v25, %v435_v25 }
 0x11a   :  { %1492 = vst [vmem:[%s2124_s2 + $0x48] sm:$0xff] %v1372_v23   ;;  %1508 = vst [vmem:[%s2124_s2 + $0xc8] sm:$0xff] %v1452_v26   ;;  %v1447_v34 = vpack.c.bf16 %v1935_v27, %v1929_v16 }
 0x11b   :  { %1491 = vst [vmem:[%s2124_s2 + $0x40] sm:$0xff] %v1367_v30   ;;  %v960_v36 = vadd.f32 %v1589_v12, %v959_v31  ;;  %v1092_v37 = vadd.f32 %v1091_v28, %v1029_v32 }
 0x11c   :  { %1507 = vst [vmem:[%s2124_s2 + $0xc0] sm:$0xff] %v1447_v34  }
 0x11d   :  { %v1093_v39 = vadd.f32 %v1092_v37, %v1030_v35  ;;  %v1593_v40 = vpop.f32.mrb[20].mxu0  ;;  %v961_v42 = vadd.f32 %v1590_v20, %v960_v36  ;;  %v1951_v44 = vpop.f32.mrb[20].mxu1 }
 0x11e   :  { %v448_v46 = vpop.f32.mrb[21].mxu0  ;;  %v1953_v47 = vpop.f32.mrb[21].mxu1  ;;  %v1034_v6 = vmul.f32 %v1593_v40, %v1593_v40 }
 0x11f   :  { %v962_v48 = vadd.f32 %v961_v42, %v448_v46  ;;  %v1032_v51 = vmul.f32 %v448_v46, %v448_v46  ;;  %v1094_v53 = vadd.f32 %v1093_v39, %v1031_v38  ;;  %v1594_v54 = vpop.f32.mrb[22].mxu0  ;;  %v1955_v55 = vpop.f32.mrb[22].mxu1 }
 0x120   :  { %v1382_v56 = vpack.c.bf16 %v1594_v54, %v1593_v40  ;;  %v451_v58 = vpop.f32.mrb[23].mxu0  ;;  %v1462_v59 = vpack.c.bf16 %v1955_v55, %v1951_v44  ;;  %v1959_v60 = vpop.f32.mrb[23].mxu1  ;;  %v1035_v10 = vmul.f32 %v1594_v54, %v1594_v54 }
 0x121   :  { %v1095_v63 = vadd.f32 %v1094_v53, %v1032_v51  ;;  %v1377_v1 = vpack.c.bf16 %v451_v58, %v448_v46  ;;  %v963_v2 = vadd.f32 %v962_v48, %v451_v58  ;;  %v1033_v3 = vmul.f32 %v451_v58, %v451_v58 }
 0x122   :  { %1494 = vst [vmem:[%s2124_s2 + $0x58] sm:$0xff] %v1382_v56   ;;  %1510 = vst [vmem:[%s2124_s2 + $0xd8] sm:$0xff] %v1462_v59   ;;  %v1457_v4 = vpack.c.bf16 %v1959_v60, %v1953_v47 }
 0x123   :  { %1493 = vst [vmem:[%s2124_s2 + $0x50] sm:$0xff] %v1377_v1   ;;  %v964_v7 = vadd.f32 %v1593_v40, %v963_v2  ;;  %v1096_v8 = vadd.f32 %v1095_v63, %v1033_v3 }
 0x124   :  { %1509 = vst [vmem:[%s2124_s2 + $0xd0] sm:$0xff] %v1457_v4  }
 0x125   :  { %v1097_v11 = vadd.f32 %v1096_v8, %v1034_v6  ;;  %v1597_v12 = vpop.f32.mrb[24].mxu0  ;;  %v965_v13 = vadd.f32 %v1594_v54, %v964_v7  ;;  %v1975_v15 = vpop.f32.mrb[24].mxu1 }
 0x126   :  { %v464_v17 = vpop.f32.mrb[25].mxu0  ;;  %v1977_v18 = vpop.f32.mrb[25].mxu1  ;;  %v1038_v39 = vmul.f32 %v1597_v12, %v1597_v12 }
 0x127   :  { %v966_v19 = vadd.f32 %v965_v13, %v464_v17  ;;  %v1036_v20 = vmul.f32 %v464_v17, %v464_v17  ;;  %v1098_v23 = vadd.f32 %v1097_v11, %v1035_v10  ;;  %v1598_v25 = vpop.f32.mrb[26].mxu0  ;;  %v1979_v26 = vpop.f32.mrb[26].mxu1 }
 0x128   :  { %v1392_v28 = vpack.c.bf16 %v1598_v25, %v1597_v12  ;;  %v467_v30 = vpop.f32.mrb[27].mxu0  ;;  %v1472_v31 = vpack.c.bf16 %v1979_v26, %v1975_v15  ;;  %v1983_v32 = vpop.f32.mrb[27].mxu1  ;;  %v1039_v46 = vmul.f32 %v1598_v25, %v1598_v25 }
 0x129   :  { %v1099_v34 = vadd.f32 %v1098_v23, %v1036_v20  ;;  %v1387_v35 = vpack.c.bf16 %v467_v30, %v464_v17  ;;  %v967_v36 = vadd.f32 %v966_v19, %v467_v30  ;;  %v1037_v37 = vmul.f32 %v467_v30, %v467_v30 }
 0x12a   :  { %1496 = vst [vmem:[%s2124_s2 + $0x68] sm:$0xff] %v1392_v28   ;;  %1512 = vst [vmem:[%s2124_s2 + $0xe8] sm:$0xff] %v1472_v31   ;;  %v1467_v38 = vpack.c.bf16 %v1983_v32, %v1977_v18  ;;  %v1044_v31 = vmul.f32 %v1833_v43, %v1833_v43 }
 0x12b   :  { %1495 = vst [vmem:[%s2124_s2 + $0x60] sm:$0xff] %v1387_v35   ;;  %v968_v40 = vadd.f32 %v1597_v12, %v967_v36  ;;  %v1100_v42 = vadd.f32 %v1099_v34, %v1037_v37 }
 0x12c   :  { %1511 = vst [vmem:[%s2124_s2 + $0xe0] sm:$0xff] %v1467_v38   ;;  %v1045_v38 = vmul.f32 %v1839_v50, %v1839_v50 }
 0x12d   :  { %v1101_v48 = vadd.f32 %v1100_v42, %v1038_v39  ;;  %v1601_v51 = vpop.f32.mrb[28].mxu0  ;;  %v969_v53 = vadd.f32 %v1598_v25, %v968_v40  ;;  %v1999_v54 = vpop.f32.mrb[28].mxu1  ;;  %v1046_v39 = vmul.f32 %v1831_v41, %v1831_v41 }
 0x12e   :  { %v480_v56 = vpop.f32.mrb[29].mxu0  ;;  %v2001_v58 = vpop.f32.mrb[29].mxu1  ;;  %v1042_v19 = vmul.f32 %v1601_v51, %v1601_v51 }
 0x12f   :  { %v970_v59 = vadd.f32 %v969_v53, %v480_v56  ;;  %v1040_v63 = vmul.f32 %v480_v56, %v480_v56  ;;  %v1102_v1 = vadd.f32 %v1101_v48, %v1039_v46  ;;  %v1602_v2 = vpop.f32.mrb[30].mxu0  ;;  %v2003_v3 = vpop.f32.mrb[30].mxu1  ;;  %v1047_v46 = vmul.f32 %v1835_v45, %v1835_v45 }
 0x130   :  { %v1402_v4 = vpack.c.bf16 %v1602_v2, %v1601_v51  ;;  %v483_v6 = vpop.f32.mrb[31].mxu0  ;;  %v1482_v7 = vpack.c.bf16 %v2003_v3, %v1999_v54  ;;  %v2007_v8 = vpop.f32.mrb[31].mxu1  ;;  %v1043_v25 = vmul.f32 %v1602_v2, %v1602_v2 }
 0x131   :  { %v1103_v10 = vadd.f32 %v1102_v1, %v1040_v63  ;;  %v1397_v11 = vpack.c.bf16 %v483_v6, %v480_v56  ;;  %v971_v12 = vadd.f32 %v970_v59, %v483_v6  ;;  %v1041_v13 = vmul.f32 %v483_v6, %v483_v6 }
 0x132   :  { %1498 = vst [vmem:[%s2124_s2 + $0x78] sm:$0xff] %v1402_v4   ;;  %1514 = vst [vmem:[%s2124_s2 + $0xf8] sm:$0xff] %v1482_v7   ;;  %v1477_v17 = vpack.c.bf16 %v2007_v8, %v2001_v58  ;;  %v1049_v63 = vmul.f32 %v1863_v9, %v1863_v9 }
 0x133   :  { %1497 = vst [vmem:[%s2124_s2 + $0x70] sm:$0xff] %v1397_v11   ;;  %v972_v20 = vadd.f32 %v1601_v51, %v971_v12  ;;  %v1104_v23 = vadd.f32 %v1103_v10, %v1041_v13  ;;  %v1053_v12 = vmul.f32 %v1887_v33, %v1887_v33 }
 0x134   :  { %1513 = vst [vmem:[%s2124_s2 + $0xf0] sm:$0xff] %v1477_v17  }
 0x135   :  { %v1105_v28 = vadd.f32 %v1104_v23, %v1042_v19  ;;  %v973_v30 = vadd.f32 %v1602_v2, %v972_v20 }
 0x137   :  { %v974_v34 = vadd.f32 %v973_v30, %v1833_v43  ;;  %v1106_v35 = vadd.f32 %v1105_v28, %v1043_v25  ;;  %v1048_v43 = vmul.f32 %v1857_v0, %v1857_v0  ;;  %v1057_v30 = vmul.f32 %v1911_v61, %v1911_v61 }
 0x139   :  { %v1107_v36 = vadd.f32 %v1106_v35, %v1044_v31  ;;  %v975_v37 = vadd.f32 %v974_v34, %v1839_v50 }
 0x13b   :  { %v976_v40 = vadd.f32 %v1831_v41, %v975_v37  ;;  %v1108_v42 = vadd.f32 %v1107_v36, %v1045_v38  ;;  %v1050_v41 = vmul.f32 %v1855_v62, %v1855_v62 }
 0x13d   :  { %v1109_v48 = vadd.f32 %v1108_v42, %v1046_v39  ;;  %v977_v51 = vadd.f32 %v1835_v45, %v976_v40  ;;  %v1051_v45 = vmul.f32 %v1859_v5, %v1859_v5  ;;  %v1061_v40 = vmul.f32 %v1935_v27, %v1935_v27 }
 0x13f   :  { %v978_v53 = vadd.f32 %v977_v51, %v1857_v0  ;;  %v1110_v56 = vadd.f32 %v1109_v48, %v1047_v46  ;;  %v1052_v0 = vmul.f32 %v1881_v24, %v1881_v24 }
 0x141   :  { %v1111_v59 = vadd.f32 %v1110_v56, %v1048_v43  ;;  %v979_v50 = vadd.f32 %v978_v53, %v1863_v9 }
 0x143   :  { %v980_v1 = vadd.f32 %v1855_v62, %v979_v50  ;;  %v1112_v2 = vadd.f32 %v1111_v59, %v1049_v63  ;;  %v1054_v62 = vmul.f32 %v1879_v22, %v1879_v22  ;;  %v1065_v59 = vmul.f32 %v1959_v60, %v1959_v60 }
 0x145   :  { %v1113_v4 = vadd.f32 %v1112_v2, %v1050_v41  ;;  %v981_v6 = vadd.f32 %v1859_v5, %v980_v1  ;;  %v1055_v5 = vmul.f32 %v1883_v29, %v1883_v29 }
 0x147   :  { %v982_v7 = vadd.f32 %v981_v6, %v1881_v24  ;;  %v1114_v10 = vadd.f32 %v1113_v4, %v1051_v45  ;;  %v1056_v24 = vmul.f32 %v1905_v52, %v1905_v52  ;;  %v1069_v6 = vmul.f32 %v1983_v32, %v1983_v32 }
 0x149   :  { %v1115_v11 = vadd.f32 %v1114_v10, %v1052_v0  ;;  %v983_v9 = vadd.f32 %v982_v7, %v1887_v33 }
 0x14b   :  { %v984_v13 = vadd.f32 %v1879_v22, %v983_v9  ;;  %v1116_v17 = vadd.f32 %v1115_v11, %v1053_v12  ;;  %v1058_v22 = vmul.f32 %v1903_v49, %v1903_v49 }
 0x14d   :  { %v1117_v19 = vadd.f32 %v1116_v17, %v1054_v62  ;;  %v985_v20 = vadd.f32 %v1883_v29, %v984_v13  ;;  %v1059_v29 = vmul.f32 %v1907_v57, %v1907_v57  ;;  %v1073_v13 = vmul.f32 %v2007_v8, %v2007_v8 }
 0x14f   :  { %v986_v23 = vadd.f32 %v985_v20, %v1905_v52  ;;  %v1118_v25 = vadd.f32 %v1117_v19, %v1055_v5  ;;  %v1060_v52 = vmul.f32 %v1929_v16, %v1929_v16 }
 0x151   :  { %v1119_v28 = vadd.f32 %v1118_v25, %v1056_v24  ;;  %v987_v33 = vadd.f32 %v986_v23, %v1911_v61 }
 0x153   :  { %v988_v31 = vadd.f32 %v1903_v49, %v987_v33  ;;  %v1120_v34 = vadd.f32 %v1119_v28, %v1057_v30  ;;  %v1062_v49 = vmul.f32 %v1927_v14, %v1927_v14 }
 0x155   :  { %v1121_v35 = vadd.f32 %v1120_v34, %v1058_v22  ;;  %v989_v36 = vadd.f32 %v1907_v57, %v988_v31  ;;  %v1063_v57 = vmul.f32 %v1931_v21, %v1931_v21 }
 0x157   :  { %v990_v37 = vadd.f32 %v989_v36, %v1929_v16  ;;  %v1122_v38 = vadd.f32 %v1121_v35, %v1059_v29  ;;  %v1064_v16 = vmul.f32 %v1953_v47, %v1953_v47 }
 0x159   :  { %v1123_v39 = vadd.f32 %v1122_v38, %v1060_v52  ;;  %v991_v61 = vadd.f32 %v990_v37, %v1935_v27 }
 0x15b   :  { %v992_v42 = vadd.f32 %v1927_v14, %v991_v61  ;;  %v1124_v46 = vadd.f32 %v1123_v39, %v1061_v40  ;;  %v1066_v14 = vmul.f32 %v1951_v44, %v1951_v44 }
 0x15d   :  { %v1125_v48 = vadd.f32 %v1124_v46, %v1062_v49  ;;  %v993_v51 = vadd.f32 %v1931_v21, %v992_v42  ;;  %v1067_v21 = vmul.f32 %v1955_v55, %v1955_v55 }
 0x15f   :  { %v994_v43 = vadd.f32 %v993_v51, %v1953_v47  ;;  %v1126_v53 = vadd.f32 %v1125_v48, %v1063_v57  ;;  %v1068_v47 = vmul.f32 %v1977_v18, %v1977_v18 }
 0x161   :  { %v1127_v56 = vadd.f32 %v1126_v53, %v1064_v16  ;;  %v995_v27 = vadd.f32 %v994_v43, %v1959_v60 }
 0x163   :  { %v996_v50 = vadd.f32 %v1951_v44, %v995_v27  ;;  %v1128_v63 = vadd.f32 %v1127_v56, %v1065_v59  ;;  %v1070_v44 = vmul.f32 %v1975_v15, %v1975_v15 }
 0x165   :  { %v1129_v41 = vadd.f32 %v1128_v63, %v1066_v14  ;;  %v997_v1 = vadd.f32 %v1955_v55, %v996_v50  ;;  %v1071_v55 = vmul.f32 %v1979_v26, %v1979_v26 }
 0x167   :  { %v998_v2 = vadd.f32 %v997_v1, %v1977_v18  ;;  %v1130_v45 = vadd.f32 %v1129_v41, %v1067_v21  ;;  %v1072_v18 = vmul.f32 %v2001_v58, %v2001_v58 }
 0x169   :  { %v1131_v4 = vadd.f32 %v1130_v45, %v1068_v47  ;;  %v999_v60 = vadd.f32 %v998_v2, %v1983_v32 }
 0x16b   :  { %v1000_v0 = vadd.f32 %v1975_v15, %v999_v60  ;;  %v1132_v7 = vadd.f32 %v1131_v4, %v1069_v6  ;;  %v1074_v15 = vmul.f32 %v1999_v54, %v1999_v54 }
 0x16d   :  { %v1133_v10 = vadd.f32 %v1132_v7, %v1070_v44  ;;  %v1001_v11 = vadd.f32 %v1979_v26, %v1000_v0  ;;  %v1075_v26 = vmul.f32 %v2003_v3, %v2003_v3 }
 0x16f   :  { %v1002_v9 = vadd.f32 %v1001_v11, %v2001_v58  ;;  %v1134_v12 = vadd.f32 %v1133_v10, %v1071_v55 }
 0x171   :  { %v1135_v62 = vadd.f32 %v1134_v12, %v1072_v18  ;;  %v1003_v32 = vadd.f32 %v1002_v9, %v2007_v8 }
 0x173   :  { %v1004_v17 = vadd.f32 %v1999_v54, %v1003_v32  ;;  %v1136_v5 = vadd.f32 %v1135_v62, %v1073_v13 }
 0x175   :  { %v1005_v19 = vadd.f32 %v2003_v3, %v1004_v17  ;;  %v1137_v20 = vadd.f32 %v1136_v5, %v1074_v15 }
 0x177   :  { %v1006_v58 = vrot.slane %v1005_v19, 4  ;;  %v1138_v24 = vadd.f32 %v1137_v20, %v1075_v26 }
 0x179   :  { %v1007_v23 = vadd.f32 %v1006_v58, %v1005_v19  ;;  %v1139_v25 = vrot.slane %v1138_v24, 4 }
 0x17b   :  { %v1008_v28 = vrot.slane %v1007_v23, 2  ;;  %v1140_v33 = vadd.f32 %v1139_v25, %v1138_v24 }
 0x17d   :  { %v1009_v30 = vadd.f32 %v1008_v28, %v1007_v23  ;;  %v1141_v8 = vrot.slane %v1140_v33, 2 }
 0x17f   :  { %v1010_v22 = vrot.slane %v1009_v30, 1  ;;  %v1142_v31 = vadd.f32 %v1141_v8, %v1140_v33 }
 0x181   :  { %v1143_v34 = vrot.slane %v1142_v31, 1  ;;  %v1011_v54 = vadd.f32 %v1010_v22, %v1009_v30 }
 0x183   :  { %v1144_v29 = vadd.f32 %v1143_v34, %v1142_v31 }
 0x185   :  { %v1146_v35 = vsel %vm1145_vm0, %v1011_v54, %v1144_v29 }
 0x186   :  { %1147 = vst [vmem:[%s2125_s3] sm:$0x3] %v1146_v35 }

// kernel: discriminator_forward.10
= control target key start
LH: loop header
LB: loop body
LE: loop exit
PB: predicated region body
PF: predicated region fallthrough
CT: control target
= control target key end

     0   :  { %s1566_s0 = inlined_call_operand.vmem [shape: bf16[512,128], index: 0, kind: input, shape index: {}]   ;;  %s1567_s1 = inlined_call_operand.vmem [shape: f32[1,128], index: 1, kind: input, shape index: {}]   ;;  %s1568_s2 = inlined_call_operand.vmem [shape: f32[1,128], index: 2, kind: input, shape index: {}]   ;;  %s1569_s3 = inlined_call_operand.vmem [shape: bf16[512,128], index: 3, kind: output, shape index: {}]  }
   0x1   :  { %v867_v0 = vld [vmem:[%s1566_s0] sm:$0xff]   ;;  %v1154_v4 = vld [vmem:[%s1566_s0 + $0x8] sm:$0xff]   ;;  %v1155_v5 = vld [vmem:[%s1566_s0 + $0x10] sm:$0xff]  }
   0x2   :  { %v1242_v1 = vld [vmem:[%s1567_s1] ss:$0 sm:$0xff]  ;;  %v868_v2 = vunpack.c.l.bf16 %v867_v0  ;;  %v869_v3 = vunpack.c.h.bf16 %v867_v0  ;;  %v1156_v6 = vld [vmem:[%s1566_s0 + $0x18] sm:$0xff]   ;;  %v872_v8 = vunpack.c.l.bf16 %v1154_v4  ;;  %v873_v9 = vunpack.c.h.bf16 %v1154_v4  ;;  %v1158_v41 = vld [vmem:[%s1566_s0 + $0x28] sm:$0xff]  }
   0x3   :  { %v1256_v7 = vld [vmem:[%s1568_s2] ss:$0 sm:$0xff]  ;;  %v876_v10 = vunpack.c.l.bf16 %v1155_v5  ;;  %v877_v11 = vunpack.c.h.bf16 %v1155_v5  ;;  %v880_v14 = vunpack.c.l.bf16 %v1156_v6  ;;  %v881_v15 = vunpack.c.h.bf16 %v1156_v6  ;;  %v1159_v46 = vld [vmem:[%s1566_s0 + $0x30] sm:$0xff]   ;;  %v1160_v55 = vld [vmem:[%s1566_s0 + $0x38] sm:$0xff]  }
   0x4   :  { %v149_v12 = vmul.f32 %v868_v2, %v1242_v1  ;;  %v150_v13 = vmul.f32 %v869_v3, %v1242_v1  ;;  %v151_v16 = vmul.f32 %v872_v8, %v1242_v1  ;;  %v152_v17 = vmul.f32 %v873_v9, %v1242_v1  ;;  %v1157_v24 = vld [vmem:[%s1566_s0 + $0x20] sm:$0xff]  }
   0x5   :  { %v153_v18 = vmul.f32 %v876_v10, %v1242_v1  ;;  %v154_v19 = vmul.f32 %v877_v11, %v1242_v1  ;;  %v155_v22 = vmul.f32 %v880_v14, %v1242_v1  ;;  %v156_v23 = vmul.f32 %v881_v15, %v1242_v1  ;;  %v1161_v14 = vld [vmem:[%s1566_s0 + $0x40] sm:$0xff]  }
   0x6   :  { %v220_v20 = vadd.f32 %v1256_v7, %v149_v12  ;;  %v221_v21 = vadd.f32 %v1256_v7, %v150_v13  ;;  %v222_v25 = vadd.f32 %v1256_v7, %v151_v16  ;;  %v223_v26 = vadd.f32 %v1256_v7, %v152_v17 }
   0x7   :  { %v224_v27 = vadd.f32 %v1256_v7, %v153_v18  ;;  %v225_v28 = vadd.f32 %v1256_v7, %v154_v19  ;;  %v226_v31 = vadd.f32 %v1256_v7, %v155_v22  ;;  %v227_v32 = vadd.f32 %v1256_v7, %v156_v23 }
   0x8   :  { %v284_v29 = vmul.f32 0.2, %v220_v20  ;;  %v285_v30 = vmul.f32 0.2, %v221_v21  ;;  %v286_v33 = vmul.f32 0.2, %v222_v25  ;;  %v884_v36 = vunpack.c.l.bf16 %v1157_v24 }
   0x9   :  { %v287_v34 = vmul.f32 0.2, %v223_v26  ;;  %v288_v35 = vmul.f32 0.2, %v224_v27  ;;  %v289_v39 = vmul.f32 0.2, %v225_v28  ;;  %v885_v50 = vunpack.c.h.bf16 %v1157_v24 }
   0xa   :  { %v348_v37 = vmax.f32 %v220_v20, %v284_v29  ;;  %v349_v38 = vmax.f32 %v221_v21, %v285_v30  ;;  %v290_v40 = vmul.f32 0.2, %v226_v31  ;;  %v350_v42 = vmax.f32 %v222_v25, %v286_v33 }
   0xb   :  { %v351_v43 = vmax.f32 %v223_v26, %v287_v34  ;;  %v352_v44 = vmax.f32 %v224_v27, %v288_v35  ;;  %v291_v45 = vmul.f32 0.2, %v227_v32  ;;  %v353_v48 = vmax.f32 %v225_v28, %v289_v39  ;;  %v1162_v27 = vld [vmem:[%s1566_s0 + $0x48] sm:$0xff]  }
   0xc   :  { %v997_v47 = vpack.c.bf16 %v349_v38, %v348_v37  ;;  %v354_v49 = vmax.f32 %v226_v31, %v290_v40  ;;  %v157_v53 = vmul.f32 %v884_v36, %v1242_v1  ;;  %v888_v54 = vunpack.c.l.bf16 %v1158_v41  ;;  %v1163_v36 = vld [vmem:[%s1566_s0 + $0x50] sm:$0xff]  }
   0xd   :  { %v1002_v51 = vpack.c.bf16 %v351_v43, %v350_v42  ;;  %v355_v52 = vmax.f32 %v227_v32, %v291_v45  ;;  %v1007_v56 = vpack.c.bf16 %v353_v48, %v352_v44  ;;  %v158_v57 = vmul.f32 %v885_v50, %v1242_v1 }
   0xe   :  { %998 = vst [vmem:[%s1569_s3] sm:$0xff] %v997_v47   ;;  %v889_v58 = vunpack.c.h.bf16 %v1158_v41  ;;  %v892_v59 = vunpack.c.l.bf16 %v1159_v46  ;;  %v228_v61 = vadd.f32 %v1256_v7, %v157_v53  ;;  %v159_v62 = vmul.f32 %v888_v54, %v1242_v1  ;;  %v1164_v41 = vld [vmem:[%s1566_s0 + $0x58] sm:$0xff]  }
   0xf   :  { %1185 = vst [vmem:[%s1569_s3 + $0x8] sm:$0xff] %v1002_v51   ;;  %v1012_v60 = vpack.c.bf16 %v355_v52, %v354_v49  ;;  %v893_v63 = vunpack.c.h.bf16 %v1159_v46  ;;  %1186 = vst [vmem:[%s1569_s3 + $0x10] sm:$0xff] %v1007_v56   ;;  %v229_v0 = vadd.f32 %v1256_v7, %v158_v57  ;;  %v896_v4 = vunpack.c.l.bf16 %v1160_v55 }
  0x10   :  { %v160_v2 = vmul.f32 %v889_v58, %v1242_v1  ;;  %v161_v3 = vmul.f32 %v892_v59, %v1242_v1  ;;  %v292_v5 = vmul.f32 0.2, %v228_v61  ;;  %v230_v6 = vadd.f32 %v1256_v7, %v159_v62  ;;  %v1165_v58 = vld [vmem:[%s1566_s0 + $0x60] sm:$0xff]  }
  0x11   :  { %1187 = vst [vmem:[%s1569_s3 + $0x18] sm:$0xff] %v1012_v60   ;;  %v162_v8 = vmul.f32 %v893_v63, %v1242_v1  ;;  %v897_v9 = vunpack.c.h.bf16 %v1160_v55  ;;  %v293_v10 = vmul.f32 0.2, %v229_v0  ;;  %v163_v13 = vmul.f32 %v896_v4, %v1242_v1 }
  0x12   :  { %v231_v11 = vadd.f32 %v1256_v7, %v160_v2  ;;  %v232_v12 = vadd.f32 %v1256_v7, %v161_v3  ;;  %v356_v15 = vmax.f32 %v228_v61, %v292_v5  ;;  %v294_v16 = vmul.f32 0.2, %v230_v6 }
  0x13   :  { %v233_v17 = vadd.f32 %v1256_v7, %v162_v8  ;;  %v164_v18 = vmul.f32 %v897_v9, %v1242_v1  ;;  %v357_v19 = vmax.f32 %v229_v0, %v293_v10  ;;  %v234_v22 = vadd.f32 %v1256_v7, %v163_v13  ;;  %v1166_v13 = vld [vmem:[%s1566_s0 + $0x68] sm:$0xff]  }
  0x14   :  { %v295_v20 = vmul.f32 0.2, %v231_v11  ;;  %v296_v21 = vmul.f32 0.2, %v232_v12  ;;  %v358_v23 = vmax.f32 %v230_v6, %v294_v16  ;;  %v900_v26 = vunpack.c.l.bf16 %v1161_v14 }
  0x15   :  { %v297_v24 = vmul.f32 0.2, %v233_v17  ;;  %v235_v25 = vadd.f32 %v1256_v7, %v164_v18  ;;  %v1017_v28 = vpack.c.bf16 %v357_v19, %v356_v15  ;;  %v298_v31 = vmul.f32 0.2, %v234_v22  ;;  %v1167_v18 = vld [vmem:[%s1566_s0 + $0x70] sm:$0xff]  }
  0x16   :  { %v359_v29 = vmax.f32 %v231_v11, %v295_v20  ;;  %v360_v30 = vmax.f32 %v232_v12, %v296_v21  ;;  %v901_v34 = vunpack.c.h.bf16 %v1161_v14  ;;  %v165_v35 = vmul.f32 %v900_v26, %v1242_v1 }
  0x17   :  { %v361_v32 = vmax.f32 %v233_v17, %v297_v24  ;;  %v299_v33 = vmul.f32 0.2, %v235_v25  ;;  %1188 = vst [vmem:[%s1569_s3 + $0x20] sm:$0xff] %v1017_v28   ;;  %v362_v38 = vmax.f32 %v234_v22, %v298_v31  ;;  %v904_v39 = vunpack.c.l.bf16 %v1162_v27 }
  0x18   :  { %v1022_v37 = vpack.c.bf16 %v359_v29, %v358_v23  ;;  %v905_v40 = vunpack.c.h.bf16 %v1162_v27  ;;  %v166_v44 = vmul.f32 %v901_v34, %v1242_v1  ;;  %v236_v45 = vadd.f32 %v1256_v7, %v165_v35  ;;  %v1168_v27 = vld [vmem:[%s1566_s0 + $0x78] sm:$0xff]  }
  0x19   :  { %v1027_v42 = vpack.c.bf16 %v361_v32, %v360_v30  ;;  %v363_v43 = vmax.f32 %v235_v25, %v299_v33  ;;  %v167_v46 = vmul.f32 %v904_v39, %v1242_v1  ;;  %v908_v48 = vunpack.c.l.bf16 %v1163_v36 }
  0x1a   :  { %1189 = vst [vmem:[%s1569_s3 + $0x28] sm:$0xff] %v1022_v37   ;;  %v168_v47 = vmul.f32 %v905_v40, %v1242_v1  ;;  %v909_v49 = vunpack.c.h.bf16 %v1163_v36  ;;  %v237_v51 = vadd.f32 %v1256_v7, %v166_v44  ;;  %v300_v52 = vmul.f32 0.2, %v236_v45  ;;  %v1169_v44 = vld [vmem:[%s1566_s0 + $0x80] sm:$0xff]  }
  0x1b   :  { %1190 = vst [vmem:[%s1569_s3 + $0x30] sm:$0xff] %v1027_v42   ;;  %v1032_v50 = vpack.c.bf16 %v363_v43, %v362_v38  ;;  %v912_v53 = vunpack.c.l.bf16 %v1164_v41  ;;  %v238_v54 = vadd.f32 %v1256_v7, %v167_v46  ;;  %v169_v56 = vmul.f32 %v908_v48, %v1242_v1 }
  0x1c   :  { %v239_v55 = vadd.f32 %v1256_v7, %v168_v47  ;;  %v170_v57 = vmul.f32 %v909_v49, %v1242_v1  ;;  %v301_v59 = vmul.f32 0.2, %v237_v51  ;;  %v364_v60 = vmax.f32 %v236_v45, %v300_v52 }
  0x1d   :  { %1191 = vst [vmem:[%s1569_s3 + $0x38] sm:$0xff] %v1032_v50   ;;  %v913_v61 = vunpack.c.h.bf16 %v1164_v41  ;;  %v171_v62 = vmul.f32 %v912_v53, %v1242_v1  ;;  %v302_v63 = vmul.f32 0.2, %v238_v54  ;;  %v240_v2 = vadd.f32 %v1256_v7, %v169_v56 }
  0x1e   :  { %v303_v0 = vmul.f32 0.2, %v239_v55  ;;  %v241_v3 = vadd.f32 %v1256_v7, %v170_v57  ;;  %v365_v4 = vmax.f32 %v237_v51, %v301_v59  ;;  %v916_v8 = vunpack.c.l.bf16 %v1165_v58  ;;  %v1170_v57 = vld [vmem:[%s1566_s0 + $0x88] sm:$0xff]  }
  0x1f   :  { %v172_v5 = vmul.f32 %v913_v61, %v1242_v1  ;;  %v242_v6 = vadd.f32 %v1256_v7, %v171_v62  ;;  %v366_v9 = vmax.f32 %v238_v54, %v302_v63  ;;  %v304_v11 = vmul.f32 0.2, %v240_v2 }
  0x20   :  { %v367_v10 = vmax.f32 %v239_v55, %v303_v0  ;;  %v305_v12 = vmul.f32 0.2, %v241_v3  ;;  %v1037_v14 = vpack.c.bf16 %v365_v4, %v364_v60  ;;  %v917_v17 = vunpack.c.h.bf16 %v1165_v58 }
  0x21   :  { %v243_v15 = vadd.f32 %v1256_v7, %v172_v5  ;;  %v306_v16 = vmul.f32 0.2, %v242_v6  ;;  %v368_v20 = vmax.f32 %v240_v2, %v304_v11  ;;  %v173_v22 = vmul.f32 %v916_v8, %v1242_v1  ;;  %v1171_v8 = vld [vmem:[%s1566_s0 + $0x90] sm:$0xff]  }
  0x22   :  { %v1042_v19 = vpack.c.bf16 %v367_v10, %v366_v9  ;;  %v369_v21 = vmax.f32 %v241_v3, %v305_v12  ;;  %1192 = vst [vmem:[%s1569_s3 + $0x40] sm:$0xff] %v1037_v14   ;;  %v174_v25 = vmul.f32 %v917_v17, %v1242_v1  ;;  %v920_v26 = vunpack.c.l.bf16 %v1166_v13 }
  0x23   :  { %v307_v23 = vmul.f32 0.2, %v243_v15  ;;  %v370_v24 = vmax.f32 %v242_v6, %v306_v16  ;;  %v244_v29 = vadd.f32 %v1256_v7, %v173_v22  ;;  %v921_v30 = vunpack.c.h.bf16 %v1166_v13  ;;  %v1172_v13 = vld [vmem:[%s1566_s0 + $0x98] sm:$0xff]  }
  0x24   :  { %1193 = vst [vmem:[%s1569_s3 + $0x48] sm:$0xff] %v1042_v19   ;;  %v1047_v28 = vpack.c.bf16 %v369_v21, %v368_v20  ;;  %v924_v31 = vunpack.c.l.bf16 %v1167_v18  ;;  %v245_v33 = vadd.f32 %v1256_v7, %v174_v25  ;;  %v175_v34 = vmul.f32 %v920_v26, %v1242_v1 }
  0x25   :  { %v371_v32 = vmax.f32 %v243_v15, %v307_v23  ;;  %v925_v35 = vunpack.c.h.bf16 %v1167_v18  ;;  %v308_v36 = vmul.f32 0.2, %v244_v29  ;;  %v176_v37 = vmul.f32 %v921_v30, %v1242_v1  ;;  %v1173_v30 = vld [vmem:[%s1566_s0 + $0xa0] sm:$0xff]  }
  0x26   :  { %1194 = vst [vmem:[%s1569_s3 + $0x50] sm:$0xff] %v1047_v28   ;;  %v177_v38 = vmul.f32 %v924_v31, %v1242_v1  ;;  %v928_v39 = vunpack.c.l.bf16 %v1168_v27  ;;  %v309_v41 = vmul.f32 0.2, %v245_v33  ;;  %v246_v42 = vadd.f32 %v1256_v7, %v175_v34 }
  0x27   :  { %v1052_v40 = vpack.c.bf16 %v371_v32, %v370_v24  ;;  %v178_v43 = vmul.f32 %v925_v35, %v1242_v1  ;;  %v372_v45 = vmax.f32 %v244_v29, %v308_v36  ;;  %v247_v46 = vadd.f32 %v1256_v7, %v176_v37 }
  0x28   :  { %v248_v47 = vadd.f32 %v1256_v7, %v177_v38  ;;  %v929_v48 = vunpack.c.h.bf16 %v1168_v27  ;;  %v373_v49 = vmax.f32 %v245_v33, %v309_v41  ;;  %v310_v50 = vmul.f32 0.2, %v246_v42 }
  0x29   :  { %1195 = vst [vmem:[%s1569_s3 + $0x58] sm:$0xff] %v1052_v40   ;;  %v249_v51 = vadd.f32 %v1256_v7, %v178_v43  ;;  %v179_v52 = vmul.f32 %v928_v39, %v1242_v1  ;;  %v311_v53 = vmul.f32 0.2, %v247_v46  ;;  %v932_v56 = vunpack.c.l.bf16 %v1169_v44  ;;  %v1174_v43 = vld [vmem:[%s1566_s0 + $0xa8] sm:$0xff]  }
  0x2a   :  { %v312_v54 = vmul.f32 0.2, %v248_v47  ;;  %v180_v55 = vmul.f32 %v929_v48, %v1242_v1  ;;  %v1057_v58 = vpack.c.bf16 %v373_v49, %v372_v45  ;;  %v374_v59 = vmax.f32 %v246_v42, %v310_v50 }
  0x2b   :  { %v313_v60 = vmul.f32 0.2, %v249_v51  ;;  %v250_v61 = vadd.f32 %v1256_v7, %v179_v52  ;;  %v375_v62 = vmax.f32 %v247_v46, %v311_v53  ;;  %v933_v2 = vunpack.c.h.bf16 %v1169_v44  ;;  %v1175_v52 = vld [vmem:[%s1566_s0 + $0xb0] sm:$0xff]  }
  0x2c   :  { %v376_v63 = vmax.f32 %v248_v47, %v312_v54  ;;  %v251_v0 = vadd.f32 %v1256_v7, %v180_v55  ;;  %1196 = vst [vmem:[%s1569_s3 + $0x60] sm:$0xff] %v1057_v58   ;;  %v181_v5 = vmul.f32 %v932_v56, %v1242_v1  ;;  %v936_v6 = vunpack.c.l.bf16 %v1170_v57 }
  0x2d   :  { %v377_v3 = vmax.f32 %v249_v51, %v313_v60  ;;  %v314_v4 = vmul.f32 0.2, %v250_v61  ;;  %v1062_v9 = vpack.c.bf16 %v375_v62, %v374_v59  ;;  %v182_v11 = vmul.f32 %v933_v2, %v1242_v1  ;;  %v1176_v2 = vld [vmem:[%s1566_s0 + $0xb8] sm:$0xff]  }
  0x2e   :  { %v315_v10 = vmul.f32 0.2, %v251_v0  ;;  %v937_v12 = vunpack.c.h.bf16 %v1170_v57  ;;  %v252_v16 = vadd.f32 %v1256_v7, %v181_v5  ;;  %v183_v17 = vmul.f32 %v936_v6, %v1242_v1 }
  0x2f   :  { %v1067_v14 = vpack.c.bf16 %v377_v3, %v376_v63  ;;  %v378_v15 = vmax.f32 %v250_v61, %v314_v4  ;;  %1197 = vst [vmem:[%s1569_s3 + $0x68] sm:$0xff] %v1062_v9   ;;  %v253_v19 = vadd.f32 %v1256_v7, %v182_v11  ;;  %v940_v21 = vunpack.c.l.bf16 %v1171_v8 }
  0x30   :  { %v379_v18 = vmax.f32 %v251_v0, %v315_v10  ;;  %v184_v20 = vmul.f32 %v937_v12, %v1242_v1  ;;  %v316_v22 = vmul.f32 0.2, %v252_v16  ;;  %v254_v23 = vadd.f32 %v1256_v7, %v183_v17  ;;  %v1177_v12 = vld [vmem:[%s1566_s0 + $0xc0] sm:$0xff]  }
  0x31   :  { %1198 = vst [vmem:[%s1569_s3 + $0x70] sm:$0xff] %v1067_v14   ;;  %v941_v24 = vunpack.c.h.bf16 %v1171_v8  ;;  %v944_v25 = vunpack.c.l.bf16 %v1172_v13  ;;  %v317_v27 = vmul.f32 0.2, %v253_v19  ;;  %v185_v29 = vmul.f32 %v940_v21, %v1242_v1 }
  0x32   :  { %v1072_v26 = vpack.c.bf16 %v379_v18, %v378_v15  ;;  %v255_v28 = vadd.f32 %v1256_v7, %v184_v20  ;;  %v380_v31 = vmax.f32 %v252_v16, %v316_v22  ;;  %v318_v32 = vmul.f32 0.2, %v254_v23 }
  0x33   :  { %v186_v33 = vmul.f32 %v941_v24, %v1242_v1  ;;  %v945_v34 = vunpack.c.h.bf16 %v1172_v13  ;;  %v381_v35 = vmax.f32 %v253_v19, %v317_v27  ;;  %v256_v37 = vadd.f32 %v1256_v7, %v185_v29  ;;  %v1178_v29 = vld [vmem:[%s1566_s0 + $0xc8] sm:$0xff]  }
  0x34   :  { %1199 = vst [vmem:[%s1569_s3 + $0x78] sm:$0xff] %v1072_v26   ;;  %v319_v36 = vmul.f32 0.2, %v255_v28  ;;  %v187_v38 = vmul.f32 %v944_v25, %v1242_v1  ;;  %v382_v39 = vmax.f32 %v254_v23, %v318_v32  ;;  %v948_v42 = vunpack.c.l.bf16 %v1173_v30 }
  0x35   :  { %v257_v40 = vadd.f32 %v1256_v7, %v186_v33  ;;  %v188_v41 = vmul.f32 %v945_v34, %v1242_v1  ;;  %v1077_v44 = vpack.c.bf16 %v381_v35, %v380_v31  ;;  %v320_v46 = vmul.f32 0.2, %v256_v37 }
  0x36   :  { %v383_v45 = vmax.f32 %v255_v28, %v319_v36  ;;  %v258_v47 = vadd.f32 %v1256_v7, %v187_v38  ;;  %v949_v50 = vunpack.c.h.bf16 %v1173_v30  ;;  %v189_v51 = vmul.f32 %v948_v42, %v1242_v1  ;;  %v1179_v42 = vld [vmem:[%s1566_s0 + $0xd0] sm:$0xff]  }
  0x37   :  { %v321_v48 = vmul.f32 0.2, %v257_v40  ;;  %v259_v49 = vadd.f32 %v1256_v7, %v188_v41  ;;  %1200 = vst [vmem:[%s1569_s3 + $0x80] sm:$0xff] %v1077_v44   ;;  %v384_v54 = vmax.f32 %v256_v37, %v320_v46  ;;  %v952_v56 = vunpack.c.l.bf16 %v1174_v43 }
  0x38   :  { %v1082_v53 = vpack.c.bf16 %v383_v45, %v382_v39  ;;  %v322_v55 = vmul.f32 0.2, %v258_v47  ;;  %v190_v59 = vmul.f32 %v949_v50, %v1242_v1  ;;  %v260_v60 = vadd.f32 %v1256_v7, %v189_v51  ;;  %v1180_v51 = vld [vmem:[%s1566_s0 + $0xd8] sm:$0xff]  }
  0x39   :  { %v385_v57 = vmax.f32 %v257_v40, %v321_v48  ;;  %v323_v58 = vmul.f32 0.2, %v259_v49  ;;  %v953_v62 = vunpack.c.h.bf16 %v1174_v43  ;;  %v191_v63 = vmul.f32 %v952_v56, %v1242_v1 }
  0x3a   :  { %1201 = vst [vmem:[%s1569_s3 + $0x88] sm:$0xff] %v1082_v53   ;;  %v386_v61 = vmax.f32 %v258_v47, %v322_v55  ;;  %v956_v0 = vunpack.c.l.bf16 %v1175_v52  ;;  %v261_v5 = vadd.f32 %v1256_v7, %v190_v59  ;;  %v324_v6 = vmul.f32 0.2, %v260_v60 }
  0x3b   :  { %v1087_v3 = vpack.c.bf16 %v385_v57, %v384_v54  ;;  %v387_v4 = vmax.f32 %v259_v49, %v323_v58  ;;  %v192_v8 = vmul.f32 %v953_v62, %v1242_v1  ;;  %v262_v9 = vadd.f32 %v1256_v7, %v191_v63 }
  0x3c   :  { %v957_v10 = vunpack.c.h.bf16 %v1175_v52  ;;  %v193_v11 = vmul.f32 %v956_v0, %v1242_v1  ;;  %v325_v14 = vmul.f32 0.2, %v261_v5  ;;  %v388_v15 = vmax.f32 %v260_v60, %v324_v6  ;;  %v1181_v0 = vld [vmem:[%s1566_s0 + $0xe0] sm:$0xff]  }
  0x3d   :  { %1202 = vst [vmem:[%s1569_s3 + $0x90] sm:$0xff] %v1087_v3   ;;  %v1092_v13 = vpack.c.bf16 %v387_v4, %v386_v61  ;;  %v960_v16 = vunpack.c.l.bf16 %v1176_v2  ;;  %v263_v17 = vadd.f32 %v1256_v7, %v192_v8  ;;  %v326_v18 = vmul.f32 0.2, %v262_v9 }
  0x3e   :  { %v194_v19 = vmul.f32 %v957_v10, %v1242_v1  ;;  %v264_v20 = vadd.f32 %v1256_v7, %v193_v11  ;;  %v389_v21 = vmax.f32 %v261_v5, %v325_v14  ;;  %v961_v22 = vunpack.c.h.bf16 %v1176_v2  ;;  %v1182_v11 = vld [vmem:[%s1566_s0 + $0xe8] sm:$0xff]  }
  0x3f   :  { %1203 = vst [vmem:[%s1569_s3 + $0x98] sm:$0xff] %v1092_v13   ;;  %v195_v23 = vmul.f32 %v960_v16, %v1242_v1  ;;  %v964_v24 = vunpack.c.l.bf16 %v1177_v12  ;;  %v327_v25 = vmul.f32 0.2, %v263_v17  ;;  %v390_v26 = vmax.f32 %v262_v9, %v326_v18 }
  0x40   :  { %v265_v27 = vadd.f32 %v1256_v7, %v194_v19  ;;  %v328_v28 = vmul.f32 0.2, %v264_v20  ;;  %v1097_v30 = vpack.c.bf16 %v389_v21, %v388_v15  ;;  %v196_v31 = vmul.f32 %v961_v22, %v1242_v1 }
  0x41   :  { %v266_v32 = vadd.f32 %v1256_v7, %v195_v23  ;;  %v965_v33 = vunpack.c.h.bf16 %v1177_v12  ;;  %v391_v34 = vmax.f32 %v263_v17, %v327_v25  ;;  %v197_v37 = vmul.f32 %v964_v24, %v1242_v1  ;;  %v1183_v24 = vld [vmem:[%s1566_s0 + $0xf0] sm:$0xff]  }
  0x42   :  { %v329_v35 = vmul.f32 0.2, %v265_v27  ;;  %v392_v36 = vmax.f32 %v264_v20, %v328_v28  ;;  %1204 = vst [vmem:[%s1569_s3 + $0xa0] sm:$0xff] %v1097_v30   ;;  %v267_v38 = vadd.f32 %v1256_v7, %v196_v31  ;;  %v968_v41 = vunpack.c.l.bf16 %v1178_v29 }
  0x43   :  { %v330_v39 = vmul.f32 0.2, %v266_v32  ;;  %v198_v40 = vmul.f32 %v965_v33, %v1242_v1  ;;  %v1102_v43 = vpack.c.bf16 %v391_v34, %v390_v26  ;;  %v268_v45 = vadd.f32 %v1256_v7, %v197_v37  ;;  %v1184_v37 = vld [vmem:[%s1566_s0 + $0xf8] sm:$0xff]  }
  0x44   :  { %v393_v44 = vmax.f32 %v265_v27, %v329_v35  ;;  %v969_v46 = vunpack.c.h.bf16 %v1178_v29  ;;  %v331_v47 = vmul.f32 0.2, %v267_v38  ;;  %v199_v50 = vmul.f32 %v968_v41, %v1242_v1 }
  0x45   :  { %v394_v48 = vmax.f32 %v266_v32, %v330_v39  ;;  %v269_v49 = vadd.f32 %v1256_v7, %v198_v40  ;;  %1205 = vst [vmem:[%s1569_s3 + $0xa8] sm:$0xff] %v1102_v43   ;;  %v332_v53 = vmul.f32 0.2, %v268_v45  ;;  %v972_v55 = vunpack.c.l.bf16 %v1179_v42 }
  0x46   :  { %v1107_v52 = vpack.c.bf16 %v393_v44, %v392_v36  ;;  %v200_v54 = vmul.f32 %v969_v46, %v1242_v1  ;;  %v395_v56 = vmax.f32 %v267_v38, %v331_v47  ;;  %v270_v58 = vadd.f32 %v1256_v7, %v199_v50 }
  0x47   :  { %v333_v57 = vmul.f32 0.2, %v269_v49  ;;  %v973_v59 = vunpack.c.h.bf16 %v1179_v42  ;;  %v396_v60 = vmax.f32 %v268_v45, %v332_v53  ;;  %v201_v62 = vmul.f32 %v972_v55, %v1242_v1 }
  0x48   :  { %1206 = vst [vmem:[%s1569_s3 + $0xb0] sm:$0xff] %v1107_v52   ;;  %v271_v61 = vadd.f32 %v1256_v7, %v200_v54  ;;  %v976_v63 = vunpack.c.l.bf16 %v1180_v51  ;;  %v1112_v2 = vpack.c.bf16 %v395_v56, %v394_v48  ;;  %v334_v4 = vmul.f32 0.2, %v270_v58 }
  0x49   :  { %v397_v3 = vmax.f32 %v269_v49, %v333_v57  ;;  %v202_v5 = vmul.f32 %v973_v59, %v1242_v1  ;;  %v272_v8 = vadd.f32 %v1256_v7, %v201_v62  ;;  %v977_v9 = vunpack.c.h.bf16 %v1180_v51 }
  0x4a   :  { %v335_v6 = vmul.f32 0.2, %v271_v61  ;;  %v203_v10 = vmul.f32 %v976_v63, %v1242_v1  ;;  %1207 = vst [vmem:[%s1569_s3 + $0xb8] sm:$0xff] %v1112_v2   ;;  %v398_v13 = vmax.f32 %v270_v58, %v334_v4  ;;  %v980_v15 = vunpack.c.l.bf16 %v1181_v0 }
  0x4b   :  { %v1117_v12 = vpack.c.bf16 %v397_v3, %v396_v60  ;;  %v273_v14 = vadd.f32 %v1256_v7, %v202_v5  ;;  %v336_v17 = vmul.f32 0.2, %v272_v8  ;;  %v204_v18 = vmul.f32 %v977_v9, %v1242_v1 }
  0x4c   :  { %v399_v16 = vmax.f32 %v271_v61, %v335_v6  ;;  %v274_v19 = vadd.f32 %v1256_v7, %v203_v10  ;;  %v981_v21 = vunpack.c.h.bf16 %v1181_v0  ;;  %v205_v22 = vmul.f32 %v980_v15, %v1242_v1 }
  0x4d   :  { %1208 = vst [vmem:[%s1569_s3 + $0xc0] sm:$0xff] %v1117_v12   ;;  %v337_v20 = vmul.f32 0.2, %v273_v14  ;;  %v984_v23 = vunpack.c.l.bf16 %v1182_v11  ;;  %v400_v26 = vmax.f32 %v272_v8, %v336_v17  ;;  %v275_v27 = vadd.f32 %v1256_v7, %v204_v18 }
  0x4e   :  { %v1122_v25 = vpack.c.bf16 %v399_v16, %v398_v13  ;;  %v338_v28 = vmul.f32 0.2, %v274_v19  ;;  %v206_v30 = vmul.f32 %v981_v21, %v1242_v1  ;;  %v276_v31 = vadd.f32 %v1256_v7, %v205_v22 }
  0x4f   :  { %v401_v29 = vmax.f32 %v273_v14, %v337_v20  ;;  %v985_v32 = vunpack.c.h.bf16 %v1182_v11  ;;  %v339_v33 = vmul.f32 0.2, %v275_v27  ;;  %v207_v35 = vmul.f32 %v984_v23, %v1242_v1 }
  0x50   :  { %1209 = vst [vmem:[%s1569_s3 + $0xc8] sm:$0xff] %v1122_v25   ;;  %v402_v34 = vmax.f32 %v274_v19, %v338_v28  ;;  %v988_v36 = vunpack.c.l.bf16 %v1183_v24  ;;  %v277_v39 = vadd.f32 %v1256_v7, %v206_v30  ;;  %v340_v40 = vmul.f32 0.2, %v276_v31 }
  0x51   :  { %v1127_v38 = vpack.c.bf16 %v401_v29, %v400_v26  ;;  %v208_v41 = vmul.f32 %v985_v32, %v1242_v1  ;;  %v403_v42 = vmax.f32 %v275_v27, %v339_v33  ;;  %v278_v43 = vadd.f32 %v1256_v7, %v207_v35 }
  0x52   :  { %v989_v44 = vunpack.c.h.bf16 %v1183_v24  ;;  %v209_v45 = vmul.f32 %v988_v36, %v1242_v1  ;;  %v341_v46 = vmul.f32 0.2, %v277_v39  ;;  %v404_v47 = vmax.f32 %v276_v31, %v340_v40 }
  0x53   :  { %1210 = vst [vmem:[%s1569_s3 + $0xd0] sm:$0xff] %v1127_v38   ;;  %v279_v48 = vadd.f32 %v1256_v7, %v208_v41  ;;  %v992_v49 = vunpack.c.l.bf16 %v1184_v37  ;;  %v1132_v50 = vpack.c.bf16 %v403_v42, %v402_v34  ;;  %v342_v51 = vmul.f32 0.2, %v278_v43 }
  0x54   :  { %v210_v52 = vmul.f32 %v989_v44, %v1242_v1  ;;  %v280_v53 = vadd.f32 %v1256_v7, %v209_v45  ;;  %v405_v54 = vmax.f32 %v277_v39, %v341_v46  ;;  %v993_v56 = vunpack.c.h.bf16 %v1184_v37 }
  0x55   :  { %v343_v55 = vmul.f32 0.2, %v279_v48  ;;  %v211_v57 = vmul.f32 %v992_v49, %v1242_v1  ;;  %1211 = vst [vmem:[%s1569_s3 + $0xd8] sm:$0xff] %v1132_v50   ;;  %v406_v58 = vmax.f32 %v278_v43, %v342_v51 }
  0x56   :  { %v281_v59 = vadd.f32 %v1256_v7, %v210_v52  ;;  %v344_v60 = vmul.f32 0.2, %v280_v53  ;;  %v1137_v61 = vpack.c.bf16 %v405_v54, %v404_v47  ;;  %v212_v63 = vmul.f32 %v993_v56, %v1242_v1 }
  0x57   :  { %v407_v62 = vmax.f32 %v279_v48, %v343_v55  ;;  %v282_v0 = vadd.f32 %v1256_v7, %v211_v57 }
  0x58   :  { %v345_v2 = vmul.f32 0.2, %v281_v59  ;;  %v408_v3 = vmax.f32 %v280_v53, %v344_v60  ;;  %1212 = vst [vmem:[%s1569_s3 + $0xe0] sm:$0xff] %v1137_v61   ;;  %v283_v5 = vadd.f32 %v1256_v7, %v212_v63 }
  0x59   :  { %v1142_v4 = vpack.c.bf16 %v407_v62, %v406_v58  ;;  %v346_v6 = vmul.f32 0.2, %v282_v0 }
  0x5a   :  { %v409_v8 = vmax.f32 %v281_v59, %v345_v2  ;;  %v347_v9 = vmul.f32 0.2, %v283_v5 }
  0x5b   :  { %1213 = vst [vmem:[%s1569_s3 + $0xe8] sm:$0xff] %v1142_v4   ;;  %v410_v10 = vmax.f32 %v282_v0, %v346_v6 }
  0x5c   :  { %v1147_v1 = vpack.c.bf16 %v409_v8, %v408_v3  ;;  %v411_v11 = vmax.f32 %v283_v5, %v347_v9 }
  0x5e   :  { %1214 = vst [vmem:[%s1569_s3 + $0xf0] sm:$0xff] %v1147_v1   ;;  %v1152_v12 = vpack.c.bf16 %v411_v11, %v410_v10 }
  0x60   :  { %1215 = vst [vmem:[%s1569_s3 + $0xf8] sm:$0xff] %v1152_v12  }

// kernel: discriminator_forward.11
= control target key start
LH: loop header
LB: loop body
LE: loop exit
PB: predicated region body
PF: predicated region fallthrough
CT: control target
= control target key end

     0   :  { %vm473_vm0 = vcmask 1040384   ;;  %s876_s1 = inlined_call_operand.vmem [shape: bf16[256,128], index: 1, kind: input, shape index: {}]   ;;  %s877_s0 = inlined_call_operand.vmem [shape: bf16[128,256], index: 0, kind: input, shape index: {}]   ;;  %s878_s2 = inlined_call_operand.vmem [shape: bf16[128,128], index: 2, kind: output, shape index: {0}]   ;;  %s879_s3 = inlined_call_operand.vmem [shape: f32[1,2,128], index: 3, kind: output, shape index: {1}]  }
   0x1   :  { %v675_v0 = vld [vmem:[%s876_s1 + $0x40] sm:$0xff]   ;;  %v677_v2 = vld [vmem:[%s876_s1 + $0x48] sm:$0xff]   ;;  %v679_v4 = vld [vmem:[%s876_s1 + $0x50] sm:$0xff]  }
   0x2   :  { %v676_v1 = vld [vmem:[%s876_s1] sm:$0xff]   ;;  %595 = vmatprep.subr.bf16.mxu0 %v675_v0  ;;  %659 = vmatprep.subr.bf16.mxu1 %v675_v0  ;;  %v678_v3 = vld [vmem:[%s876_s1 + $0x8] sm:$0xff]   ;;  %v680_v5 = vld [vmem:[%s876_s1 + $0x10] sm:$0xff]  }
   0x3   :  { %596 = vmatpush3.bf16.msra.mxu0 %v676_v1  ;;  %667 = vmatpush3.bf16.msra.mxu1 %v676_v1  ;;  %v681_v6 = vld [vmem:[%s876_s1 + $0x58] sm:$0xff]   ;;  %v683_v8 = vld [vmem:[%s876_s1 + $0x60] sm:$0xff]   ;;  %v685_v10 = vld [vmem:[%s876_s1 + $0x68] sm:$0xff]  }
   0x4   :  { %597 = vmatprep.subr.bf16.mxu0 %v677_v2  ;;  %660 = vmatprep.subr.bf16.mxu1 %v677_v2  ;;  %v682_v7 = vld [vmem:[%s876_s1 + $0x18] sm:$0xff]   ;;  %v684_v9 = vld [vmem:[%s876_s1 + $0x20] sm:$0xff]   ;;  %v686_v12 = vld [vmem:[%s876_s1 + $0x28] sm:$0xff]  }
   0x5   :  { %v693_v11 = vld [vmem:[%s877_s0 + $0x4] ss:$8 sps:$4 sm:$0xff]   ;;  %v687_v14 = vld [vmem:[%s876_s1 + $0x70] sm:$0xff]   ;;  %v689_v16 = vld [vmem:[%s876_s1 + $0x78] sm:$0xff]  }
   0x6   :  { %v699_v13 = vld [vmem:[%s877_s0 + $0x44] ss:$8 sps:$4 sm:$0xff]   ;;  %270 = vmatprep.mubr.bf16.mxu0 %v693_v11  ;;  %v688_v15 = vld [vmem:[%s876_s1 + $0x30] sm:$0xff]   ;;  %v690_v17 = vld [vmem:[%s876_s1 + $0x38] sm:$0xff]  }
   0x7   :  { %598 = vmatpush3.bf16.msra.mxu0 %v678_v3  ;;  %668 = vmatpush3.bf16.msra.mxu1 %v678_v3  ;;  %v691_v18 = vld [vmem:[%s877_s0] ss:$8 sps:$4 sm:$0xff]   ;;  %v694_v20 = vld [vmem:[%s877_s0 + $0x14] ss:$8 sps:$4 sm:$0xff]   ;;  %v696_v22 = vld [vmem:[%s877_s0 + $0x10] ss:$8 sps:$4 sm:$0xff]  }
   0x8   :  { %599 = vmatprep.subr.bf16.mxu0 %v679_v4  ;;  %661 = vmatprep.subr.bf16.mxu1 %v679_v4  ;;  %v697_v19 = vld [vmem:[%s877_s0 + $0x40] ss:$8 sps:$4 sm:$0xff]   ;;  %v703_v21 = vld [vmem:[%s877_s0 + $0x54] ss:$8 sps:$4 sm:$0xff]   ;;  %v705_v23 = vld [vmem:[%s877_s0 + $0x50] ss:$8 sps:$4 sm:$0xff]  }
   0x9   :  { %302 = vmatprep.mubr.bf16.mxu1 %v699_v13  ;;  %v700_v24 = vld [vmem:[%s877_s0 + $0x24] ss:$8 sps:$4 sm:$0xff]   ;;  %v702_v26 = vld [vmem:[%s877_s0 + $0x20] ss:$8 sps:$4 sm:$0xff]   ;;  %v706_v28 = vld [vmem:[%s877_s0 + $0x34] ss:$8 sps:$4 sm:$0xff]  }
   0xa   :  { %v709_v25 = vld [vmem:[%s877_s0 + $0x64] ss:$8 sps:$4 sm:$0xff]   ;;  %v711_v27 = vld [vmem:[%s877_s0 + $0x60] ss:$8 sps:$4 sm:$0xff]   ;;  %v712_v29 = vld [vmem:[%s877_s0 + $0x74] ss:$8 sps:$4 sm:$0xff]  }
   0xb   :  { %600 = vmatpush3.bf16.msra.mxu0 %v680_v5  ;;  %669 = vmatpush3.bf16.msra.mxu1 %v680_v5  ;;  %v708_v30 = vld [vmem:[%s877_s0 + $0x30] ss:$8 sps:$4 sm:$0xff]  }
   0xc   :  { %601 = vmatprep.subr.bf16.mxu0 %v681_v6  ;;  %662 = vmatprep.subr.bf16.mxu1 %v681_v6  ;;  %v714_v31 = vld [vmem:[%s877_s0 + $0x70] ss:$8 sps:$4 sm:$0xff]  }
   0xf   :  { %602 = vmatpush3.bf16.msra.mxu0 %v682_v7  ;;  %670 = vmatpush3.bf16.msra.mxu1 %v682_v7 }
  0x10   :  { %603 = vmatprep.subr.bf16.mxu0 %v683_v8  ;;  %663 = vmatprep.subr.bf16.mxu1 %v683_v8 }
  0x13   :  { %604 = vmatpush3.bf16.msra.mxu0 %v684_v9  ;;  %671 = vmatpush3.bf16.msra.mxu1 %v684_v9 }
  0x14   :  { %605 = vmatprep.subr.bf16.mxu0 %v685_v10  ;;  %664 = vmatprep.subr.bf16.mxu1 %v685_v10 }
  0x17   :  { %606 = vmatpush3.bf16.msra.mxu0 %v686_v12  ;;  %672 = vmatpush3.bf16.msra.mxu1 %v686_v12 }
  0x18   :  { %607 = vmatprep.subr.bf16.mxu0 %v687_v14  ;;  %665 = vmatprep.subr.bf16.mxu1 %v687_v14 }
  0x1b   :  { %608 = vmatpush3.bf16.msra.mxu0 %v688_v15  ;;  %673 = vmatpush3.bf16.msra.mxu1 %v688_v15 }
  0x1c   :  { %609 = vmatprep.subr.bf16.mxu0 %v689_v16  ;;  %666 = vmatprep.subr.bf16.mxu1 %v689_v16 }
  0x1f   :  { %610 = vmatpush3.bf16.msra.mxu0 %v690_v17  ;;  %674 = vmatpush3.bf16.msra.mxu1 %v690_v17 }
  0x22   :  { %271 = vmatmul.mubr.bf16.vlgmr.msra.gmra.mrb[0].mxu0 %v691_v18  ;;  %303 = vmatmul.mubr.bf16.vlgmr.msra.gmra.mrb[0].mxu1 %v697_v19 }
  0x23   :  { %278 = vmatprep.mubr.bf16.mxu0 %v694_v20  ;;  %310 = vmatprep.mubr.bf16.mxu1 %v703_v21 }
  0x2a   :  { %279 = vmatmul.mubr.bf16.gmra.mrb[4].mxu0 %v696_v22  ;;  %311 = vmatmul.mubr.bf16.gmra.mrb[4].mxu1 %v705_v23 }
  0x2b   :  { %286 = vmatprep.mubr.bf16.mxu0 %v700_v24  ;;  %318 = vmatprep.mubr.bf16.mxu1 %v709_v25 }
  0x32   :  { %287 = vmatmul.mubr.bf16.gmra.mrb[8].mxu0 %v702_v26  ;;  %319 = vmatmul.mubr.bf16.gmra.mrb[8].mxu1 %v711_v27 }
  0x33   :  { %294 = vmatprep.mubr.bf16.mxu0 %v706_v28  ;;  %326 = vmatprep.mubr.bf16.mxu1 %v712_v29 }
  0x3a   :  { %295 = vmatmul.mubr.bf16.gmra.mrb[12].mxu0 %v708_v30  ;;  %327 = vmatmul.mubr.bf16.gmra.mrb[12].mxu1 %v714_v31 }
  0xf5   :  { %v611_v32 = vpop.f32.mrb[0].mxu0  ;;  %v635_v33 = vpop.f32.mrb[0].mxu1 }
  0xf6   :  { %v612_v34 = vpop.f32.mrb[1].mxu0  ;;  %v636_v35 = vpop.f32.mrb[1].mxu1 }
  0xf7   :  { %v613_v36 = vadd.f32 %v612_v34, %v611_v32  ;;  %v614_v37 = vpop.f32.mrb[2].mxu0  ;;  %v831_v38 = vadd.f32 %v636_v35, %v635_v33  ;;  %v638_v39 = vpop.f32.mrb[2].mxu1 }
  0xf8   :  { %v615_v40 = vpop.f32.mrb[3].mxu0  ;;  %v639_v41 = vpop.f32.mrb[3].mxu1 }
  0xf9   :  { %v616_v42 = vadd.f32 %v615_v40, %v614_v37  ;;  %v833_v43 = vadd.f32 %v639_v41, %v638_v39  ;;  %v436_v44 = vmul.f32 %v613_v36, %v613_v36 }
  0xfb   :  { %v551_v45 = vpack.c.bf16 %v616_v42, %v613_v36  ;;  %v415_v46 = vadd.f32 %v616_v42, %v613_v36  ;;  %v437_v47 = vmul.f32 %v616_v42, %v616_v42  ;;  %v571_v48 = vpack.c.bf16 %v833_v43, %v831_v38 }
  0xfd   :  { %552 = vst [vmem:[%s878_s2] sm:$0xff] %v551_v45   ;;  %v452_v49 = vadd.f32 %v437_v47, %v436_v44  ;;  %v617_v50 = vpop.f32.mrb[4].mxu0  ;;  %591 = vst [vmem:[%s878_s2 + $0x20] sm:$0xff] %v571_v48   ;;  %v641_v51 = vpop.f32.mrb[4].mxu1  ;;  %v444_v47 = vmul.f32 %v831_v38, %v831_v38 }
  0xfe   :  { %v618_v52 = vpop.f32.mrb[5].mxu0  ;;  %v642_v53 = vpop.f32.mrb[5].mxu1 }
  0xff   :  { %v619_v54 = vadd.f32 %v618_v52, %v617_v50  ;;  %v620_v55 = vpop.f32.mrb[6].mxu0  ;;  %v843_v56 = vadd.f32 %v642_v53, %v641_v51  ;;  %v644_v57 = vpop.f32.mrb[6].mxu1  ;;  %v445_v50 = vmul.f32 %v833_v43, %v833_v43 }
 0x100   :  { %v621_v58 = vpop.f32.mrb[7].mxu0  ;;  %v645_v59 = vpop.f32.mrb[7].mxu1 }
 0x101   :  { %v416_v60 = vadd.f32 %v619_v54, %v415_v46  ;;  %v438_v61 = vmul.f32 %v619_v54, %v619_v54  ;;  %v622_v62 = vadd.f32 %v621_v58, %v620_v55  ;;  %v646_v63 = vadd.f32 %v645_v59, %v644_v57 }
 0x102   :  { %v446_v53 = vmul.f32 %v843_v56, %v843_v56 }
 0x103   :  { %v453_v0 = vadd.f32 %v452_v49, %v438_v61  ;;  %v556_v1 = vpack.c.bf16 %v622_v62, %v619_v54  ;;  %v417_v2 = vadd.f32 %v622_v62, %v416_v60  ;;  %v439_v3 = vmul.f32 %v622_v62, %v622_v62 }
 0x104   :  { %v576_v4 = vpack.c.bf16 %v646_v63, %v843_v56  ;;  %v447_v57 = vmul.f32 %v646_v63, %v646_v63 }
 0x105   :  { %588 = vst [vmem:[%s878_s2 + $0x8] sm:$0xff] %v556_v1   ;;  %v454_v5 = vadd.f32 %v453_v0, %v439_v3  ;;  %v623_v6 = vpop.f32.mrb[8].mxu0  ;;  %v647_v7 = vpop.f32.mrb[8].mxu1 }
 0x106   :  { %v624_v8 = vpop.f32.mrb[9].mxu0  ;;  %592 = vst [vmem:[%s878_s2 + $0x28] sm:$0xff] %v576_v4   ;;  %v648_v9 = vpop.f32.mrb[9].mxu1 }
 0x107   :  { %v625_v10 = vadd.f32 %v624_v8, %v623_v6  ;;  %v626_v11 = vpop.f32.mrb[10].mxu0  ;;  %v649_v12 = vadd.f32 %v648_v9, %v647_v7  ;;  %v650_v13 = vpop.f32.mrb[10].mxu1 }
 0x108   :  { %v627_v14 = vpop.f32.mrb[11].mxu0  ;;  %v651_v15 = vpop.f32.mrb[11].mxu1 }
 0x109   :  { %v418_v16 = vadd.f32 %v625_v10, %v417_v2  ;;  %v440_v17 = vmul.f32 %v625_v10, %v625_v10  ;;  %v628_v18 = vadd.f32 %v627_v14, %v626_v11  ;;  %v652_v19 = vadd.f32 %v651_v15, %v650_v13 }
 0x10a   :  { %v448_v60 = vmul.f32 %v649_v12, %v649_v12 }
 0x10b   :  { %v455_v20 = vadd.f32 %v454_v5, %v440_v17  ;;  %v561_v21 = vpack.c.bf16 %v628_v18, %v625_v10  ;;  %v419_v22 = vadd.f32 %v628_v18, %v418_v16  ;;  %v441_v23 = vmul.f32 %v628_v18, %v628_v18 }
 0x10c   :  { %v581_v24 = vpack.c.bf16 %v652_v19, %v649_v12  ;;  %v449_v1 = vmul.f32 %v652_v19, %v652_v19 }
 0x10d   :  { %589 = vst [vmem:[%s878_s2 + $0x10] sm:$0xff] %v561_v21   ;;  %v456_v25 = vadd.f32 %v455_v20, %v441_v23  ;;  %v629_v26 = vpop.f32.mrb[12].mxu0  ;;  %v653_v27 = vpop.f32.mrb[12].mxu1 }
 0x10e   :  { %v630_v28 = vpop.f32.mrb[13].mxu0  ;;  %593 = vst [vmem:[%s878_s2 + $0x30] sm:$0xff] %v581_v24   ;;  %v654_v29 = vpop.f32.mrb[13].mxu1 }
 0x10f   :  { %v631_v30 = vadd.f32 %v630_v28, %v629_v26  ;;  %v632_v31 = vpop.f32.mrb[14].mxu0  ;;  %v655_v32 = vadd.f32 %v654_v29, %v653_v27  ;;  %v656_v33 = vpop.f32.mrb[14].mxu1 }
 0x110   :  { %v633_v34 = vpop.f32.mrb[15].mxu0  ;;  %v657_v35 = vpop.f32.mrb[15].mxu1 }
 0x111   :  { %v420_v36 = vadd.f32 %v631_v30, %v419_v22  ;;  %v442_v37 = vmul.f32 %v631_v30, %v631_v30  ;;  %v634_v39 = vadd.f32 %v633_v34, %v632_v31  ;;  %v658_v40 = vadd.f32 %v657_v35, %v656_v33 }
 0x112   :  { %v450_v2 = vmul.f32 %v655_v32, %v655_v32 }
 0x113   :  { %v457_v41 = vadd.f32 %v456_v25, %v442_v37  ;;  %v566_v42 = vpack.c.bf16 %v634_v39, %v631_v30  ;;  %v421_v44 = vadd.f32 %v634_v39, %v420_v36  ;;  %v443_v45 = vmul.f32 %v634_v39, %v634_v39 }
 0x114   :  { %v586_v46 = vpack.c.bf16 %v658_v40, %v655_v32  ;;  %v451_v6 = vmul.f32 %v658_v40, %v658_v40 }
 0x115   :  { %590 = vst [vmem:[%s878_s2 + $0x18] sm:$0xff] %v566_v42   ;;  %v422_v48 = vadd.f32 %v831_v38, %v421_v44  ;;  %v458_v49 = vadd.f32 %v457_v41, %v443_v45 }
 0x116   :  { %594 = vst [vmem:[%s878_s2 + $0x38] sm:$0xff] %v586_v46  }
 0x117   :  { %v423_v51 = vadd.f32 %v833_v43, %v422_v48  ;;  %v459_v52 = vadd.f32 %v458_v49, %v444_v47 }
 0x119   :  { %v460_v54 = vadd.f32 %v459_v52, %v445_v50  ;;  %v424_v55 = vadd.f32 %v843_v56, %v423_v51 }
 0x11b   :  { %v425_v58 = vadd.f32 %v646_v63, %v424_v55  ;;  %v461_v38 = vadd.f32 %v460_v54, %v446_v53 }
 0x11d   :  { %v426_v59 = vadd.f32 %v649_v12, %v425_v58  ;;  %v462_v61 = vadd.f32 %v461_v38, %v447_v57 }
 0x11f   :  { %v463_v62 = vadd.f32 %v462_v61, %v448_v60  ;;  %v427_v0 = vadd.f32 %v652_v19, %v426_v59 }
 0x121   :  { %v464_v3 = vadd.f32 %v463_v62, %v449_v1  ;;  %v428_v4 = vadd.f32 %v655_v32, %v427_v0 }
 0x123   :  { %v465_v43 = vadd.f32 %v464_v3, %v450_v2  ;;  %v429_v5 = vadd.f32 %v658_v40, %v428_v4 }
 0x125   :  { %v430_v7 = vrot.slane %v429_v5, 4  ;;  %v466_v8 = vadd.f32 %v465_v43, %v451_v6 }
 0x127   :  { %v431_v9 = vadd.f32 %v430_v7, %v429_v5  ;;  %v467_v10 = vrot.slane %v466_v8, 4 }
 0x129   :  { %v432_v56 = vrot.slane %v431_v9, 2  ;;  %v468_v11 = vadd.f32 %v467_v10, %v466_v8 }
 0x12b   :  { %v433_v63 = vadd.f32 %v432_v56, %v431_v9  ;;  %v469_v13 = vrot.slane %v468_v11, 2 }
 0x12d   :  { %v434_v14 = vrot.slane %v433_v63, 1  ;;  %v470_v12 = vadd.f32 %v469_v13, %v468_v11 }
 0x12f   :  { %v471_v15 = vrot.slane %v470_v12, 1  ;;  %v435_v16 = vadd.f32 %v434_v14, %v433_v63 }
 0x131   :  { %v472_v17 = vadd.f32 %v471_v15, %v470_v12 }
 0x133   :  { %v474_v18 = vsel %vm473_vm0, %v435_v16, %v472_v17 }
 0x134   :  { %475 = vst [vmem:[%s879_s3] sm:$0x3] %v474_v18 }

// kernel: discriminator_forward.12
= control target key start
LH: loop header
LB: loop body
LE: loop exit
PB: predicated region body
PF: predicated region fallthrough
CT: control target
= control target key end

     0   :  { %s438_s0 = inlined_call_operand.vmem [shape: bf16[128,128], index: 0, kind: input, shape index: {}]   ;;  %s439_s1 = inlined_call_operand.vmem [shape: f32[1,128], index: 1, kind: input, shape index: {}]   ;;  %s440_s2 = inlined_call_operand.vmem [shape: f32[1,128], index: 2, kind: input, shape index: {}]   ;;  %s441_s3 = inlined_call_operand.vmem [shape: bf16[128,128], index: 3, kind: output, shape index: {}]  }
   0x1   :  { %v243_v0 = vld [vmem:[%s438_s0] sm:$0xff]   ;;  %v314_v4 = vld [vmem:[%s438_s0 + $0x8] sm:$0xff]   ;;  %v315_v5 = vld [vmem:[%s438_s0 + $0x10] sm:$0xff]  }
   0x2   :  { %v354_v1 = vld [vmem:[%s439_s1] ss:$0 sm:$0xff]  ;;  %v244_v2 = vunpack.c.l.bf16 %v243_v0  ;;  %v245_v3 = vunpack.c.h.bf16 %v243_v0  ;;  %v316_v6 = vld [vmem:[%s438_s0 + $0x18] sm:$0xff]   ;;  %v248_v8 = vunpack.c.l.bf16 %v314_v4  ;;  %v249_v9 = vunpack.c.h.bf16 %v314_v4  ;;  %v318_v41 = vld [vmem:[%s438_s0 + $0x28] sm:$0xff]  }
   0x3   :  { %v368_v7 = vld [vmem:[%s440_s2] ss:$0 sm:$0xff]  ;;  %v252_v10 = vunpack.c.l.bf16 %v315_v5  ;;  %v253_v11 = vunpack.c.h.bf16 %v315_v5  ;;  %v256_v14 = vunpack.c.l.bf16 %v316_v6  ;;  %v257_v15 = vunpack.c.h.bf16 %v316_v6  ;;  %v319_v46 = vld [vmem:[%s438_s0 + $0x30] sm:$0xff]   ;;  %v320_v55 = vld [vmem:[%s438_s0 + $0x38] sm:$0xff]  }
   0x4   :  { %v53_v12 = vmul.f32 %v244_v2, %v354_v1  ;;  %v54_v13 = vmul.f32 %v245_v3, %v354_v1  ;;  %v55_v16 = vmul.f32 %v248_v8, %v354_v1  ;;  %v56_v17 = vmul.f32 %v249_v9, %v354_v1  ;;  %v317_v24 = vld [vmem:[%s438_s0 + $0x20] sm:$0xff]  }
   0x5   :  { %v57_v18 = vmul.f32 %v252_v10, %v354_v1  ;;  %v58_v19 = vmul.f32 %v253_v11, %v354_v1  ;;  %v59_v22 = vmul.f32 %v256_v14, %v354_v1  ;;  %v60_v23 = vmul.f32 %v257_v15, %v354_v1 }
   0x6   :  { %v76_v20 = vadd.f32 %v368_v7, %v53_v12  ;;  %v77_v21 = vadd.f32 %v368_v7, %v54_v13  ;;  %v78_v25 = vadd.f32 %v368_v7, %v55_v16  ;;  %v79_v26 = vadd.f32 %v368_v7, %v56_v17 }
   0x7   :  { %v80_v27 = vadd.f32 %v368_v7, %v57_v18  ;;  %v81_v28 = vadd.f32 %v368_v7, %v58_v19  ;;  %v82_v31 = vadd.f32 %v368_v7, %v59_v22  ;;  %v83_v32 = vadd.f32 %v368_v7, %v60_v23 }
   0x8   :  { %v92_v29 = vmul.f32 0.2, %v76_v20  ;;  %v93_v30 = vmul.f32 0.2, %v77_v21  ;;  %v94_v33 = vmul.f32 0.2, %v78_v25  ;;  %v260_v36 = vunpack.c.l.bf16 %v317_v24 }
   0x9   :  { %v95_v34 = vmul.f32 0.2, %v79_v26  ;;  %v96_v35 = vmul.f32 0.2, %v80_v27  ;;  %v97_v39 = vmul.f32 0.2, %v81_v28  ;;  %v261_v50 = vunpack.c.h.bf16 %v317_v24 }
   0xa   :  { %v108_v37 = vmax.f32 %v76_v20, %v92_v29  ;;  %v109_v38 = vmax.f32 %v77_v21, %v93_v30  ;;  %v98_v40 = vmul.f32 0.2, %v82_v31  ;;  %v110_v42 = vmax.f32 %v78_v25, %v94_v33 }
   0xb   :  { %v111_v43 = vmax.f32 %v79_v26, %v95_v34  ;;  %v112_v44 = vmax.f32 %v80_v27, %v96_v35  ;;  %v99_v45 = vmul.f32 0.2, %v83_v32  ;;  %v113_v48 = vmax.f32 %v81_v28, %v97_v39 }
   0xc   :  { %v277_v47 = vpack.c.bf16 %v109_v38, %v108_v37  ;;  %v114_v49 = vmax.f32 %v82_v31, %v98_v40  ;;  %v61_v53 = vmul.f32 %v260_v36, %v354_v1  ;;  %v264_v54 = vunpack.c.l.bf16 %v318_v41 }
   0xd   :  { %v282_v51 = vpack.c.bf16 %v111_v43, %v110_v42  ;;  %v115_v52 = vmax.f32 %v83_v32, %v99_v45  ;;  %v287_v56 = vpack.c.bf16 %v113_v48, %v112_v44  ;;  %v62_v57 = vmul.f32 %v261_v50, %v354_v1 }
   0xe   :  { %278 = vst [vmem:[%s441_s3] sm:$0xff] %v277_v47   ;;  %v265_v58 = vunpack.c.h.bf16 %v318_v41  ;;  %v268_v59 = vunpack.c.l.bf16 %v319_v46  ;;  %v84_v61 = vadd.f32 %v368_v7, %v61_v53  ;;  %v63_v62 = vmul.f32 %v264_v54, %v354_v1 }
   0xf   :  { %321 = vst [vmem:[%s441_s3 + $0x8] sm:$0xff] %v282_v51   ;;  %v292_v60 = vpack.c.bf16 %v115_v52, %v114_v49  ;;  %v269_v63 = vunpack.c.h.bf16 %v319_v46  ;;  %322 = vst [vmem:[%s441_s3 + $0x10] sm:$0xff] %v287_v56   ;;  %v85_v0 = vadd.f32 %v368_v7, %v62_v57  ;;  %v272_v4 = vunpack.c.l.bf16 %v320_v55 }
  0x10   :  { %v64_v2 = vmul.f32 %v265_v58, %v354_v1  ;;  %v65_v3 = vmul.f32 %v268_v59, %v354_v1  ;;  %v100_v5 = vmul.f32 0.2, %v84_v61  ;;  %v86_v6 = vadd.f32 %v368_v7, %v63_v62 }
  0x11   :  { %323 = vst [vmem:[%s441_s3 + $0x18] sm:$0xff] %v292_v60   ;;  %v66_v8 = vmul.f32 %v269_v63, %v354_v1  ;;  %v273_v9 = vunpack.c.h.bf16 %v320_v55  ;;  %v101_v10 = vmul.f32 0.2, %v85_v0  ;;  %v67_v13 = vmul.f32 %v272_v4, %v354_v1 }
  0x12   :  { %v87_v11 = vadd.f32 %v368_v7, %v64_v2  ;;  %v88_v12 = vadd.f32 %v368_v7, %v65_v3  ;;  %v116_v14 = vmax.f32 %v84_v61, %v100_v5  ;;  %v102_v15 = vmul.f32 0.2, %v86_v6 }
  0x13   :  { %v89_v16 = vadd.f32 %v368_v7, %v66_v8  ;;  %v68_v17 = vmul.f32 %v273_v9, %v354_v1  ;;  %v117_v18 = vmax.f32 %v85_v0, %v101_v10  ;;  %v90_v21 = vadd.f32 %v368_v7, %v67_v13 }
  0x14   :  { %v103_v19 = vmul.f32 0.2, %v87_v11  ;;  %v104_v20 = vmul.f32 0.2, %v88_v12  ;;  %v118_v22 = vmax.f32 %v86_v6, %v102_v15 }
  0x15   :  { %v105_v23 = vmul.f32 0.2, %v89_v16  ;;  %v91_v24 = vadd.f32 %v368_v7, %v68_v17  ;;  %v297_v25 = vpack.c.bf16 %v117_v18, %v116_v14  ;;  %v106_v28 = vmul.f32 0.2, %v90_v21 }
  0x16   :  { %v119_v26 = vmax.f32 %v87_v11, %v103_v19  ;;  %v120_v27 = vmax.f32 %v88_v12, %v104_v20 }
  0x17   :  { %v121_v29 = vmax.f32 %v89_v16, %v105_v23  ;;  %v107_v30 = vmul.f32 0.2, %v91_v24  ;;  %324 = vst [vmem:[%s441_s3 + $0x20] sm:$0xff] %v297_v25   ;;  %v122_v31 = vmax.f32 %v90_v21, %v106_v28 }
  0x18   :  { %v302_v1 = vpack.c.bf16 %v119_v26, %v118_v22 }
  0x19   :  { %v307_v32 = vpack.c.bf16 %v121_v29, %v120_v27  ;;  %v123_v33 = vmax.f32 %v91_v24, %v107_v30 }
  0x1a   :  { %325 = vst [vmem:[%s441_s3 + $0x28] sm:$0xff] %v302_v1  }
  0x1b   :  { %326 = vst [vmem:[%s441_s3 + $0x30] sm:$0xff] %v307_v32   ;;  %v312_v7 = vpack.c.bf16 %v123_v33, %v122_v31 }
  0x1d   :  { %327 = vst [vmem:[%s441_s3 + $0x38] sm:$0xff] %v312_v7  }

// kernel: discriminator_forward.13
= control target key start
LH: loop header
LB: loop body
LE: loop exit
PB: predicated region body
PF: predicated region fallthrough
CT: control target
= control target key end

     0   :  { %vm458_vm0 = vcmask 1040384   ;;  %s777_s1 = inlined_call_operand.vmem [shape: bf16[512,128], index: 1, kind: input, shape index: {}]   ;;  %s778_s0 = inlined_call_operand.vmem [shape: bf16[32,512], index: 0, kind: input, shape index: {}]   ;;  %s779_s2 = inlined_call_operand.vmem [shape: bf16[32,128], index: 2, kind: output, shape index: {0}]   ;;  %s780_s3 = inlined_call_operand.vmem [shape: f32[1,2,128], index: 3, kind: output, shape index: {1}]  }
   0x1   :  { %v584_v0 = vld [vmem:[%s777_s1 + $0x40] sm:$0xff]   ;;  %v588_v4 = vld [vmem:[%s777_s1 + $0x48] sm:$0xff]   ;;  %v592_v8 = vld [vmem:[%s777_s1 + $0x50] sm:$0xff]  }
   0x2   :  { %v585_v1 = vld [vmem:[%s777_s1 + $0xc0] sm:$0xff]   ;;  %528 = vmatprep.subr.bf16.mxu0 %v584_v0  ;;  %v589_v5 = vld [vmem:[%s777_s1 + $0xc8] sm:$0xff]   ;;  %v593_v9 = vld [vmem:[%s777_s1 + $0xd0] sm:$0xff]  }
   0x3   :  { %v586_v2 = vld [vmem:[%s777_s1] sm:$0xff]   ;;  %556 = vmatprep.subr.bf16.mxu1 %v585_v1  ;;  %v590_v6 = vld [vmem:[%s777_s1 + $0x8] sm:$0xff]   ;;  %v594_v10 = vld [vmem:[%s777_s1 + $0x10] sm:$0xff]  }
   0x4   :  { %v587_v3 = vld [vmem:[%s777_s1 + $0x80] sm:$0xff]   ;;  %529 = vmatpush3.bf16.msra.mxu0 %v586_v2  ;;  %v591_v7 = vld [vmem:[%s777_s1 + $0x88] sm:$0xff]   ;;  %v595_v11 = vld [vmem:[%s777_s1 + $0x90] sm:$0xff]  }
   0x5   :  { %557 = vmatpush3.bf16.msra.mxu1 %v587_v3  ;;  %530 = vmatprep.subr.bf16.mxu0 %v588_v4  ;;  %v596_v12 = vld [vmem:[%s777_s1 + $0x58] sm:$0xff]   ;;  %v600_v16 = vld [vmem:[%s777_s1 + $0x60] sm:$0xff]   ;;  %v604_v20 = vld [vmem:[%s777_s1 + $0x68] sm:$0xff]  }
   0x6   :  { %558 = vmatprep.subr.bf16.mxu1 %v589_v5  ;;  %v597_v13 = vld [vmem:[%s777_s1 + $0xd8] sm:$0xff]   ;;  %v601_v17 = vld [vmem:[%s777_s1 + $0xe0] sm:$0xff]   ;;  %v605_v21 = vld [vmem:[%s777_s1 + $0xe8] sm:$0xff]  }
   0x7   :  { %v598_v14 = vld [vmem:[%s777_s1 + $0x18] sm:$0xff]   ;;  %v602_v18 = vld [vmem:[%s777_s1 + $0x20] sm:$0xff]   ;;  %v606_v22 = vld [vmem:[%s777_s1 + $0x28] sm:$0xff]  }
   0x8   :  { %531 = vmatpush3.bf16.msra.mxu0 %v590_v6  ;;  %v599_v15 = vld [vmem:[%s777_s1 + $0x98] sm:$0xff]   ;;  %v603_v19 = vld [vmem:[%s777_s1 + $0xa0] sm:$0xff]   ;;  %v607_v23 = vld [vmem:[%s777_s1 + $0xa8] sm:$0xff]  }
   0x9   :  { %559 = vmatpush3.bf16.msra.mxu1 %v591_v7  ;;  %532 = vmatprep.subr.bf16.mxu0 %v592_v8  ;;  %v608_v24 = vld [vmem:[%s777_s1 + $0x70] sm:$0xff]   ;;  %v612_v28 = vld [vmem:[%s777_s1 + $0x78] sm:$0xff]  }
   0xa   :  { %560 = vmatprep.subr.bf16.mxu1 %v593_v9  ;;  %v609_v25 = vld [vmem:[%s777_s1 + $0xf0] sm:$0xff]   ;;  %v613_v29 = vld [vmem:[%s777_s1 + $0xf8] sm:$0xff]  }
   0xb   :  { %v610_v26 = vld [vmem:[%s777_s1 + $0x30] sm:$0xff]   ;;  %v614_v30 = vld [vmem:[%s777_s1 + $0x38] sm:$0xff]  }
   0xc   :  { %533 = vmatpush3.bf16.msra.mxu0 %v594_v10  ;;  %v611_v27 = vld [vmem:[%s777_s1 + $0xb0] sm:$0xff]   ;;  %v615_v31 = vld [vmem:[%s777_s1 + $0xb8] sm:$0xff]  }
   0xd   :  { %561 = vmatpush3.bf16.msra.mxu1 %v595_v11  ;;  %534 = vmatprep.subr.bf16.mxu0 %v596_v12  ;;  %v616_v32 = vld [vmem:[%s778_s0] ss:$16 sps:$4 sm:$0xff]   ;;  %v618_v33 = vld [vmem:[%s778_s0 + $0x4] ss:$16 sps:$4 sm:$0xff]   ;;  %v619_v34 = vld [vmem:[%s778_s0 + $0x8] ss:$16 sps:$4 sm:$0xff]  }
   0xe   :  { %562 = vmatprep.subr.bf16.mxu1 %v597_v13  ;;  %v621_v35 = vld [vmem:[%s778_s0 + $0xc] ss:$16 sps:$4 sm:$0xff]   ;;  %350 = vmatprep.mubr.bf16.mxu0 %v618_v33  ;;  %v622_v36 = vld [vmem:[%s778_s0 + $0x24] ss:$16 sps:$4 sm:$0xff]   ;;  %v626_v38 = vld [vmem:[%s778_s0 + $0x20] ss:$16 sps:$4 sm:$0xff]  }
   0xf   :  { %399 = vmatprep.mubr.bf16.mxu1 %v621_v35  ;;  %v624_v37 = vld [vmem:[%s778_s0 + $0x2c] ss:$16 sps:$4 sm:$0xff]   ;;  %v627_v39 = vld [vmem:[%s778_s0 + $0x28] ss:$16 sps:$4 sm:$0xff]  }
  0x10   :  { %535 = vmatpush3.bf16.msra.mxu0 %v598_v14 }
  0x11   :  { %563 = vmatpush3.bf16.msra.mxu1 %v599_v15  ;;  %536 = vmatprep.subr.bf16.mxu0 %v600_v16 }
  0x12   :  { %564 = vmatprep.subr.bf16.mxu1 %v601_v17 }
  0x14   :  { %537 = vmatpush3.bf16.msra.mxu0 %v602_v18 }
  0x15   :  { %565 = vmatpush3.bf16.msra.mxu1 %v603_v19  ;;  %538 = vmatprep.subr.bf16.mxu0 %v604_v20 }
  0x16   :  { %566 = vmatprep.subr.bf16.mxu1 %v605_v21 }
  0x18   :  { %539 = vmatpush3.bf16.msra.mxu0 %v606_v22 }
  0x19   :  { %567 = vmatpush3.bf16.msra.mxu1 %v607_v23  ;;  %540 = vmatprep.subr.bf16.mxu0 %v608_v24 }
  0x1a   :  { %568 = vmatprep.subr.bf16.mxu1 %v609_v25 }
  0x1c   :  { %541 = vmatpush3.bf16.msra.mxu0 %v610_v26 }
  0x1d   :  { %569 = vmatpush3.bf16.msra.mxu1 %v611_v27  ;;  %542 = vmatprep.subr.bf16.mxu0 %v612_v28 }
  0x1e   :  { %570 = vmatprep.subr.bf16.mxu1 %v613_v29 }
  0x20   :  { %543 = vmatpush3.bf16.msra.mxu0 %v614_v30 }
  0x21   :  { %571 = vmatpush3.bf16.msra.mxu1 %v615_v31 }
  0x23   :  { %351 = vmatmul.mubr.bf16.vlgmr.msra.gmra.mrb[0].mxu0 %v616_v32 }
  0x24   :  { %400 = vmatmul.mubr.bf16.vlgmr.msra.gmra.mrb[0].mxu1 %v619_v34  ;;  %358 = vmatprep.mubr.bf16.mxu0 %v622_v36 }
  0x25   :  { %407 = vmatprep.mubr.bf16.mxu1 %v624_v37 }
  0x2b   :  { %359 = vmatmul.mubr.bf16.gmra.mrb[4].mxu0 %v626_v38 }
  0x2c   :  { %408 = vmatmul.mubr.bf16.gmra.mrb[4].mxu1 %v627_v39 }
  0xf6   :  { %v544_v40 = vpop.f32.mrb[0].mxu0 }
  0xf7   :  { %v572_v41 = vpop.f32.mrb[0].mxu1  ;;  %v545_v42 = vpop.f32.mrb[1].mxu0 }
  0xf8   :  { %v546_v43 = vadd.f32 %v545_v42, %v544_v40  ;;  %v573_v44 = vpop.f32.mrb[1].mxu1  ;;  %v547_v45 = vpop.f32.mrb[2].mxu0 }
  0xf9   :  { %v574_v46 = vadd.f32 %v573_v44, %v572_v41  ;;  %v575_v47 = vpop.f32.mrb[2].mxu1  ;;  %v548_v48 = vpop.f32.mrb[3].mxu0 }
  0xfa   :  { %v549_v49 = vadd.f32 %v548_v48, %v547_v45  ;;  %v576_v50 = vpop.f32.mrb[3].mxu1 }
  0xfb   :  { %v402_v51 = vadd.f32 %v574_v46, %v546_v43  ;;  %v577_v52 = vadd.f32 %v576_v50, %v575_v47 }
  0xfd   :  { %v405_v53 = vadd.f32 %v577_v52, %v549_v49  ;;  %v445_v55 = vmul.f32 %v402_v51, %v402_v51 }
  0xfe   :  { %v550_v54 = vpop.f32.mrb[4].mxu0 }
  0xff   :  { %v520_v56 = vpack.c.bf16 %v405_v53, %v402_v51  ;;  %v436_v57 = vadd.f32 %v405_v53, %v402_v51  ;;  %v446_v58 = vmul.f32 %v405_v53, %v405_v53  ;;  %v578_v59 = vpop.f32.mrb[4].mxu1  ;;  %v551_v60 = vpop.f32.mrb[5].mxu0 }
 0x100   :  { %v552_v61 = vadd.f32 %v551_v60, %v550_v54  ;;  %v579_v62 = vpop.f32.mrb[5].mxu1  ;;  %v553_v63 = vpop.f32.mrb[6].mxu0 }
 0x101   :  { %521 = vst [vmem:[%s779_s2] sm:$0xff] %v520_v56   ;;  %v449_v0 = vadd.f32 %v446_v58, %v445_v55  ;;  %v580_v1 = vadd.f32 %v579_v62, %v578_v59  ;;  %v581_v2 = vpop.f32.mrb[6].mxu1  ;;  %v554_v3 = vpop.f32.mrb[7].mxu0 }
 0x102   :  { %v555_v4 = vadd.f32 %v554_v3, %v553_v63  ;;  %v582_v5 = vpop.f32.mrb[7].mxu1 }
 0x103   :  { %v410_v6 = vadd.f32 %v580_v1, %v552_v61  ;;  %v583_v7 = vadd.f32 %v582_v5, %v581_v2 }
 0x105   :  { %v437_v8 = vadd.f32 %v436_v57, %v410_v6  ;;  %v447_v9 = vmul.f32 %v410_v6, %v410_v6  ;;  %v413_v10 = vadd.f32 %v583_v7, %v555_v4 }
 0x107   :  { %v450_v11 = vadd.f32 %v449_v0, %v447_v9  ;;  %v525_v12 = vpack.c.bf16 %v413_v10, %v410_v6  ;;  %v438_v13 = vadd.f32 %v437_v8, %v413_v10  ;;  %v448_v14 = vmul.f32 %v413_v10, %v413_v10 }
 0x109   :  { %527 = vst [vmem:[%s779_s2 + $0x8] sm:$0xff] %v525_v12   ;;  %v439_v15 = vrot.slane %v438_v13, 4  ;;  %v451_v16 = vadd.f32 %v450_v11, %v448_v14 }
 0x10b   :  { %v440_v17 = vadd.f32 %v439_v15, %v438_v13  ;;  %v452_v18 = vrot.slane %v451_v16, 4 }
 0x10d   :  { %v441_v19 = vrot.slane %v440_v17, 2  ;;  %v453_v20 = vadd.f32 %v452_v18, %v451_v16 }
 0x10f   :  { %v442_v21 = vadd.f32 %v441_v19, %v440_v17  ;;  %v454_v22 = vrot.slane %v453_v20, 2 }
 0x111   :  { %v443_v23 = vrot.slane %v442_v21, 1  ;;  %v455_v24 = vadd.f32 %v454_v22, %v453_v20 }
 0x113   :  { %v456_v25 = vrot.slane %v455_v24, 1  ;;  %v444_v26 = vadd.f32 %v443_v23, %v442_v21 }
 0x115   :  { %v457_v27 = vadd.f32 %v456_v25, %v455_v24 }
 0x117   :  { %v459_v28 = vsel %vm458_vm0, %v444_v26, %v457_v27 }
 0x118   :  { %460 = vst [vmem:[%s780_s3] sm:$0x3] %v459_v28 }

// kernel: discriminator_forward.14
= control target key start
LH: loop header
LB: loop body
LE: loop exit
PB: predicated region body
PF: predicated region fallthrough
CT: control target
= control target key end

     0   :  { %s144_s0 = inlined_call_operand.vmem [shape: bf16[32,128], index: 0, kind: input, shape index: {}]   ;;  %s145_s1 = inlined_call_operand.vmem [shape: f32[1,128], index: 1, kind: input, shape index: {}]   ;;  %s146_s2 = inlined_call_operand.vmem [shape: f32[1,128], index: 2, kind: input, shape index: {}]   ;;  %s147_s3 = inlined_call_operand.vmem [shape: bf16[32,128], index: 3, kind: output, shape index: {}]  }
   0x1   :  { %v87_v0 = vld [vmem:[%s144_s0] sm:$0xff]   ;;  %v104_v4 = vld [vmem:[%s144_s0 + $0x8] sm:$0xff]  }
   0x2   :  { %v76_v1 = vld [vmem:[%s145_s1] ss:$0 sm:$0xff]  ;;  %v88_v2 = vunpack.c.l.bf16 %v87_v0  ;;  %v89_v3 = vunpack.c.h.bf16 %v87_v0  ;;  %v92_v6 = vunpack.c.l.bf16 %v104_v4  ;;  %v93_v7 = vunpack.c.h.bf16 %v104_v4 }
   0x3   :  { %v77_v5 = vld [vmem:[%s146_s2] ss:$0 sm:$0xff] }
   0x4   :  { %v29_v8 = vmul.f32 %v88_v2, %v76_v1  ;;  %v30_v9 = vmul.f32 %v89_v3, %v76_v1  ;;  %v31_v10 = vmul.f32 %v92_v6, %v76_v1  ;;  %v32_v11 = vmul.f32 %v93_v7, %v76_v1 }
   0x6   :  { %v40_v12 = vadd.f32 %v77_v5, %v29_v8  ;;  %v41_v13 = vadd.f32 %v77_v5, %v30_v9  ;;  %v42_v14 = vadd.f32 %v77_v5, %v31_v10  ;;  %v43_v15 = vadd.f32 %v77_v5, %v32_v11 }
   0x8   :  { %v44_v16 = vmul.f32 0.2, %v40_v12  ;;  %v45_v17 = vmul.f32 0.2, %v41_v13  ;;  %v46_v18 = vmul.f32 0.2, %v42_v14 }
   0x9   :  { %v47_v19 = vmul.f32 0.2, %v43_v15 }
   0xa   :  { %v48_v20 = vmax.f32 %v40_v12, %v44_v16  ;;  %v49_v21 = vmax.f32 %v41_v13, %v45_v17  ;;  %v50_v22 = vmax.f32 %v42_v14, %v46_v18 }
   0xb   :  { %v51_v23 = vmax.f32 %v43_v15, %v47_v19 }
   0xc   :  { %v97_v24 = vpack.c.bf16 %v49_v21, %v48_v20 }
   0xd   :  { %v102_v25 = vpack.c.bf16 %v51_v23, %v50_v22 }
   0xe   :  { %98 = vst [vmem:[%s147_s3] sm:$0xff] %v97_v24  }
   0xf   :  { %105 = vst [vmem:[%s147_s3 + $0x8] sm:$0xff] %v102_v25  }

// kernel: discriminator_forward.15
= control target key start
LH: loop header
LB: loop body
LE: loop exit
PB: predicated region body
PF: predicated region fallthrough
CT: control target
= control target key end

     0   :  { %v977_v22 = vmov 1966171168   ;;  %v146_v24 = vlaneseq  ;;  %s1204_s1 = inlined_call_operand.vmem [shape: bf16[1024,128], index: 1, kind: input, shape index: {}]   ;;  %s1205_s0 = inlined_call_operand.vmem [shape: bf16[2,1024], index: 0, kind: input, shape index: {}]   ;;  %s1206_s2 = inlined_call_operand.vmem [shape: f32[2,128], index: 2, kind: output, shape index: {}]  }
   0x1   :  { %v908_v0 = vld [vmem:[%s1204_s1 + $0x40] sm:$0xff]   ;;  %v912_v4 = vld [vmem:[%s1204_s1 + $0x48] sm:$0xff]   ;;  %v916_v8 = vld [vmem:[%s1204_s1 + $0x50] sm:$0xff]   ;;  %v144_v23 = vunpack.c.l.s4 %v977_v22 }
   0x2   :  { %v909_v1 = vld [vmem:[%s1204_s1 + $0xc0] sm:$0xff]   ;;  %819 = vmatprep.subr.bf16.mxu0 %v908_v0  ;;  %v913_v5 = vld [vmem:[%s1204_s1 + $0xc8] sm:$0xff]   ;;  %v917_v9 = vld [vmem:[%s1204_s1 + $0xd0] sm:$0xff]   ;;  %v147_v30 = vshrl.u32 %v146_v24, 7 }
   0x3   :  { %v910_v2 = vld [vmem:[%s1204_s1] sm:$0xff]   ;;  %841 = vmatprep.subr.bf16.mxu1 %v909_v1  ;;  %v914_v6 = vld [vmem:[%s1204_s1 + $0x8] sm:$0xff]   ;;  %v918_v10 = vld [vmem:[%s1204_s1 + $0x10] sm:$0xff]   ;;  %v145_v29 = vunpack.c.0.s8 %v144_v23 }
   0x4   :  { %v911_v3 = vld [vmem:[%s1204_s1 + $0x80] sm:$0xff]   ;;  %820 = vmatpush3.bf16.msra.mxu0 %v910_v2  ;;  %v915_v7 = vld [vmem:[%s1204_s1 + $0x88] sm:$0xff]   ;;  %v919_v11 = vld [vmem:[%s1204_s1 + $0x90] sm:$0xff]  }
   0x5   :  { %842 = vmatpush3.bf16.msra.mxu1 %v911_v3  ;;  %821 = vmatprep.subr.bf16.mxu0 %v912_v4  ;;  %v920_v12 = vld [vmem:[%s1204_s1 + $0x58] sm:$0xff]   ;;  %v924_v16 = vld [vmem:[%s1204_s1 + $0x60] sm:$0xff]   ;;  %v928_v20 = vld [vmem:[%s1204_s1 + $0x68] sm:$0xff]   ;;  %v1083_v35 = vsub.s32 %v145_v29, %v147_v30 }
   0x6   :  { %843 = vmatprep.subr.bf16.mxu1 %v913_v5  ;;  %v921_v13 = vld [vmem:[%s1204_s1 + $0xd8] sm:$0xff]   ;;  %v925_v17 = vld [vmem:[%s1204_s1 + $0xe0] sm:$0xff]   ;;  %v929_v21 = vld [vmem:[%s1204_s1 + $0xe8] sm:$0xff]  }
   0x7   :  { %v922_v14 = vld [vmem:[%s1204_s1 + $0x18] sm:$0xff]   ;;  %v926_v18 = vld [vmem:[%s1204_s1 + $0x20] sm:$0xff]   ;;  %v930_v25 = vld [vmem:[%s1204_s1 + $0x28] sm:$0xff]  }
   0x8   :  { %822 = vmatpush3.bf16.msra.mxu0 %v914_v6  ;;  %v923_v15 = vld [vmem:[%s1204_s1 + $0x98] sm:$0xff]   ;;  %v927_v19 = vld [vmem:[%s1204_s1 + $0xa0] sm:$0xff]   ;;  %v931_v26 = vld [vmem:[%s1204_s1 + $0xa8] sm:$0xff]  }
   0x9   :  { %844 = vmatpush3.bf16.msra.mxu1 %v915_v7  ;;  %823 = vmatprep.subr.bf16.mxu0 %v916_v8  ;;  %v932_v27 = vld [vmem:[%s1204_s1 + $0x70] sm:$0xff]   ;;  %v936_v33 = vld [vmem:[%s1204_s1 + $0x78] sm:$0xff]   ;;  %v12_v38 = vld [vmem:[%s1205_s0] sm:$0xff] }
   0xa   :  { %845 = vmatprep.subr.bf16.mxu1 %v917_v9  ;;  %v933_v28 = vld [vmem:[%s1204_s1 + $0xf0] sm:$0xff]   ;;  %v937_v34 = vld [vmem:[%s1204_s1 + $0xf8] sm:$0xff]   ;;  %v142_v39 = vcombine.high %v12_v38, %v12_v38  ;;  %v149_v40 = vrot.slane %v12_v38, %v1083_v35  ;;  %v941_v41 = vld [vmem:[%s1204_s1 + $0x140] sm:$0xff]  }
   0xb   :  { %v934_v31 = vld [vmem:[%s1204_s1 + $0x30] sm:$0xff]   ;;  %v938_v36 = vld [vmem:[%s1204_s1 + $0x38] sm:$0xff]   ;;  %v942_v42 = vld [vmem:[%s1204_s1 + $0x1c0] sm:$0xff]  }
   0xc   :  { %824 = vmatpush3.bf16.msra.mxu0 %v918_v10  ;;  %v935_v32 = vld [vmem:[%s1204_s1 + $0xb0] sm:$0xff]   ;;  %v939_v37 = vld [vmem:[%s1204_s1 + $0xb8] sm:$0xff]   ;;  %v157_v43 = vcombine.high %v149_v40, %v149_v40  ;;  %v165_v44 = vrot.slane %v149_v40, %v1083_v35  ;;  %v1103_v45 = vrot.slane %v142_v39, %v1083_v35  ;;  %v943_v47 = vld [vmem:[%s1204_s1 + $0x100] sm:$0xff]  }
   0xd   :  { %846 = vmatpush3.bf16.msra.mxu1 %v919_v11  ;;  %825 = vmatprep.subr.bf16.mxu0 %v920_v12  ;;  %v945_v50 = vld [vmem:[%s1204_s1 + $0x148] sm:$0xff]   ;;  %v944_v52 = vld [vmem:[%s1204_s1 + $0x180] sm:$0xff]   ;;  %v949_v57 = vld [vmem:[%s1204_s1 + $0x150] sm:$0xff]  }
   0xe   :  { %847 = vmatprep.subr.bf16.mxu1 %v921_v13  ;;  %v179_v46 = vrot.slane %v157_v43, %v1083_v35  ;;  %v158_v48 = vcombine.high %v1103_v45, %v1103_v45  ;;  %v187_v49 = vcombine.high %v165_v44, %v165_v44  ;;  %v946_v54 = vld [vmem:[%s1204_s1 + $0x1c8] sm:$0xff]   ;;  %v950_v59 = vld [vmem:[%s1204_s1 + $0x1d0] sm:$0xff]   ;;  %v953_v61 = vld [vmem:[%s1204_s1 + $0x158] sm:$0xff]  }
   0xf   :  { %v947_v55 = vld [vmem:[%s1204_s1 + $0x108] sm:$0xff]   ;;  %v951_v60 = vld [vmem:[%s1204_s1 + $0x110] sm:$0xff]   ;;  %v954_v63 = vld [vmem:[%s1204_s1 + $0x1d8] sm:$0xff]  }
  0x10   :  { %826 = vmatpush3.bf16.msra.mxu0 %v922_v14  ;;  %615 = vmatprep.mubr.bf16.mxu0 %v179_v46  ;;  %v189_v51 = vcombine.high %v179_v46, %v179_v46  ;;  %v186_v53 = vrot.slane %v158_v48, %v1083_v35  ;;  %v948_v58 = vld [vmem:[%s1204_s1 + $0x188] sm:$0xff]   ;;  %v952_v62 = vld [vmem:[%s1204_s1 + $0x190] sm:$0xff]   ;;  %v955_v0 = vld [vmem:[%s1204_s1 + $0x118] sm:$0xff]  }
  0x11   :  { %848 = vmatpush3.bf16.msra.mxu1 %v923_v15  ;;  %827 = vmatprep.subr.bf16.mxu0 %v924_v16  ;;  %v957_v1 = vld [vmem:[%s1204_s1 + $0x160] sm:$0xff]   ;;  %v956_v2 = vld [vmem:[%s1204_s1 + $0x198] sm:$0xff]   ;;  %v961_v5 = vld [vmem:[%s1204_s1 + $0x168] sm:$0xff]  }
  0x12   :  { %849 = vmatprep.subr.bf16.mxu1 %v925_v17  ;;  %655 = vmatprep.mubr.bf16.mxu1 %v189_v51  ;;  %v190_v56 = vcombine.high %v186_v53, %v186_v53  ;;  %v958_v3 = vld [vmem:[%s1204_s1 + $0x1e0] sm:$0xff]   ;;  %v962_v7 = vld [vmem:[%s1204_s1 + $0x1e8] sm:$0xff]   ;;  %v965_v9 = vld [vmem:[%s1204_s1 + $0x170] sm:$0xff]   ;;  %v172_v17 = vrot.slane %v1103_v45, %v1083_v35 }
  0x13   :  { %v959_v4 = vld [vmem:[%s1204_s1 + $0x120] sm:$0xff]   ;;  %v963_v8 = vld [vmem:[%s1204_s1 + $0x128] sm:$0xff]   ;;  %v966_v11 = vld [vmem:[%s1204_s1 + $0x1f0] sm:$0xff]  }
  0x14   :  { %828 = vmatpush3.bf16.msra.mxu0 %v926_v18  ;;  %v960_v6 = vld [vmem:[%s1204_s1 + $0x1a0] sm:$0xff]   ;;  %v964_v10 = vld [vmem:[%s1204_s1 + $0x1a8] sm:$0xff]   ;;  %v967_v12 = vld [vmem:[%s1204_s1 + $0x130] sm:$0xff]  }
  0x15   :  { %850 = vmatpush3.bf16.msra.mxu1 %v927_v19  ;;  %829 = vmatprep.subr.bf16.mxu0 %v928_v20  ;;  %v969_v13 = vld [vmem:[%s1204_s1 + $0x178] sm:$0xff]   ;;  %v968_v14 = vld [vmem:[%s1204_s1 + $0x1b0] sm:$0xff]   ;;  %v188_v19 = vcombine.high %v172_v17, %v172_v17 }
  0x16   :  { %851 = vmatprep.subr.bf16.mxu1 %v929_v21  ;;  %v970_v15 = vld [vmem:[%s1204_s1 + $0x1f8] sm:$0xff]  }
  0x17   :  { %v971_v16 = vld [vmem:[%s1204_s1 + $0x138] sm:$0xff]  }
  0x18   :  { %830 = vmatpush3.bf16.msra.mxu0 %v930_v25  ;;  %v972_v18 = vld [vmem:[%s1204_s1 + $0x1b8] sm:$0xff]  }
  0x19   :  { %852 = vmatpush3.bf16.msra.mxu1 %v931_v26  ;;  %831 = vmatprep.subr.bf16.mxu0 %v932_v27 }
  0x1a   :  { %853 = vmatprep.subr.bf16.mxu1 %v933_v28 }
  0x1c   :  { %832 = vmatpush3.bf16.msra.mxu0 %v934_v31 }
  0x1d   :  { %854 = vmatpush3.bf16.msra.mxu1 %v935_v32  ;;  %833 = vmatprep.subr.bf16.mxu0 %v936_v33 }
  0x1e   :  { %855 = vmatprep.subr.bf16.mxu1 %v937_v34 }
  0x20   :  { %834 = vmatpush3.bf16.msra.mxu0 %v938_v36 }
  0x21   :  { %856 = vmatpush3.bf16.msra.mxu1 %v939_v37  ;;  %863 = vmatprep.subr.bf16.mxu0 %v941_v41 }
  0x22   :  { %885 = vmatprep.subr.bf16.mxu1 %v942_v42 }
  0x23   :  { %616 = vmatmul.mubr.bf16.vlgmr.msra.gmra.mrb[0].mxu0 %v165_v44 }
  0x24   :  { %864 = vmatpush3.bf16.msra.mxu0 %v943_v47  ;;  %656 = vmatmul.mubr.bf16.vlgmr.msra.gmra.mrb[0].mxu1 %v187_v49 }
  0x25   :  { %865 = vmatprep.subr.bf16.mxu0 %v945_v50  ;;  %886 = vmatpush3.bf16.msra.mxu1 %v944_v52 }
  0x26   :  { %695 = vmatprep.mubr.bf16.mxu0 %v186_v53  ;;  %887 = vmatprep.subr.bf16.mxu1 %v946_v54 }
  0x27   :  { %735 = vmatprep.mubr.bf16.mxu1 %v190_v56 }
  0x28   :  { %866 = vmatpush3.bf16.msra.mxu0 %v947_v55 }
  0x29   :  { %867 = vmatprep.subr.bf16.mxu0 %v949_v57  ;;  %888 = vmatpush3.bf16.msra.mxu1 %v948_v58 }
  0x2a   :  { %889 = vmatprep.subr.bf16.mxu1 %v950_v59 }
  0x2c   :  { %868 = vmatpush3.bf16.msra.mxu0 %v951_v60 }
  0x2d   :  { %869 = vmatprep.subr.bf16.mxu0 %v953_v61  ;;  %890 = vmatpush3.bf16.msra.mxu1 %v952_v62 }
  0x2e   :  { %891 = vmatprep.subr.bf16.mxu1 %v954_v63 }
  0x30   :  { %870 = vmatpush3.bf16.msra.mxu0 %v955_v0 }
  0x31   :  { %871 = vmatprep.subr.bf16.mxu0 %v957_v1  ;;  %892 = vmatpush3.bf16.msra.mxu1 %v956_v2 }
  0x32   :  { %893 = vmatprep.subr.bf16.mxu1 %v958_v3 }
  0x34   :  { %872 = vmatpush3.bf16.msra.mxu0 %v959_v4 }
  0x35   :  { %873 = vmatprep.subr.bf16.mxu0 %v961_v5  ;;  %894 = vmatpush3.bf16.msra.mxu1 %v960_v6 }
  0x36   :  { %895 = vmatprep.subr.bf16.mxu1 %v962_v7 }
  0x38   :  { %874 = vmatpush3.bf16.msra.mxu0 %v963_v8 }
  0x39   :  { %875 = vmatprep.subr.bf16.mxu0 %v965_v9  ;;  %896 = vmatpush3.bf16.msra.mxu1 %v964_v10 }
  0x3a   :  { %897 = vmatprep.subr.bf16.mxu1 %v966_v11 }
  0x3c   :  { %876 = vmatpush3.bf16.msra.mxu0 %v967_v12 }
  0x3d   :  { %877 = vmatprep.subr.bf16.mxu0 %v969_v13  ;;  %898 = vmatpush3.bf16.msra.mxu1 %v968_v14 }
  0x3e   :  { %899 = vmatprep.subr.bf16.mxu1 %v970_v15 }
  0x40   :  { %878 = vmatpush3.bf16.msra.mxu0 %v971_v16 }
  0x41   :  { %900 = vmatpush3.bf16.msra.mxu1 %v972_v18 }
  0x43   :  { %696 = vmatmul.mubr.bf16.vlgmr.msra.gmra.mrb[4].mxu0 %v172_v17 }
  0x44   :  { %736 = vmatmul.mubr.bf16.vlgmr.msra.gmra.mrb[4].mxu1 %v188_v19 }
  0xf6   :  { %v835_v20 = vpop.f32.mrb[0].mxu0 }
  0xf7   :  { %v836_v21 = vpop.f32.mrb[1].mxu0  ;;  %v857_v22 = vpop.f32.mrb[0].mxu1 }
  0xf8   :  { %v837_v23 = vadd.f32 %v836_v21, %v835_v20  ;;  %v838_v24 = vpop.f32.mrb[2].mxu0  ;;  %v858_v25 = vpop.f32.mrb[1].mxu1 }
  0xf9   :  { %v839_v26 = vpop.f32.mrb[3].mxu0  ;;  %v859_v27 = vadd.f32 %v858_v25, %v857_v22  ;;  %v860_v28 = vpop.f32.mrb[2].mxu1 }
  0xfa   :  { %v861_v29 = vpop.f32.mrb[3].mxu1 }
  0xfb   :  { %v658_v30 = vadd.f32 %v859_v27, %v837_v23 }
 0x116   :  { %v879_v31 = vpop.f32.mrb[4].mxu0 }
 0x117   :  { %v880_v32 = vpop.f32.mrb[5].mxu0  ;;  %v901_v33 = vpop.f32.mrb[4].mxu1 }
 0x118   :  { %v881_v34 = vadd.f32 %v880_v32, %v879_v31  ;;  %v882_v35 = vpop.f32.mrb[6].mxu0  ;;  %v902_v36 = vpop.f32.mrb[5].mxu1 }
 0x119   :  { %v883_v37 = vpop.f32.mrb[7].mxu0  ;;  %v903_v39 = vadd.f32 %v902_v36, %v901_v33  ;;  %v904_v40 = vpop.f32.mrb[6].mxu1 }
 0x11a   :  { %v698_v38 = vadd.f32 %v881_v34, %v658_v30  ;;  %v905_v41 = vpop.f32.mrb[7].mxu1 }
 0x11c   :  { %v738_v42 = vadd.f32 %v903_v39, %v698_v38 }
 0x11e   :  { %v818_v43 = vmul.f32 -1.442695, %v738_v42 }
 0x120   :  { %973 = vpow2.f32 %v818_v43 }
 0x12a   :  { %v974_v44 = vpop.eup %973 }
 0x12b   :  { %v746_v45 = vadd.f32 1.0, %v974_v44 }
 0x12d   :  { %975 = vrcp.f32 %v746_v45 }
 0x137   :  { %v976_v46 = vpop.eup %975 }
 0x138   :  { %749 = vst [vmem:[%s1206_s2] sm:$0x3] %v976_v46 }

</bundles_post_ra>
